<compile_context>
chip_gen: v7x
topology: tpu7x:2x2x1
jax: 0.10.0
libtpu: 0.0.40
codegen_flags: <defaults>
</compile_context>

<pallas_src>
import jax
import jax.numpy as jnp
import numpy as np
from jax.experimental import pallas as pl
from jax.experimental.pallas import tpu as pltpu


# ----------------------------------------------------------------------------
# Kernels
# ----------------------------------------------------------------------------
def make_conv_kernel(nb):
    """conv1 + ReLU + 2x2 max-pool for a block of `nb` samples.

    x_ref : (nb, 40, 32) f32   per sample: rows 0-15 = even image rows (14 used),
                               rows 16-31 = odd image rows (14 used), rows 32-39
                               zero pad; 32 cols = 28 image cols + 4 zero pad.
    w_ref : (192, 1536) f32    banded conv RHS: row = s*32 + j (s = di+ki, j = col),
                               col = di*768 + dj*384 + pw*32 + c.
    b_ref : (1, 384) f32       conv bias tiled per pw (lane = pw*32 + c).
    o_ref : (nb, 12, 384) bf16 pooled output, [n, ph, pw*32 + c].
    """
    def kernel(x_ref, w_ref, b_ref, o_ref):
        wc = w_ref[...]                                     # (192, 1536)
        acc = None
        # s = di + ki selects which 16-row slab of the parity-split image is
        # needed; the banded RHS columns already separate di and dj so the
        # 2x2 pool partners land in disjoint 384-lane groups.
        for s in range(6):
            off = (s % 2) * 16 + (s // 2)                   # slab start row
            lhs = x_ref[:, off:off + 16, :].reshape(nb * 16, 32)
            part = jnp.dot(lhs, wc[s * 32:(s + 1) * 32, :],
                           preferred_element_type=jnp.float32)
            acc = part if acc is None else acc + part       # (nb*16, 1536)
        # 2x2 max-pool = max over the 4 (di, dj) lane-group slices.
        z = jnp.maximum(jnp.maximum(acc[:, 0:384], acc[:, 384:768]),
                        jnp.maximum(acc[:, 768:1152], acc[:, 1152:1536]))
        # bias + ReLU after the pool (max commutes with +const, ReLU monotone).
        z = jnp.maximum(z + b_ref[...], 0.0)                # (nb*16, 384)
        # rows 12..15 of each 16-row sample slab are junk -> drop on store.
        o_ref[...] = z.reshape(nb, 16, 384)[:, :12, :].astype(o_ref.dtype)

    return kernel


def fc_kernel(x_ref, w1_ref, b1_ref, w2_ref, b2_ref, o_ref):
    """fc1 (bf16 x bf16 -> f32) -> ReLU -> fc2 (f32); weights stay VMEM-resident."""
    h = jnp.dot(x_ref[...], w1_ref[...], preferred_element_type=jnp.float32)
    h = jnp.maximum(h + b1_ref[...], 0.0)
    o_ref[...] = (
        jnp.dot(h, w2_ref[...], preferred_element_type=jnp.float32) + b2_ref[...]
    )


# ----------------------------------------------------------------------------
# Pallas wrappers
# ----------------------------------------------------------------------------
def conv_relu_pool(xprep, wcat, bconv, nb):
    n_pad = xprep.shape[0]
    return pl.pallas_call(
        make_conv_kernel(nb),
        out_shape=jax.ShapeDtypeStruct((n_pad, 12, 384), jnp.bfloat16),
        grid=(n_pad // nb,),
        in_specs=[
            pl.BlockSpec((nb, 40, 32), lambda i: (i, 0, 0)),
            pl.BlockSpec((192, 1536), lambda i: (0, 0)),     # banded W, resident
            pl.BlockSpec((1, 384), lambda i: (0, 0)),
        ],
        out_specs=pl.BlockSpec((nb, 12, 384), lambda i: (i, 0, 0)),
        compiler_params=pltpu.CompilerParams(dimension_semantics=("parallel",)),
    )(xprep, wcat, bconv)


def fc_stack(x_flat, w1, b1, w2p, b2p, nb_fc):
    n_pad = x_flat.shape[0]
    return pl.pallas_call(
        fc_kernel,
        out_shape=jax.ShapeDtypeStruct((n_pad, 128), jnp.float32),
        grid=(n_pad // nb_fc,),
        in_specs=[
            pl.BlockSpec((nb_fc, 4608), lambda i: (i, 0)),
            pl.BlockSpec((4608, 128), lambda i: (0, 0)),     # fc1 W (bf16), resident
            pl.BlockSpec((1, 128), lambda i: (0, 0)),
            pl.BlockSpec((128, 128), lambda i: (0, 0)),      # fc2 W (lane-padded)
            pl.BlockSpec((1, 128), lambda i: (0, 0)),
        ],
        out_specs=pl.BlockSpec((nb_fc, 128), lambda i: (i, 0)),
        compiler_params=pltpu.CompilerParams(dimension_semantics=("parallel",)),
    )(x_flat, w1, b1, w2p, b2p)


# ----------------------------------------------------------------------------
# Glue: tiny input relayout / parameter setup (plain JAX, negligible HBM)
# ----------------------------------------------------------------------------
def _pick_block(n_pad, candidates):
    """Largest block in `candidates` dividing n_pad, preferring >= 2 grid steps."""
    two_step = [b for b in candidates if n_pad % b == 0 and n_pad // b >= 2]
    if two_step:
        return max(two_step)
    fits = [b for b in candidates if n_pad % b == 0]
    return max(fits) if fits else n_pad


def prep_images(x, n_pad):
    """(N, 1, 28, 28) NCHW -> (n_pad, 40, 32): batch pad, width pad to 32,
    rows split by parity (rows 0-15 even, 16-31 odd), 8 extra zero rows."""
    n = x.shape[0]
    xs = jnp.pad(x[:, 0], ((0, n_pad - n), (0, 0), (0, 4)))       # (n_pad, 28, 32)
    xsp = xs.reshape(n_pad, 14, 2, 32).transpose(0, 2, 1, 3)      # (n_pad, 2, 14, 32)
    xsp = jnp.pad(xsp, ((0, 0), (0, 0), (0, 2), (0, 0)))          # (n_pad, 2, 16, 32)
    xsp = xsp.reshape(n_pad, 32, 32)
    return jnp.pad(xsp, ((0, 0), (0, 8), (0, 0)))                 # (n_pad, 40, 32)


def init_params(key):
    """Deterministic synthetic parameters, shapes match the PyTorch module."""
    k = jax.random.split(key, 6)
    return {
        "conv_w": jax.random.normal(k[0], (32, 1, 5, 5), jnp.float32) * 0.2,
        "conv_b": jax.random.normal(k[1], (32,), jnp.float32) * 0.1,
        "fc1_w": jax.random.normal(k[2], (128, 32 * 12 * 12), jnp.float32) * 0.02,
        "fc1_b": jax.random.normal(k[3], (128,), jnp.float32) * 0.02,
        "fc2_w": jax.random.normal(k[4], (10, 128), jnp.float32) * 0.05,
        "fc2_b": jax.random.normal(k[5], (10,), jnp.float32) * 0.05,
    }


def kernel_params(params):
    """Re-layout PyTorch-convention parameters for the Pallas kernels."""
    # --- banded conv RHS -----------------------------------------------------
    # Wband[ki, j, dj, pw, c] = conv_w[c, ki, j - (2*pw + dj)]  (0 <= kj <= 4)
    wt = jnp.transpose(params["conv_w"][:, 0], (1, 2, 0))         # (ki, kj, c)
    j_idx = jnp.arange(32).reshape(1, 32, 1, 1, 1)
    dj_idx = jnp.arange(2).reshape(1, 1, 2, 1, 1)
    pw_idx = jnp.arange(12).reshape(1, 1, 1, 12, 1)
    wband = jnp.zeros((5, 32, 2, 12, 32), jnp.float32)
    for kj in range(5):
        sel = (j_idx - 2 * pw_idx - dj_idx == kj).astype(jnp.float32)
        wband = wband + sel * wt[:, kj].reshape(5, 1, 1, 1, 32)
    wband = wband.reshape(5, 32, 768)                             # per-ki, cols=(dj,pw,c)
    # Fold di in: for slab s = di + ki, di=0 half uses ki=s, di=1 half uses ki=s-1.
    wcat = jnp.zeros((6, 32, 1536), jnp.float32)
    for s in range(6):
        if s <= 4:
            wcat = wcat.at[s, :, :768].set(wband[s])
        if s >= 1:
            wcat = wcat.at[s, :, 768:].set(wband[s - 1])
    wcat = wcat.reshape(192, 1536)
    bconv = jnp.tile(params["conv_b"], 12).reshape(1, 384)        # lane = pw*32 + c

    # --- fc weights ----------------------------------------------------------
    # Our pooled flatten order is (ph, pw, c); PyTorch flattens as (c, ph, pw).
    w1 = (
        params["fc1_w"].T.reshape(32, 12, 12, 128)
        .transpose(1, 2, 0, 3)
        .reshape(32 * 12 * 12, 128)
    ).astype(jnp.bfloat16)                                        # bf16 stream
    b1 = params["fc1_b"].reshape(1, 128)
    # Pad fc2 to 128 output lanes (zeros) so the final store is lane-dense.
    w2p = jnp.zeros((128, 128), jnp.float32).at[:, :10].set(params["fc2_w"].T)
    b2p = jnp.zeros((1, 128), jnp.float32).at[0, :10].set(params["fc2_b"])
    return wcat, bconv, w1, b1, w2p, b2p


def target_model_forward(x, params):
    """x: (N, 1, 28, 28) float32 (NCHW, like PyTorch).  Returns (N, 10)."""
    n = x.shape[0]
    n_pad = ((n + 7) // 8) * 8
    nb_conv = _pick_block(n_pad, (16, 8))
    nb_fc = _pick_block(n_pad, (256, 128, 64, 32, 16, 8))

    wcat, bconv, w1, b1, w2p, b2p = kernel_params(params)
    xprep = prep_images(x, n_pad)                                 # (n_pad, 40, 32)
    pooled = conv_relu_pool(xprep, wcat, bconv, nb_conv)          # (n_pad, 12, 384) bf16
    flat = pooled.reshape(n_pad, 4608)                            # free row-major view
    out = fc_stack(flat, w1, b1, w2p, b2p, nb_fc)                 # (n_pad, 128) f32
    return out[:n, :10]


# ----------------------------------------------------------------------------
# Pure-JAX reference (mirrors the PyTorch forward exactly, NCHW, full f32)
# ----------------------------------------------------------------------------
def reference_forward(x, params):
    hi = jax.lax.Precision.HIGHEST
    n = x.shape[0]
    xs = x[:, 0]
    patches = jnp.stack(
        [xs[:, ki:ki + 24, kj:kj + 24] for ki in range(5) for kj in range(5)],
        axis=-1,
    )  # (N, 24, 24, 25)
    wm = params["conv_w"][:, 0].reshape(32, 25)                   # (C, 25)
    conv = jnp.einsum("nhwt,ct->nchw", patches, wm, precision=hi)
    conv = conv + params["conv_b"][None, :, None, None]
    conv = jnp.maximum(conv, 0.0)
    pooled = conv.reshape(n, 32, 12, 2, 12, 2).max(axis=(3, 5))   # (N, 32, 12, 12)
    flat = pooled.reshape(n, -1)                                  # (C, H, W) order
    h = jnp.maximum(
        jnp.matmul(flat, params["fc1_w"].T, precision=hi) + params["fc1_b"], 0.0
    )
    return jnp.matmul(h, params["fc2_w"].T, precision=hi) + params["fc2_b"]


# ----------------------------------------------------------------------------
if __name__ == "__main__":
    key = jax.random.PRNGKey(0)
    kx, kp = jax.random.split(key)

    # Input shape is pinned by fc1 (32*12*12): 28x28, 1 channel.  Small batch.
    x = jax.random.normal(kx, (2, 1, 28, 28), jnp.float32)
    params = init_params(kp)

    fwd = jax.jit(target_model_forward)
    out = jax.block_until_ready(fwd(x, params))

    ref = jax.block_until_ready(reference_forward(x, params))
    assert out.shape == (2, 10), out.shape
    # bf16 streaming of the pooled activations / fc1 weight (f32 accumulation)
    # gives ~1e-2-scale deviation vs. the all-f32 HIGHEST-precision reference.
    np.testing.assert_allclose(np.asarray(out), np.asarray(ref), rtol=2e-2, atol=2e-2)

    print("KERNEL_OK")
</pallas_src>

<mosaic_0001>
module attributes {stable_mosaic.version = 11 : i64} {
  func.func @kernel(%arg0: i32, %arg1: memref<8x40x32xf32, #tpu.memory_space<vmem>>, %arg2: memref<192x1536xf32, #tpu.memory_space<vmem>>, %arg3: memref<1x384xf32, #tpu.memory_space<vmem>>, %arg4: memref<8x12x384xbf16, #tpu.memory_space<vmem>>) attributes {dimension_semantics = [#tpu.dimension_semantics<parallel>], iteration_bounds = array<i64: 1>, scalar_prefetch = 0 : i64, scratch_operands = 0 : i64, tpu.core_type = #tpu.core_type<tc>, window_params = [{transform_indices = @transform_0, window_bounds = array<i64: 8, 40, 32>}, {pipeline_mode = #tpu.pipeline_mode<synchronous>, transform_indices = @transform_1, window_bounds = array<i64: 192, 1536>}, {pipeline_mode = #tpu.pipeline_mode<synchronous>, transform_indices = @transform_2, window_bounds = array<i64: 1, 384>}, {transform_indices = @transform_3, window_bounds = array<i64: 8, 12, 384>}]} {
    %c0 = arith.constant 0 : index
    %c0_0 = arith.constant 0 : index
    %0 = vector.load %arg2[%c0, %c0_0] : memref<192x1536xf32, #tpu.memory_space<vmem>>, vector<192x1536xf32>
    %c0_1 = arith.constant 0 : index
    %c0_2 = arith.constant 0 : index
    %c0_3 = arith.constant 0 : index
    %1 = vector.load %arg1[%c0_1, %c0_2, %c0_3] : memref<8x40x32xf32, #tpu.memory_space<vmem>>, vector<8x16x32xf32>
    %2 = vector.shape_cast %1 : vector<8x16x32xf32> to vector<128x32xf32>
    %3 = vector.extract_strided_slice %0 {offsets = [0, 0], sizes = [32, 1536], strides = [1, 1]} : vector<192x1536xf32> to vector<32x1536xf32>
    %cst = arith.constant dense<0.000000e+00> : vector<128x1536xf32>
    %4 = tpu.matmul %2, %3, %cst {dimension_numbers = #tpu.dot_dimension_numbers<[1], [0], [0], [1], [0, 0, 1, 1], [], []>} : vector<128x32xf32>, vector<32x1536xf32>, vector<128x1536xf32> -> vector<128x1536xf32>
    %c0_4 = arith.constant 0 : index
    %c16 = arith.constant 16 : index
    %c0_5 = arith.constant 0 : index
    %5 = vector.load %arg1[%c0_4, %c16, %c0_5] : memref<8x40x32xf32, #tpu.memory_space<vmem>>, vector<8x16x32xf32>
    %6 = vector.shape_cast %5 : vector<8x16x32xf32> to vector<128x32xf32>
    %7 = vector.extract_strided_slice %0 {offsets = [32, 0], sizes = [32, 1536], strides = [1, 1]} : vector<192x1536xf32> to vector<32x1536xf32>
    %cst_6 = arith.constant dense<0.000000e+00> : vector<128x1536xf32>
    %8 = tpu.matmul %6, %7, %cst_6 {dimension_numbers = #tpu.dot_dimension_numbers<[1], [0], [0], [1], [0, 0, 1, 1], [], []>} : vector<128x32xf32>, vector<32x1536xf32>, vector<128x1536xf32> -> vector<128x1536xf32>
    %9 = arith.addf %4, %8 : vector<128x1536xf32>
    %c0_7 = arith.constant 0 : index
    %c1 = arith.constant 1 : index
    %c0_8 = arith.constant 0 : index
    %10 = vector.load %arg1[%c0_7, %c1, %c0_8] : memref<8x40x32xf32, #tpu.memory_space<vmem>>, vector<8x16x32xf32>
    %11 = vector.shape_cast %10 : vector<8x16x32xf32> to vector<128x32xf32>
    %12 = vector.extract_strided_slice %0 {offsets = [64, 0], sizes = [32, 1536], strides = [1, 1]} : vector<192x1536xf32> to vector<32x1536xf32>
    %cst_9 = arith.constant dense<0.000000e+00> : vector<128x1536xf32>
    %13 = tpu.matmul %11, %12, %cst_9 {dimension_numbers = #tpu.dot_dimension_numbers<[1], [0], [0], [1], [0, 0, 1, 1], [], []>} : vector<128x32xf32>, vector<32x1536xf32>, vector<128x1536xf32> -> vector<128x1536xf32>
    %14 = arith.addf %9, %13 : vector<128x1536xf32>
    %c0_10 = arith.constant 0 : index
    %c17 = arith.constant 17 : index
    %c0_11 = arith.constant 0 : index
    %15 = vector.load %arg1[%c0_10, %c17, %c0_11] : memref<8x40x32xf32, #tpu.memory_space<vmem>>, vector<8x16x32xf32>
    %16 = vector.shape_cast %15 : vector<8x16x32xf32> to vector<128x32xf32>
    %17 = vector.extract_strided_slice %0 {offsets = [96, 0], sizes = [32, 1536], strides = [1, 1]} : vector<192x1536xf32> to vector<32x1536xf32>
    %cst_12 = arith.constant dense<0.000000e+00> : vector<128x1536xf32>
    %18 = tpu.matmul %16, %17, %cst_12 {dimension_numbers = #tpu.dot_dimension_numbers<[1], [0], [0], [1], [0, 0, 1, 1], [], []>} : vector<128x32xf32>, vector<32x1536xf32>, vector<128x1536xf32> -> vector<128x1536xf32>
    %19 = arith.addf %14, %18 : vector<128x1536xf32>
    %c0_13 = arith.constant 0 : index
    %c2 = arith.constant 2 : index
    %c0_14 = arith.constant 0 : index
    %20 = vector.load %arg1[%c0_13, %c2, %c0_14] : memref<8x40x32xf32, #tpu.memory_space<vmem>>, vector<8x16x32xf32>
    %21 = vector.shape_cast %20 : vector<8x16x32xf32> to vector<128x32xf32>
    %22 = vector.extract_strided_slice %0 {offsets = [128, 0], sizes = [32, 1536], strides = [1, 1]} : vector<192x1536xf32> to vector<32x1536xf32>
    %cst_15 = arith.constant dense<0.000000e+00> : vector<128x1536xf32>
    %23 = tpu.matmul %21, %22, %cst_15 {dimension_numbers = #tpu.dot_dimension_numbers<[1], [0], [0], [1], [0, 0, 1, 1], [], []>} : vector<128x32xf32>, vector<32x1536xf32>, vector<128x1536xf32> -> vector<128x1536xf32>
    %24 = arith.addf %19, %23 : vector<128x1536xf32>
    %c0_16 = arith.constant 0 : index
    %c18 = arith.constant 18 : index
    %c0_17 = arith.constant 0 : index
    %25 = vector.load %arg1[%c0_16, %c18, %c0_17] : memref<8x40x32xf32, #tpu.memory_space<vmem>>, vector<8x16x32xf32>
    %26 = vector.shape_cast %25 : vector<8x16x32xf32> to vector<128x32xf32>
    %27 = vector.extract_strided_slice %0 {offsets = [160, 0], sizes = [32, 1536], strides = [1, 1]} : vector<192x1536xf32> to vector<32x1536xf32>
    %cst_18 = arith.constant dense<0.000000e+00> : vector<128x1536xf32>
    %28 = tpu.matmul %26, %27, %cst_18 {dimension_numbers = #tpu.dot_dimension_numbers<[1], [0], [0], [1], [0, 0, 1, 1], [], []>} : vector<128x32xf32>, vector<32x1536xf32>, vector<128x1536xf32> -> vector<128x1536xf32>
    %29 = arith.addf %24, %28 : vector<128x1536xf32>
    %30 = vector.extract_strided_slice %29 {offsets = [0, 0], sizes = [128, 384], strides = [1, 1]} : vector<128x1536xf32> to vector<128x384xf32>
    %31 = vector.extract_strided_slice %29 {offsets = [0, 384], sizes = [128, 384], strides = [1, 1]} : vector<128x1536xf32> to vector<128x384xf32>
    %32 = arith.maximumf %30, %31 : vector<128x384xf32>
    %33 = vector.extract_strided_slice %29 {offsets = [0, 768], sizes = [128, 384], strides = [1, 1]} : vector<128x1536xf32> to vector<128x384xf32>
    %34 = vector.extract_strided_slice %29 {offsets = [0, 1152], sizes = [128, 384], strides = [1, 1]} : vector<128x1536xf32> to vector<128x384xf32>
    %35 = arith.maximumf %33, %34 : vector<128x384xf32>
    %36 = arith.maximumf %32, %35 : vector<128x384xf32>
    %c0_19 = arith.constant 0 : index
    %c0_20 = arith.constant 0 : index
    %37 = vector.load %arg3[%c0_19, %c0_20] : memref<1x384xf32, #tpu.memory_space<vmem>>, vector<1x384xf32>
    %38 = vector.broadcast %37 : vector<1x384xf32> to vector<128x384xf32>
    %39 = arith.addf %36, %38 : vector<128x384xf32>
    %cst_21 = arith.constant 0.000000e+00 : f32
    %40 = vector.broadcast %cst_21 : f32 to vector<128x384xf32>
    %41 = arith.maximumf %39, %40 : vector<128x384xf32>
    %42 = vector.shape_cast %41 : vector<128x384xf32> to vector<8x16x384xf32>
    %43 = vector.extract_strided_slice %42 {offsets = [0, 0, 0], sizes = [8, 12, 384], strides = [1, 1, 1]} : vector<8x16x384xf32> to vector<8x12x384xf32>
    %44 = arith.truncf %43 : vector<8x12x384xf32> to vector<8x12x384xbf16>
    %c0_22 = arith.constant 0 : index
    %c0_23 = arith.constant 0 : index
    %c0_24 = arith.constant 0 : index
    %45 = vector.load %arg4[%c0_22, %c0_23, %c0_24] : memref<8x12x384xbf16, #tpu.memory_space<vmem>>, vector<8x12x384xbf16>
    tpu.vector_store %arg4[%c0_22, %c0_23, %c0_24], %44 {strides = array<i32>} : memref<8x12x384xbf16, #tpu.memory_space<vmem>>, vector<8x12x384xbf16>,
    return
  }
  func.func @transform_0(%arg0: i32) -> (i32, i32, i32) {
    %c0_i32 = arith.constant 0 : i32
    %c0_i32_0 = arith.constant 0 : i32
    %c0_i32_1 = arith.constant 0 : i32
    return %arg0, %c0_i32, %c0_i32_0 : i32, i32, i32
  }
  func.func @transform_1(%arg0: i32) -> (i32, i32) {
    %c0_i32 = arith.constant 0 : i32
    %c0_i32_0 = arith.constant 0 : i32
    %c0_i32_1 = arith.constant 0 : i32
    return %c0_i32, %c0_i32_0 : i32, i32
  }
  func.func @transform_2(%arg0: i32) -> (i32, i32) {
    %c0_i32 = arith.constant 0 : i32
    %c0_i32_0 = arith.constant 0 : i32
    %c0_i32_1 = arith.constant 0 : i32
    return %c0_i32, %c0_i32_0 : i32, i32
  }
  func.func @transform_3(%arg0: i32) -> (i32, i32, i32) {
    %c0_i32 = arith.constant 0 : i32
    %c0_i32_0 = arith.constant 0 : i32
    %c0_i32_1 = arith.constant 0 : i32
    return %arg0, %c0_i32, %c0_i32_0 : i32, i32, i32
  }
}

module attributes {stable_mosaic.version = 11 : i64} {
  func.func @fc_kernel(%arg0: i32, %arg1: memref<8x4608xbf16, #tpu.memory_space<vmem>>, %arg2: memref<4608x128xbf16, #tpu.memory_space<vmem>>, %arg3: memref<1x128xf32, #tpu.memory_space<vmem>>, %arg4: memref<128x128xf32, #tpu.memory_space<vmem>>, %arg5: memref<1x128xf32, #tpu.memory_space<vmem>>, %arg6: memref<8x128xf32, #tpu.memory_space<vmem>>) attributes {dimension_semantics = [#tpu.dimension_semantics<parallel>], iteration_bounds = array<i64: 1>, scalar_prefetch = 0 : i64, scratch_operands = 0 : i64, tpu.core_type = #tpu.core_type<tc>, window_params = [{transform_indices = @transform_0, window_bounds = array<i64: 8, 4608>}, {pipeline_mode = #tpu.pipeline_mode<synchronous>, transform_indices = @transform_1, window_bounds = array<i64: 4608, 128>}, {pipeline_mode = #tpu.pipeline_mode<synchronous>, transform_indices = @transform_2, window_bounds = array<i64: 1, 128>}, {pipeline_mode = #tpu.pipeline_mode<synchronous>, transform_indices = @transform_3, window_bounds = array<i64: 128, 128>}, {pipeline_mode = #tpu.pipeline_mode<synchronous>, transform_indices = @transform_4, window_bounds = array<i64: 1, 128>}, {transform_indices = @transform_5, window_bounds = array<i64: 8, 128>}]} {
    %c0 = arith.constant 0 : index
    %c0_0 = arith.constant 0 : index
    %0 = vector.load %arg1[%c0, %c0_0] : memref<8x4608xbf16, #tpu.memory_space<vmem>>, vector<8x4608xbf16>
    %c0_1 = arith.constant 0 : index
    %c0_2 = arith.constant 0 : index
    %1 = vector.load %arg2[%c0_1, %c0_2] : memref<4608x128xbf16, #tpu.memory_space<vmem>>, vector<4608x128xbf16>
    %cst = arith.constant dense<0.000000e+00> : vector<8x128xf32>
    %2 = tpu.matmul %0, %1, %cst {dimension_numbers = #tpu.dot_dimension_numbers<[1], [0], [0], [1], [0, 0, 1, 1], [], []>} : vector<8x4608xbf16>, vector<4608x128xbf16>, vector<8x128xf32> -> vector<8x128xf32>
    %c0_3 = arith.constant 0 : index
    %c0_4 = arith.constant 0 : index
    %3 = vector.load %arg3[%c0_3, %c0_4] : memref<1x128xf32, #tpu.memory_space<vmem>>, vector<1x128xf32>
    %4 = vector.broadcast %3 : vector<1x128xf32> to vector<8x128xf32>
    %5 = arith.addf %2, %4 : vector<8x128xf32>
    %cst_5 = arith.constant 0.000000e+00 : f32
    %6 = vector.broadcast %cst_5 : f32 to vector<8x128xf32>
    %7 = arith.maximumf %5, %6 : vector<8x128xf32>
    %c0_6 = arith.constant 0 : index
    %c0_7 = arith.constant 0 : index
    %8 = vector.load %arg4[%c0_6, %c0_7] : memref<128x128xf32, #tpu.memory_space<vmem>>, vector<128x128xf32>
    %cst_8 = arith.constant dense<0.000000e+00> : vector<8x128xf32>
    %9 = tpu.matmul %7, %8, %cst_8 {dimension_numbers = #tpu.dot_dimension_numbers<[1], [0], [0], [1], [0, 0, 1, 1], [], []>} : vector<8x128xf32>, vector<128x128xf32>, vector<8x128xf32> -> vector<8x128xf32>
    %c0_9 = arith.constant 0 : index
    %c0_10 = arith.constant 0 : index
    %10 = vector.load %arg5[%c0_9, %c0_10] : memref<1x128xf32, #tpu.memory_space<vmem>>, vector<1x128xf32>
    %11 = vector.broadcast %10 : vector<1x128xf32> to vector<8x128xf32>
    %12 = arith.addf %9, %11 : vector<8x128xf32>
    %c0_11 = arith.constant 0 : index
    %c0_12 = arith.constant 0 : index
    %13 = vector.load %arg6[%c0_11, %c0_12] : memref<8x128xf32, #tpu.memory_space<vmem>>, vector<8x128xf32>
    tpu.vector_store %arg6[%c0_11, %c0_12], %12 {strides = array<i32>} : memref<8x128xf32, #tpu.memory_space<vmem>>, vector<8x128xf32>,
    return
  }
  func.func @transform_0(%arg0: i32) -> (i32, i32) {
    %c0_i32 = arith.constant 0 : i32
    %c0_i32_0 = arith.constant 0 : i32
    return %arg0, %c0_i32 : i32, i32
  }
  func.func @transform_1(%arg0: i32) -> (i32, i32) {
    %c0_i32 = arith.constant 0 : i32
    %c0_i32_0 = arith.constant 0 : i32
    %c0_i32_1 = arith.constant 0 : i32
    return %c0_i32, %c0_i32_0 : i32, i32
  }
  func.func @transform_2(%arg0: i32) -> (i32, i32) {
    %c0_i32 = arith.constant 0 : i32
    %c0_i32_0 = arith.constant 0 : i32
    %c0_i32_1 = arith.constant 0 : i32
    return %c0_i32, %c0_i32_0 : i32, i32
  }
  func.func @transform_3(%arg0: i32) -> (i32, i32) {
    %c0_i32 = arith.constant 0 : i32
    %c0_i32_0 = arith.constant 0 : i32
    %c0_i32_1 = arith.constant 0 : i32
    return %c0_i32, %c0_i32_0 : i32, i32
  }
  func.func @transform_4(%arg0: i32) -> (i32, i32) {
    %c0_i32 = arith.constant 0 : i32
    %c0_i32_0 = arith.constant 0 : i32
    %c0_i32_1 = arith.constant 0 : i32
    return %c0_i32, %c0_i32_0 : i32, i32
  }
  func.func @transform_5(%arg0: i32) -> (i32, i32) {
    %c0_i32 = arith.constant 0 : i32
    %c0_i32_0 = arith.constant 0 : i32
    return %arg0, %c0_i32 : i32, i32
  }
}

</mosaic_0001>

<bundles_post_ra>
// kernel: tile.8
= control target key start
LH: loop header
LB: loop body
LE: loop exit
PB: predicated region body
PF: predicated region fallthrough
CT: control target
= control target key end

     0   :  { %s28_s0 = inlined_call_operand.vmem [shape: f32[32], index: 0, kind: input, shape index: {}]   ;;  %s29_s1 = inlined_call_operand.vmem [shape: f32[12,32], index: 1, kind: output, shape index: {}]  }
   0x1   :  { %v4_v0 = vld [vmem:[%s28_s0] ss:$0 sm:$0xff] }
   0x2   :  { %5 = vst [vmem:[%s29_s1] sm:$0xff] %v4_v0  ;;  %8 = vst [vmem:[%s29_s1 + $0x8] sm:$0xff] %v4_v0 }

// kernel: tile.9
= control target key start
LH: loop header
LB: loop body
LE: loop exit
PB: predicated region body
PF: predicated region fallthrough
CT: control target
= control target key end

     0   :  { %s49_s8 = smov 96   ;;  %vm3_vm0 = vcmask 261120   ;;  %s51_s15 = smov 64   ;;  %vm9_vm1 = vcmask 1048320   ;;  %vm15_vm2 = vcmask 785920   ;;  %vm21_vm3 = vcmask 523520   ;;  %s83_s0 = inlined_call_operand.vmem [shape: f32[12,32], index: 0, kind: input, shape index: {}]   ;;  %s84_s1 = inlined_call_operand.vmem [shape: f32[1,384], index: 1, kind: output, shape index: {}]  }
   0x1   :  { %v41_v0 = vld [vmem:[%s83_s0 + $0x3] ss:$4 sm:$0x7]   ;;  %v42_v1 = vld [vmem:[%s83_s0 + $0x2] ss:$4 sm:$0x7]  }
   0x2   :  { %7 = vrot.lane.b32.xlu0 %v41_v0, %s49_s8  ;;  %v43_v2 = vld [vmem:[%s83_s0 + $0x1] ss:$4 sm:$0x7]   ;;  %v2_v3 = vld [vmem:[%s83_s0] ss:$4 sm:$0x7]  }
   0x3   :  { %s50_s0 = smov 32   ;;  %4 = vst.msk [vmem:[#allocation0] ss:$8 sm:$0x7] %vm3_vm0, %v2_v3  }
   0x4   :  { %19 = vrot.lane.b32.xlu1 %v43_v2, %s50_s0 }
   0x6   :  { %13 = vrot.lane.b32.xlu0 %v42_v1, %s51_s15 }
  0x74   :  { %v8_v4 = vpop.permute.xlu0 %7  }
  0x75   :  { %10 = vst.msk [vmem:[#allocation0] ss:$8 sm:$0x7] %vm9_vm1, %v8_v4  }
  0x76   :  { %v20_v5 = vpop.permute.xlu1 %19  }
  0x78   :  { %v14_v6 = vpop.permute.xlu0 %13  }
  0x79   :  { %16 = vst.msk [vmem:[#allocation0] ss:$8 sm:$0x7] %vm15_vm2, %v14_v6  }
  0x7a   :  { %22 = vst.msk [vmem:[#allocation0] ss:$8 sm:$0x7] %vm21_vm3, %v20_v5  }
  0x81   :  { %v26_v7 = vld [vmem:[#allocation0] sm:$0x1]  ;;  %v30_v8 = vld [vmem:[#allocation0 + $0x8] sm:$0x1]  ;;  %v35_v9 = vld [vmem:[#allocation0 + $0x10] sm:$0x1] }
  0x82   :  { %28 = vst [vmem:[%s84_s1] sm:$0x1] %v26_v7  ;;  %44 = vst [vmem:[%s84_s1 + $0x1] sm:$0x1] %v30_v8 }
  0x83   :  { %45 = vst [vmem:[%s84_s1 + $0x2] sm:$0x1] %v35_v9 }

// kernel: target_model_forward.2
= control target key start
LH: loop header
LB: loop body
LE: loop exit
PB: predicated region body
PF: predicated region fallthrough
CT: control target
= control target key end

     0   :  { %v9593_v3 = vmov 0.0   ;;  %vm334_vm0 = vcmask 261120   ;;  %s13367_s1 = inlined_call_operand.vmem [shape: f32[192,1536], index: 1, kind: input, shape index: {}]   ;;  %s13368_s0 = inlined_call_operand.vmem [shape: f32[8,40,32], index: 0, kind: input, shape index: {}]   ;;  %s13369_s2 = inlined_call_operand.vmem [shape: f32[1,384], index: 2, kind: input, shape index: {}]   ;;  %s13370_s3 = inlined_call_operand.vmem [shape: bf16[8,12,384], index: 3, kind: output, shape index: {}]  }
   0x1   :  { %v63_v0 = vld [vmem:[%s13367_s1 + $0x188] sm:$0xff]  ;;  %v65_v2 = vld [vmem:[%s13367_s1 + $0x198] sm:$0xff]  ;;  %447 = vmatprep.mubr.f32.mxu0 %v9593_v3  ;;  %608 = vmatprep.mubr.f32.mxu1 %v9593_v3  ;;  %v62_v6 = vld [vmem:[%s13367_s1 + $0x180] sm:$0xff] }
   0x2   :  { %v75_v1 = vld [vmem:[%s13367_s1 + $0x1e8] sm:$0xff]  ;;  %v77_v5 = vld [vmem:[%s13367_s1 + $0x1f8] sm:$0xff]  ;;  %v74_v7 = vld [vmem:[%s13367_s1 + $0x1e0] sm:$0xff] }
   0x3   :  { %v8344_v4 = vpack.c.bf16 %v75_v1, %v63_v0  ;;  %v8352_v8 = vpack.c.bf16 %v77_v5, %v65_v2  ;;  %v8346_v9 = vpack.c.bf16 %v74_v7, %v62_v6  ;;  %v64_v10 = vld [vmem:[%s13367_s1 + $0x190] sm:$0xff]  ;;  %v87_v12 = vld [vmem:[%s13367_s1 + $0x248] sm:$0xff]  ;;  %v89_v15 = vld [vmem:[%s13367_s1 + $0x258] sm:$0xff] }
   0x4   :  { %v76_v11 = vld [vmem:[%s13367_s1 + $0x1f0] sm:$0xff]  ;;  %v99_v14 = vld [vmem:[%s13367_s1 + $0x2a8] sm:$0xff]  ;;  %v101_v16 = vld [vmem:[%s13367_s1 + $0x2b8] sm:$0xff] }
   0x5   :  { %8345 = vmatprep.subr.bf16.mxu0 %v8344_v4  ;;  %v8354_v13 = vpack.c.bf16 %v76_v11, %v64_v10  ;;  %8353 = vmatprep.subr.bf16.mxu1 %v8352_v8  ;;  %v8348_v17 = vpack.c.bf16 %v99_v14, %v87_v12  ;;  %v8356_v18 = vpack.c.bf16 %v101_v16, %v89_v15  ;;  %v86_v19 = vld [vmem:[%s13367_s1 + $0x240] sm:$0xff]  ;;  %v88_v21 = vld [vmem:[%s13367_s1 + $0x250] sm:$0xff]  ;;  %v67_v24 = vld [vmem:[%s13367_s1 + $0x1a8] sm:$0xff] }
   0x6   :  { %8347 = vmatpush1.bf16.msra.mxu0 %v8346_v9  ;;  %v98_v20 = vld [vmem:[%s13367_s1 + $0x2a0] sm:$0xff]  ;;  %v100_v23 = vld [vmem:[%s13367_s1 + $0x2b0] sm:$0xff]  ;;  %v79_v26 = vld [vmem:[%s13367_s1 + $0x208] sm:$0xff] }
   0x7   :  { %8355 = vmatpush1.bf16.msra.mxu1 %v8354_v13  ;;  %v8350_v22 = vpack.c.bf16 %v98_v20, %v86_v19  ;;  %8349 = vmatprep.subr.bf16.mxu0 %v8348_v17  ;;  %v8358_v25 = vpack.c.bf16 %v100_v23, %v88_v21  ;;  %v69_v27 = vld [vmem:[%s13367_s1 + $0x1b8] sm:$0xff]  ;;  %v8360_v29 = vpack.c.bf16 %v79_v26, %v67_v24  ;;  %v66_v31 = vld [vmem:[%s13367_s1 + $0x1a0] sm:$0xff]  ;;  %v68_v33 = vld [vmem:[%s13367_s1 + $0x1b0] sm:$0xff] }
   0x8   :  { %8357 = vmatprep.subr.bf16.mxu1 %v8356_v18  ;;  %v81_v28 = vld [vmem:[%s13367_s1 + $0x218] sm:$0xff]  ;;  %v78_v32 = vld [vmem:[%s13367_s1 + $0x200] sm:$0xff]  ;;  %v9688_v34 = vld [vmem:[%s13368_s0 + $0x10] sm:$0xff] }
   0x9   :  { %v8368_v30 = vpack.c.bf16 %v81_v28, %v69_v27  ;;  %v8362_v35 = vpack.c.bf16 %v78_v32, %v66_v31  ;;  %v80_v36 = vld [vmem:[%s13367_s1 + $0x210] sm:$0xff]  ;;  %v9696_v38 = vld [vmem:[%s13368_s0 + $0x18] sm:$0xff]  ;;  %v91_v39 = vld [vmem:[%s13367_s1 + $0x268] sm:$0xff] }
   0xa   :  { %8351 = vmatpush1.bf16.msra.mxu0 %v8350_v22  ;;  %v8370_v37 = vpack.c.bf16 %v80_v36, %v68_v33  ;;  %v103_v40 = vld [vmem:[%s13367_s1 + $0x2c8] sm:$0xff]  ;;  %v93_v41 = vld [vmem:[%s13367_s1 + $0x278] sm:$0xff]  ;;  %v90_v44 = vld [vmem:[%s13367_s1 + $0x260] sm:$0xff] }
   0xb   :  { %8359 = vmatpush1.bf16.msra.mxu1 %v8358_v25  ;;  %8361 = vmatprep.subr.bf16.mxu0 %v8360_v29  ;;  %v8364_v42 = vpack.c.bf16 %v103_v40, %v91_v39  ;;  %v105_v43 = vld [vmem:[%s13367_s1 + $0x2d8] sm:$0xff]  ;;  %v102_v45 = vld [vmem:[%s13367_s1 + $0x2c0] sm:$0xff]  ;;  %v92_v48 = vld [vmem:[%s13367_s1 + $0x270] sm:$0xff] }
   0xc   :  { %8369 = vmatprep.subr.bf16.mxu1 %v8368_v30  ;;  %v8372_v46 = vpack.c.bf16 %v105_v43, %v93_v41  ;;  %v8366_v47 = vpack.c.bf16 %v102_v45, %v90_v44  ;;  %v104_v49 = vld [vmem:[%s13367_s1 + $0x2d0] sm:$0xff]  ;;  %v9733_v51 = vld [vmem:[%s13368_s0 + $0x38] sm:$0xff]  ;;  %v71_v52 = vld [vmem:[%s13367_s1 + $0x1c8] sm:$0xff] }
   0xd   :  { %7704 = vmatmul.mubr.msk.f32.vlgmr.msra.gmra.mrb[0].mxu0 %vm334_vm0, %v9688_v34  ;;  %v8374_v50 = vpack.c.bf16 %v104_v49, %v92_v48  ;;  %v83_v53 = vld [vmem:[%s13367_s1 + $0x228] sm:$0xff]  ;;  %v73_v54 = vld [vmem:[%s13367_s1 + $0x1d8] sm:$0xff]  ;;  %v9759_v58 = vld [vmem:[%s13368_s0 + $0x40] sm:$0xff] }
   0xe   :  { %7720 = vmatmul.mubr.msk.f32.vlgmr.msra.gmra.mrb[0].mxu1 %vm334_vm0, %v9688_v34  ;;  %8363 = vmatpush1.bf16.msra.mxu0 %v8362_v35  ;;  %v8376_v55 = vpack.c.bf16 %v83_v53, %v71_v52  ;;  %v85_v56 = vld [vmem:[%s13367_s1 + $0x238] sm:$0xff]  ;;  %v9770_v59 = vld [vmem:[%s13368_s0 + $0x60] sm:$0xff]  ;;  %v9781_v60 = vld [vmem:[%s13368_s0 + $0x68] sm:$0xff] }
   0xf   :  { %8371 = vmatpush1.bf16.msra.mxu1 %v8370_v37  ;;  %453 = vmatprep.mubr.f32.mxu0 %v9593_v3  ;;  %v8384_v57 = vpack.c.bf16 %v85_v56, %v73_v54  ;;  %v9792_v61 = vld [vmem:[%s13368_s0 + $0x88] sm:$0xff]  ;;  %v9803_v62 = vld [vmem:[%s13368_s0 + $0x90] sm:$0xff]  ;;  %v9825_v0 = vld [vmem:[%s13368_s0 + $0xb8] sm:$0xff] }
  0x10   :  { %614 = vmatprep.mubr.f32.mxu1 %v9593_v3  ;;  %8365 = vmatprep.subr.bf16.mxu0 %v8364_v42  ;;  %v9814_v63 = vld [vmem:[%s13368_s0 + $0xb0] sm:$0xff]  ;;  %v9836_v1 = vld [vmem:[%s13368_s0 + $0xd8] sm:$0xff]  ;;  %v9847_v2 = vld [vmem:[%s13368_s0 + $0xe0] sm:$0xff] }
  0x11   :  { %7705 = vmatmul.mubr.msk.f32.gmra.mrb[2].mxu0 %vm334_vm0, %v9696_v38  ;;  %8373 = vmatprep.subr.bf16.mxu1 %v8372_v46  ;;  %v9858_v4 = vld [vmem:[%s13368_s0 + $0x100] sm:$0xff]  ;;  %v9869_v5 = vld [vmem:[%s13368_s0 + $0x108] sm:$0xff]  ;;  %v9891_v7 = vld [vmem:[%s13368_s0 + $0x130] sm:$0xff] }
  0x12   :  { %7721 = vmatmul.mubr.msk.f32.gmra.mrb[2].mxu1 %vm334_vm0, %v9696_v38  ;;  %459 = vmatprep.mubr.f32.mxu0 %v9593_v3  ;;  %v9880_v6 = vld [vmem:[%s13368_s0 + $0x128] sm:$0xff]  ;;  %v70_v8 = vld [vmem:[%s13367_s1 + $0x1c0] sm:$0xff]  ;;  %v72_v10 = vld [vmem:[%s13367_s1 + $0x1d0] sm:$0xff] }
  0x13   :  { %620 = vmatprep.mubr.f32.mxu1 %v9593_v3  ;;  %8367 = vmatpush1.bf16.msra.mxu0 %v8366_v47  ;;  %v82_v9 = vld [vmem:[%s13367_s1 + $0x220] sm:$0xff]  ;;  %v84_v11 = vld [vmem:[%s13367_s1 + $0x230] sm:$0xff]  ;;  %v95_v12 = vld [vmem:[%s13367_s1 + $0x288] sm:$0xff] }
  0x14   :  { %8375 = vmatpush1.bf16.msra.mxu1 %v8374_v50  ;;  %8377 = vmatprep.subr.bf16.mxu0 %v8376_v55  ;;  %v107_v13 = vld [vmem:[%s13367_s1 + $0x2e8] sm:$0xff]  ;;  %v8378_v14 = vpack.c.bf16 %v82_v9, %v70_v8  ;;  %v97_v15 = vld [vmem:[%s13367_s1 + $0x298] sm:$0xff]  ;;  %v8386_v17 = vpack.c.bf16 %v84_v11, %v72_v10  ;;  %v94_v19 = vld [vmem:[%s13367_s1 + $0x280] sm:$0xff] }
  0x15   :  { %7706 = vmatmul.mubr.msk.f32.gmra.mrb[4].mxu0 %vm334_vm0, %v9733_v51  ;;  %8385 = vmatprep.subr.bf16.mxu1 %v8384_v57  ;;  %v109_v16 = vld [vmem:[%s13367_s1 + $0x2f8] sm:$0xff]  ;;  %v8380_v18 = vpack.c.bf16 %v107_v13, %v95_v12  ;;  %v106_v20 = vld [vmem:[%s13367_s1 + $0x2e0] sm:$0xff]  ;;  %v96_v21 = vld [vmem:[%s13367_s1 + $0x290] sm:$0xff] }
  0x16   :  { %7722 = vmatmul.mubr.msk.f32.gmra.mrb[4].mxu1 %vm334_vm0, %v9733_v51  ;;  %465 = vmatprep.mubr.f32.mxu0 %v9593_v3  ;;  %v8388_v22 = vpack.c.bf16 %v109_v16, %v97_v15  ;;  %v108_v23 = vld [vmem:[%s13367_s1 + $0x2f0] sm:$0xff]  ;;  %v15_v24 = vld [vmem:[%s13367_s1 + $0x8] sm:$0xff]  ;;  %v17_v26 = vld [vmem:[%s13367_s1 + $0x18] sm:$0xff]  ;;  %v8382_v28 = vpack.c.bf16 %v106_v20, %v94_v19 }
  0x17   :  { %626 = vmatprep.mubr.f32.mxu1 %v9593_v3  ;;  %v27_v25 = vld [vmem:[%s13367_s1 + $0x68] sm:$0xff]  ;;  %v29_v27 = vld [vmem:[%s13367_s1 + $0x78] sm:$0xff]  ;;  %v8390_v29 = vpack.c.bf16 %v108_v23, %v96_v21  ;;  %v14_v32 = vld [vmem:[%s13367_s1] sm:$0xff] }
  0x18   :  { %v8392_v30 = vpack.c.bf16 %v27_v25, %v15_v24  ;;  %v8400_v31 = vpack.c.bf16 %v29_v27, %v17_v26  ;;  %v26_v33 = vld [vmem:[%s13367_s1 + $0x60] sm:$0xff]  ;;  %v16_v35 = vld [vmem:[%s13367_s1 + $0x10] sm:$0xff]  ;;  %v39_v37 = vld [vmem:[%s13367_s1 + $0xc8] sm:$0xff] }
  0x19   :  { %7707 = vmatmul.mubr.msk.f32.gmra.mrb[6].mxu0 %vm334_vm0, %v9759_v58  ;;  %v28_v36 = vld [vmem:[%s13367_s1 + $0x70] sm:$0xff]  ;;  %v51_v39 = vld [vmem:[%s13367_s1 + $0x128] sm:$0xff]  ;;  %v8394_v40 = vpack.c.bf16 %v26_v33, %v14_v32  ;;  %v41_v41 = vld [vmem:[%s13367_s1 + $0xd8] sm:$0xff] }
  0x1a   :  { %7723 = vmatmul.mubr.msk.f32.gmra.mrb[6].mxu1 %vm334_vm0, %v9759_v58  ;;  %471 = vmatprep.mubr.f32.mxu0 %v9593_v3  ;;  %v53_v42 = vld [vmem:[%s13367_s1 + $0x138] sm:$0xff]  ;;  %v8402_v43 = vpack.c.bf16 %v28_v36, %v16_v35  ;;  %v8396_v44 = vpack.c.bf16 %v51_v39, %v39_v37  ;;  %v38_v45 = vld [vmem:[%s13367_s1 + $0xc0] sm:$0xff]  ;;  %v40_v47 = vld [vmem:[%s13367_s1 + $0xd0] sm:$0xff] }
  0x1b   :  { %632 = vmatprep.mubr.f32.mxu1 %v9593_v3  ;;  %v50_v46 = vld [vmem:[%s13367_s1 + $0x120] sm:$0xff]  ;;  %v8404_v48 = vpack.c.bf16 %v53_v42, %v41_v41  ;;  %v52_v49 = vld [vmem:[%s13367_s1 + $0x130] sm:$0xff]  ;;  %v19_v50 = vld [vmem:[%s13367_s1 + $0x28] sm:$0xff] }
  0x1c   :  { %v31_v52 = vld [vmem:[%s13367_s1 + $0x88] sm:$0xff]  ;;  %v21_v53 = vld [vmem:[%s13367_s1 + $0x38] sm:$0xff]  ;;  %v8398_v55 = vpack.c.bf16 %v50_v46, %v38_v45  ;;  %v8406_v56 = vpack.c.bf16 %v52_v49, %v40_v47  ;;  %v56_v9 = vld [vmem:[%s13367_s1 + $0x150] sm:$0xff] }
  0x1d   :  { %7708 = vmatmul.mubr.msk.f32.gmra.mrb[8].mxu0 %vm334_vm0, %v9770_v59  ;;  %v33_v54 = vld [vmem:[%s13367_s1 + $0x98] sm:$0xff]  ;;  %v8408_v57 = vpack.c.bf16 %v31_v52, %v19_v50  ;;  %v23_v10 = vld [vmem:[%s13367_s1 + $0x48] sm:$0xff]  ;;  %v10271_v20 = vld [vmem:[%s13368_s0 + $0x30] sm:$0xff] }
  0x1e   :  { %7724 = vmatmul.mubr.msk.f32.gmra.mrb[8].mxu1 %vm334_vm0, %v9770_v59  ;;  %477 = vmatprep.mubr.f32.mxu0 %v9593_v3  ;;  %v35_v11 = vld [vmem:[%s13367_s1 + $0xa8] sm:$0xff]  ;;  %v25_v13 = vld [vmem:[%s13367_s1 + $0x58] sm:$0xff]  ;;  %v10282_v21 = vld [vmem:[%s13368_s0 + $0x50] sm:$0xff] }
  0x1f   :  { %638 = vmatprep.mubr.f32.mxu1 %v9593_v3  ;;  %v10242_v12 = vld [vmem:[%s13368_s0 + $0x8] sm:$0xff]  ;;  %v10304_v23 = vld [vmem:[%s13368_s0 + $0x78] sm:$0xff]  ;;  %v10315_v24 = vld [vmem:[%s13368_s0 + $0x80] sm:$0xff] }
  0x20   :  { %v10260_v19 = vld [vmem:[%s13368_s0 + $0x28] sm:$0xff]  ;;  %v10326_v25 = vld [vmem:[%s13368_s0 + $0xa0] sm:$0xff]  ;;  %v24_v36 = vld [vmem:[%s13367_s1 + $0x50] sm:$0xff] }
  0x21   :  { %7709 = vmatmul.mubr.msk.f32.gmra.mrb[10].mxu0 %vm334_vm0, %v9781_v60  ;;  %v10337_v26 = vld [vmem:[%s13368_s0 + $0xa8] sm:$0xff]  ;;  %v10403_v32 = vld [vmem:[%s13368_s0 + $0x120] sm:$0xff]  ;;  %v36_v37 = vld [vmem:[%s13367_s1 + $0xb0] sm:$0xff] }
  0x22   :  { %7725 = vmatmul.mubr.msk.f32.gmra.mrb[10].mxu1 %vm334_vm0, %v9781_v60  ;;  %483 = vmatprep.mubr.f32.mxu0 %v9593_v3  ;;  %v10348_v27 = vld [vmem:[%s13368_s0 + $0xc8] sm:$0xff]  ;;  %v22_v33 = vld [vmem:[%s13367_s1 + $0x40] sm:$0xff]  ;;  %v49_v42 = vld [vmem:[%s13367_s1 + $0x118] sm:$0xff] }
  0x23   :  { %644 = vmatprep.mubr.f32.mxu1 %v9593_v3  ;;  %v34_v35 = vld [vmem:[%s13367_s1 + $0xa0] sm:$0xff]  ;;  %v47_v39 = vld [vmem:[%s13367_s1 + $0x108] sm:$0xff]  ;;  %v60_v50 = vld [vmem:[%s13367_s1 + $0x170] sm:$0xff] }
  0x24   :  { %v8426_v41 = vpack.c.bf16 %v34_v35, %v22_v33  ;;  %v46_v46 = vld [vmem:[%s13367_s1 + $0x100] sm:$0xff]  ;;  %v111_v52 = vld [vmem:[%s13367_s1 + $0x308] sm:$0xff]  ;;  %v152_v35 = vld [vmem:[%s13367_s1 + $0x450] sm:$0xff] }
  0x25   :  { %7710 = vmatmul.mubr.msk.f32.gmra.mrb[12].mxu0 %vm334_vm0, %v9792_v61  ;;  %v58_v47 = vld [vmem:[%s13367_s1 + $0x160] sm:$0xff] }
  0x26   :  { %7726 = vmatmul.mubr.msk.f32.gmra.mrb[12].mxu1 %vm334_vm0, %v9792_v61  ;;  %489 = vmatprep.mubr.f32.mxu0 %v9593_v3 }
  0x27   :  { %650 = vmatprep.mubr.f32.mxu1 %v9593_v3 }
  0x29   :  { %7711 = vmatmul.mubr.msk.f32.gmra.mrb[14].mxu0 %vm334_vm0, %v9803_v62 }
  0x2a   :  { %7727 = vmatmul.mubr.msk.f32.gmra.mrb[14].mxu1 %vm334_vm0, %v9803_v62  ;;  %495 = vmatprep.mubr.f32.mxu0 %v9593_v3 }
  0x2b   :  { %656 = vmatprep.mubr.f32.mxu1 %v9593_v3 }
  0x2d   :  { %7712 = vmatmul.mubr.msk.f32.gmra.mrb[16].mxu0 %vm334_vm0, %v9814_v63 }
  0x2e   :  { %7728 = vmatmul.mubr.msk.f32.gmra.mrb[16].mxu1 %vm334_vm0, %v9814_v63  ;;  %501 = vmatprep.mubr.f32.mxu0 %v9593_v3 }
  0x2f   :  { %662 = vmatprep.mubr.f32.mxu1 %v9593_v3 }
  0x31   :  { %7713 = vmatmul.mubr.msk.f32.gmra.mrb[18].mxu0 %vm334_vm0, %v9825_v0 }
  0x32   :  { %7729 = vmatmul.mubr.msk.f32.gmra.mrb[18].mxu1 %vm334_vm0, %v9825_v0  ;;  %507 = vmatprep.mubr.f32.mxu0 %v9593_v3 }
  0x33   :  { %668 = vmatprep.mubr.f32.mxu1 %v9593_v3 }
  0x35   :  { %7714 = vmatmul.mubr.msk.f32.gmra.mrb[20].mxu0 %vm334_vm0, %v9836_v1 }
  0x36   :  { %7730 = vmatmul.mubr.msk.f32.gmra.mrb[20].mxu1 %vm334_vm0, %v9836_v1  ;;  %513 = vmatprep.mubr.f32.mxu0 %v9593_v3 }
  0x37   :  { %674 = vmatprep.mubr.f32.mxu1 %v9593_v3 }
  0x39   :  { %7715 = vmatmul.mubr.msk.f32.gmra.mrb[22].mxu0 %vm334_vm0, %v9847_v2 }
  0x3a   :  { %7731 = vmatmul.mubr.msk.f32.gmra.mrb[22].mxu1 %vm334_vm0, %v9847_v2  ;;  %519 = vmatprep.mubr.f32.mxu0 %v9593_v3 }
  0x3b   :  { %680 = vmatprep.mubr.f32.mxu1 %v9593_v3 }
  0x3d   :  { %7716 = vmatmul.mubr.msk.f32.gmra.mrb[24].mxu0 %vm334_vm0, %v9858_v4 }
  0x3e   :  { %7732 = vmatmul.mubr.msk.f32.gmra.mrb[24].mxu1 %vm334_vm0, %v9858_v4  ;;  %525 = vmatprep.mubr.f32.mxu0 %v9593_v3 }
  0x3f   :  { %686 = vmatprep.mubr.f32.mxu1 %v9593_v3 }
  0x41   :  { %7717 = vmatmul.mubr.msk.f32.gmra.mrb[26].mxu0 %vm334_vm0, %v9869_v5 }
  0x42   :  { %7733 = vmatmul.mubr.msk.f32.gmra.mrb[26].mxu1 %vm334_vm0, %v9869_v5  ;;  %531 = vmatprep.mubr.f32.mxu0 %v9593_v3 }
  0x43   :  { %692 = vmatprep.mubr.f32.mxu1 %v9593_v3 }
  0x45   :  { %7718 = vmatmul.mubr.msk.f32.gmra.mrb[28].mxu0 %vm334_vm0, %v9880_v6 }
  0x46   :  { %7734 = vmatmul.mubr.msk.f32.gmra.mrb[28].mxu1 %vm334_vm0, %v9880_v6  ;;  %537 = vmatprep.mubr.f32.mxu0 %v9593_v3 }
  0x47   :  { %698 = vmatprep.mubr.f32.mxu1 %v9593_v3 }
  0x49   :  { %7719 = vmatmul.mubr.msk.f32.gmra.mrb[30].mxu0 %vm334_vm0, %v9891_v7 }
  0x4a   :  { %7735 = vmatmul.mubr.msk.f32.gmra.mrb[30].mxu1 %vm334_vm0, %v9891_v7  ;;  %769 = vmatprep.mubr.f32.mxu0 %v9593_v3 }
  0x4b   :  { %930 = vmatprep.mubr.f32.mxu1 %v9593_v3 }
  0x4d   :  { %7736 = vmatmul.mubr.msk.f32.vlgmr.msra.gmra.mrb[32].mxu0 %vm334_vm0, %v9688_v34 }
  0x4e   :  { %7752 = vmatmul.mubr.msk.f32.vlgmr.msra.gmra.mrb[32].mxu1 %vm334_vm0, %v9688_v34  ;;  %8379 = vmatpush1.bf16.msra.mxu0 %v8378_v14  ;;  %v37_v14 = vld [vmem:[%s13367_s1 + $0xb8] sm:$0xff] }
  0x4f   :  { %8387 = vmatpush1.bf16.msra.mxu1 %v8386_v17  ;;  %775 = vmatprep.mubr.f32.mxu0 %v9593_v3  ;;  %v8424_v17 = vpack.c.bf16 %v35_v11, %v23_v10  ;;  %v148_v10 = vld [vmem:[%s13367_s1 + $0x430] sm:$0xff]  ;;  %v115_v11 = vld [vmem:[%s13367_s1 + $0x328] sm:$0xff] }
  0x50   :  { %936 = vmatprep.mubr.f32.mxu1 %v9593_v3  ;;  %8381 = vmatprep.subr.bf16.mxu0 %v8380_v18  ;;  %v8432_v18 = vpack.c.bf16 %v37_v14, %v25_v13  ;;  %v127_v13 = vld [vmem:[%s13367_s1 + $0x388] sm:$0xff]  ;;  %v117_v14 = vld [vmem:[%s13367_s1 + $0x338] sm:$0xff] }
  0x51   :  { %7737 = vmatmul.mubr.msk.f32.gmra.mrb[34].mxu0 %vm334_vm0, %v9696_v38  ;;  %8389 = vmatprep.subr.bf16.mxu1 %v8388_v22  ;;  %v10293_v22 = vld [vmem:[%s13368_s0 + $0x58] sm:$0xff] }
  0x52   :  { %7753 = vmatmul.mubr.msk.f32.gmra.mrb[34].mxu1 %vm334_vm0, %v9696_v38  ;;  %781 = vmatprep.mubr.f32.mxu0 %v9593_v3 }
  0x53   :  { %942 = vmatprep.mubr.f32.mxu1 %v9593_v3  ;;  %8383 = vmatpush1.bf16.msra.mxu0 %v8382_v28  ;;  %v10359_v28 = vld [vmem:[%s13368_s0 + $0xd0] sm:$0xff] }
  0x54   :  { %8391 = vmatpush1.bf16.msra.mxu1 %v8390_v29  ;;  %8393 = vmatprep.subr.bf16.mxu0 %v8392_v30  ;;  %v10370_v29 = vld [vmem:[%s13368_s0 + $0xf0] sm:$0xff]  ;;  %v10381_v30 = vld [vmem:[%s13368_s0 + $0xf8] sm:$0xff] }
  0x55   :  { %7738 = vmatmul.mubr.msk.f32.gmra.mrb[36].mxu0 %vm334_vm0, %v9733_v51  ;;  %8401 = vmatprep.subr.bf16.mxu1 %v8400_v31  ;;  %v10392_v31 = vld [vmem:[%s13368_s0 + $0x118] sm:$0xff] }
  0x56   :  { %7754 = vmatmul.mubr.msk.f32.gmra.mrb[36].mxu1 %vm334_vm0, %v9733_v51  ;;  %787 = vmatprep.mubr.f32.mxu0 %v9593_v3 }
  0x57   :  { %948 = vmatprep.mubr.f32.mxu1 %v9593_v3 }
  0x59   :  { %7739 = vmatmul.mubr.msk.f32.gmra.mrb[38].mxu0 %vm334_vm0, %v9759_v58 }
  0x5a   :  { %7755 = vmatmul.mubr.msk.f32.gmra.mrb[38].mxu1 %vm334_vm0, %v9759_v58  ;;  %793 = vmatprep.mubr.f32.mxu0 %v9593_v3 }
  0x5b   :  { %954 = vmatprep.mubr.f32.mxu1 %v9593_v3 }
  0x5d   :  { %7740 = vmatmul.mubr.msk.f32.gmra.mrb[40].mxu0 %vm334_vm0, %v9770_v59 }
  0x5e   :  { %7756 = vmatmul.mubr.msk.f32.gmra.mrb[40].mxu1 %vm334_vm0, %v9770_v59  ;;  %799 = vmatprep.mubr.f32.mxu0 %v9593_v3 }
  0x5f   :  { %960 = vmatprep.mubr.f32.mxu1 %v9593_v3 }
  0x61   :  { %7741 = vmatmul.mubr.msk.f32.gmra.mrb[42].mxu0 %vm334_vm0, %v9781_v60 }
  0x62   :  { %7757 = vmatmul.mubr.msk.f32.gmra.mrb[42].mxu1 %vm334_vm0, %v9781_v60  ;;  %805 = vmatprep.mubr.f32.mxu0 %v9593_v3 }
  0x63   :  { %966 = vmatprep.mubr.f32.mxu1 %v9593_v3 }
  0x65   :  { %7742 = vmatmul.mubr.msk.f32.gmra.mrb[44].mxu0 %vm334_vm0, %v9792_v61 }
  0x66   :  { %7758 = vmatmul.mubr.msk.f32.gmra.mrb[44].mxu1 %vm334_vm0, %v9792_v61  ;;  %811 = vmatprep.mubr.f32.mxu0 %v9593_v3 }
  0x67   :  { %972 = vmatprep.mubr.f32.mxu1 %v9593_v3 }
  0x69   :  { %7743 = vmatmul.mubr.msk.f32.gmra.mrb[46].mxu0 %vm334_vm0, %v9803_v62 }
  0x6a   :  { %7759 = vmatmul.mubr.msk.f32.gmra.mrb[46].mxu1 %vm334_vm0, %v9803_v62  ;;  %817 = vmatprep.mubr.f32.mxu0 %v9593_v3 }
  0x6b   :  { %978 = vmatprep.mubr.f32.mxu1 %v9593_v3 }
  0x6d   :  { %7744 = vmatmul.mubr.msk.f32.gmra.mrb[48].mxu0 %vm334_vm0, %v9814_v63 }
  0x6e   :  { %7760 = vmatmul.mubr.msk.f32.gmra.mrb[48].mxu1 %vm334_vm0, %v9814_v63  ;;  %823 = vmatprep.mubr.f32.mxu0 %v9593_v3 }
  0x6f   :  { %984 = vmatprep.mubr.f32.mxu1 %v9593_v3 }
  0x71   :  { %7745 = vmatmul.mubr.msk.f32.gmra.mrb[50].mxu0 %vm334_vm0, %v9825_v0 }
  0x72   :  { %7761 = vmatmul.mubr.msk.f32.gmra.mrb[50].mxu1 %vm334_vm0, %v9825_v0  ;;  %829 = vmatprep.mubr.f32.mxu0 %v9593_v3 }
  0x73   :  { %990 = vmatprep.mubr.f32.mxu1 %v9593_v3 }
  0x75   :  { %7746 = vmatmul.mubr.msk.f32.gmra.mrb[52].mxu0 %vm334_vm0, %v9836_v1 }
  0x76   :  { %7762 = vmatmul.mubr.msk.f32.gmra.mrb[52].mxu1 %vm334_vm0, %v9836_v1  ;;  %835 = vmatprep.mubr.f32.mxu0 %v9593_v3 }
  0x77   :  { %996 = vmatprep.mubr.f32.mxu1 %v9593_v3 }
  0x79   :  { %7747 = vmatmul.mubr.msk.f32.gmra.mrb[54].mxu0 %vm334_vm0, %v9847_v2 }
  0x7a   :  { %7763 = vmatmul.mubr.msk.f32.gmra.mrb[54].mxu1 %vm334_vm0, %v9847_v2  ;;  %841 = vmatprep.mubr.f32.mxu0 %v9593_v3 }
  0x7b   :  { %1002 = vmatprep.mubr.f32.mxu1 %v9593_v3 }
  0x7d   :  { %7748 = vmatmul.mubr.msk.f32.gmra.mrb[56].mxu0 %vm334_vm0, %v9858_v4 }
  0x7e   :  { %7764 = vmatmul.mubr.msk.f32.gmra.mrb[56].mxu1 %vm334_vm0, %v9858_v4  ;;  %847 = vmatprep.mubr.f32.mxu0 %v9593_v3 }
  0x7f   :  { %1008 = vmatprep.mubr.f32.mxu1 %v9593_v3 }
  0x81   :  { %7749 = vmatmul.mubr.msk.f32.gmra.mrb[58].mxu0 %vm334_vm0, %v9869_v5 }
  0x82   :  { %7765 = vmatmul.mubr.msk.f32.gmra.mrb[58].mxu1 %vm334_vm0, %v9869_v5  ;;  %853 = vmatprep.mubr.f32.mxu0 %v9593_v3 }
  0x83   :  { %1014 = vmatprep.mubr.f32.mxu1 %v9593_v3 }
  0x85   :  { %7750 = vmatmul.mubr.msk.f32.gmra.mrb[60].mxu0 %vm334_vm0, %v9880_v6 }
  0x86   :  { %7766 = vmatmul.mubr.msk.f32.gmra.mrb[60].mxu1 %vm334_vm0, %v9880_v6  ;;  %859 = vmatprep.mubr.f32.mxu0 %v9593_v3 }
  0x87   :  { %1020 = vmatprep.mubr.f32.mxu1 %v9593_v3 }
  0x89   :  { %7751 = vmatmul.mubr.msk.f32.gmra.mrb[62].mxu0 %vm334_vm0, %v9891_v7 }
  0x8a   :  { %7767 = vmatmul.mubr.msk.f32.gmra.mrb[62].mxu1 %vm334_vm0, %v9891_v7  ;;  %1091 = vmatprep.mubr.f32.mxu0 %v9593_v3 }
  0x8b   :  { %1252 = vmatprep.mubr.f32.mxu1 %v9593_v3 }
  0x8d   :  { %7768 = vmatmul.mubr.msk.f32.vlgmr.msra.gmra.mrb[64].mxu0 %vm334_vm0, %v9688_v34 }
  0x8e   :  { %7784 = vmatmul.mubr.msk.f32.vlgmr.msra.gmra.mrb[64].mxu1 %vm334_vm0, %v9688_v34  ;;  %8395 = vmatpush1.bf16.msra.mxu0 %v8394_v40  ;;  %v8416_v34 = vpack.c.bf16 %v33_v54, %v21_v53  ;;  %v59_v40 = vld [vmem:[%s13367_s1 + $0x168] sm:$0xff]  ;;  %v113_v54 = vld [vmem:[%s13367_s1 + $0x318] sm:$0xff] }
  0x8f   :  { %8403 = vmatpush1.bf16.msra.mxu1 %v8402_v43  ;;  %1097 = vmatprep.mubr.f32.mxu0 %v9593_v3  ;;  %v61_v43 = vld [vmem:[%s13367_s1 + $0x178] sm:$0xff]  ;;  %v8428_v45 = vpack.c.bf16 %v59_v40, %v47_v39  ;;  %v123_v53 = vld [vmem:[%s13367_s1 + $0x368] sm:$0xff] }
  0x90   :  { %1258 = vmatprep.mubr.f32.mxu1 %v9593_v3  ;;  %8397 = vmatprep.subr.bf16.mxu0 %v8396_v44  ;;  %v8434_v44 = vpack.c.bf16 %v36_v37, %v24_v36  ;;  %v8436_v49 = vpack.c.bf16 %v61_v43, %v49_v42  ;;  %v119_v36 = vld [vmem:[%s13367_s1 + $0x348] sm:$0xff]  ;;  %v121_v40 = vld [vmem:[%s13367_s1 + $0x358] sm:$0xff] }
  0x91   :  { %7769 = vmatmul.mubr.msk.f32.gmra.mrb[66].mxu0 %vm334_vm0, %v9696_v38  ;;  %8405 = vmatprep.subr.bf16.mxu1 %v8404_v48  ;;  %v48_v48 = vld [vmem:[%s13367_s1 + $0x110] sm:$0xff]  ;;  %v131_v37 = vld [vmem:[%s13367_s1 + $0x3a8] sm:$0xff] }
  0x92   :  { %7785 = vmatmul.mubr.msk.f32.gmra.mrb[66].mxu1 %vm334_vm0, %v9696_v38  ;;  %1103 = vmatprep.mubr.f32.mxu0 %v9593_v3  ;;  %v18_v38 = vld [vmem:[%s13367_s1 + $0x20] sm:$0xff]  ;;  %v10754_v39 = vld [vmem:[%s13368_s0 + $0x9] sm:$0xff] }
  0x93   :  { %1264 = vmatprep.mubr.f32.mxu1 %v9593_v3  ;;  %8399 = vmatpush1.bf16.msra.mxu0 %v8398_v55  ;;  %v125_v55 = vld [vmem:[%s13367_s1 + $0x378] sm:$0xff] }
  0x94   :  { %8407 = vmatpush1.bf16.msra.mxu1 %v8406_v56  ;;  %8409 = vmatprep.subr.bf16.mxu0 %v8408_v57  ;;  %v8430_v56 = vpack.c.bf16 %v58_v47, %v46_v46  ;;  %v8438_v57 = vpack.c.bf16 %v60_v50, %v48_v48  ;;  %v10772_v46 = vld [vmem:[%s13368_s0 + $0x29] sm:$0xff]  ;;  %v10783_v47 = vld [vmem:[%s13368_s0 + $0x31] sm:$0xff]  ;;  %v10816_v50 = vld [vmem:[%s13368_s0 + $0x79] sm:$0xff] }
  0x95   :  { %7770 = vmatmul.mubr.msk.f32.gmra.mrb[68].mxu0 %vm334_vm0, %v9733_v51  ;;  %8417 = vmatprep.subr.bf16.mxu1 %v8416_v34  ;;  %v8440_v34 = vpack.c.bf16 %v123_v53, %v111_v52  ;;  %v10794_v48 = vld [vmem:[%s13368_s0 + $0x51] sm:$0xff]  ;;  %v10827_v52 = vld [vmem:[%s13368_s0 + $0x81] sm:$0xff] }
  0x96   :  { %7786 = vmatmul.mubr.msk.f32.gmra.mrb[68].mxu1 %vm334_vm0, %v9733_v51  ;;  %1109 = vmatprep.mubr.f32.mxu0 %v9593_v3  ;;  %v30_v51 = vld [vmem:[%s13367_s1 + $0x80] sm:$0xff] }
  0x97   :  { %1270 = vmatprep.mubr.f32.mxu1 %v9593_v3  ;;  %v10838_v53 = vld [vmem:[%s13368_s0 + $0xa1] sm:$0xff] }
  0x99   :  { %7771 = vmatmul.mubr.msk.f32.gmra.mrb[70].mxu0 %vm334_vm0, %v9759_v58 }
  0x9a   :  { %7787 = vmatmul.mubr.msk.f32.gmra.mrb[70].mxu1 %vm334_vm0, %v9759_v58  ;;  %1115 = vmatprep.mubr.f32.mxu0 %v9593_v3  ;;  %v20_v58 = vld [vmem:[%s13367_s1 + $0x30] sm:$0xff] }
  0x9b   :  { %1276 = vmatprep.mubr.f32.mxu1 %v9593_v3 }
  0x9d   :  { %7772 = vmatmul.mubr.msk.f32.gmra.mrb[72].mxu0 %vm334_vm0, %v9770_v59 }
  0x9e   :  { %7788 = vmatmul.mubr.msk.f32.gmra.mrb[72].mxu1 %vm334_vm0, %v9770_v59  ;;  %1121 = vmatprep.mubr.f32.mxu0 %v9593_v3  ;;  %v32_v59 = vld [vmem:[%s13367_s1 + $0x90] sm:$0xff] }
  0x9f   :  { %1282 = vmatprep.mubr.f32.mxu1 %v9593_v3 }
  0xa1   :  { %7773 = vmatmul.mubr.msk.f32.gmra.mrb[74].mxu0 %vm334_vm0, %v9781_v60 }
  0xa2   :  { %7789 = vmatmul.mubr.msk.f32.gmra.mrb[74].mxu1 %vm334_vm0, %v9781_v60  ;;  %1127 = vmatprep.mubr.f32.mxu0 %v9593_v3  ;;  %v43_v60 = vld [vmem:[%s13367_s1 + $0xe8] sm:$0xff] }
  0xa3   :  { %1288 = vmatprep.mubr.f32.mxu1 %v9593_v3 }
  0xa5   :  { %7774 = vmatmul.mubr.msk.f32.gmra.mrb[76].mxu0 %vm334_vm0, %v9792_v61 }
  0xa6   :  { %7790 = vmatmul.mubr.msk.f32.gmra.mrb[76].mxu1 %vm334_vm0, %v9792_v61  ;;  %1133 = vmatprep.mubr.f32.mxu0 %v9593_v3  ;;  %v55_v61 = vld [vmem:[%s13367_s1 + $0x148] sm:$0xff] }
  0xa7   :  { %1294 = vmatprep.mubr.f32.mxu1 %v9593_v3 }
  0xa9   :  { %7775 = vmatmul.mubr.msk.f32.gmra.mrb[78].mxu0 %vm334_vm0, %v9803_v62 }
  0xaa   :  { %7791 = vmatmul.mubr.msk.f32.gmra.mrb[78].mxu1 %vm334_vm0, %v9803_v62  ;;  %1139 = vmatprep.mubr.f32.mxu0 %v9593_v3  ;;  %v10208_v62 = vld [vmem:[%s13368_s0] sm:$0xff] }
  0xab   :  { %1300 = vmatprep.mubr.f32.mxu1 %v9593_v3 }
  0xad   :  { %7776 = vmatmul.mubr.msk.f32.gmra.mrb[80].mxu0 %vm334_vm0, %v9814_v63 }
  0xae   :  { %7792 = vmatmul.mubr.msk.f32.gmra.mrb[80].mxu1 %vm334_vm0, %v9814_v63  ;;  %1145 = vmatprep.mubr.f32.mxu0 %v9593_v3  ;;  %v8410_v63 = vpack.c.bf16 %v30_v51, %v18_v38  ;;  %v8448_v38 = vpack.c.bf16 %v125_v55, %v113_v54  ;;  %v110_v51 = vld [vmem:[%s13367_s1 + $0x300] sm:$0xff]  ;;  %v10849_v54 = vld [vmem:[%s13368_s0 + $0xa9] sm:$0xff] }
  0xaf   :  { %1306 = vmatprep.mubr.f32.mxu1 %v9593_v3  ;;  %v10860_v55 = vld [vmem:[%s13368_s0 + $0xc9] sm:$0xff] }
  0xb1   :  { %7777 = vmatmul.mubr.msk.f32.gmra.mrb[82].mxu0 %vm334_vm0, %v9825_v0 }
  0xb2   :  { %7793 = vmatmul.mubr.msk.f32.gmra.mrb[82].mxu1 %vm334_vm0, %v9825_v0  ;;  %1151 = vmatprep.mubr.f32.mxu0 %v9593_v3  ;;  %v45_v0 = vld [vmem:[%s13367_s1 + $0xf8] sm:$0xff] }
  0xb3   :  { %1312 = vmatprep.mubr.f32.mxu1 %v9593_v3 }
  0xb5   :  { %7778 = vmatmul.mubr.msk.f32.gmra.mrb[84].mxu0 %vm334_vm0, %v9836_v1 }
  0xb6   :  { %7794 = vmatmul.mubr.msk.f32.gmra.mrb[84].mxu1 %vm334_vm0, %v9836_v1  ;;  %1157 = vmatprep.mubr.f32.mxu0 %v9593_v3  ;;  %v57_v1 = vld [vmem:[%s13367_s1 + $0x158] sm:$0xff] }
  0xb7   :  { %1318 = vmatprep.mubr.f32.mxu1 %v9593_v3  ;;  %v8420_v8 = vpack.c.bf16 %v57_v1, %v45_v0  ;;  %v137_v1 = vld [vmem:[%s13367_s1 + $0x3d8] sm:$0xff] }
  0xb9   :  { %7779 = vmatmul.mubr.msk.f32.gmra.mrb[86].mxu0 %vm334_vm0, %v9847_v2 }
  0xba   :  { %7795 = vmatmul.mubr.msk.f32.gmra.mrb[86].mxu1 %vm334_vm0, %v9847_v2  ;;  %1163 = vmatprep.mubr.f32.mxu0 %v9593_v3  ;;  %v8418_v2 = vpack.c.bf16 %v32_v59, %v20_v58  ;;  %v122_v58 = vld [vmem:[%s13367_s1 + $0x360] sm:$0xff]  ;;  %v112_v59 = vld [vmem:[%s13367_s1 + $0x310] sm:$0xff] }
  0xbb   :  { %1324 = vmatprep.mubr.f32.mxu1 %v9593_v3  ;;  %v8442_v0 = vpack.c.bf16 %v122_v58, %v110_v51  ;;  %v10915_v51 = vld [vmem:[%s13368_s0 + $0x121] sm:$0xff] }
  0xbc   :  { %v118_v58 = vld [vmem:[%s13367_s1 + $0x340] sm:$0xff] }
  0xbd   :  { %7780 = vmatmul.mubr.msk.f32.gmra.mrb[88].mxu0 %vm334_vm0, %v9858_v4 }
  0xbe   :  { %7796 = vmatmul.mubr.msk.f32.gmra.mrb[88].mxu1 %vm334_vm0, %v9858_v4  ;;  %1169 = vmatprep.mubr.f32.mxu0 %v9593_v3  ;;  %v8412_v4 = vpack.c.bf16 %v55_v61, %v43_v60  ;;  %v124_v60 = vld [vmem:[%s13367_s1 + $0x370] sm:$0xff]  ;;  %v135_v61 = vld [vmem:[%s13367_s1 + $0x3c8] sm:$0xff] }
  0xbf   :  { %1330 = vmatprep.mubr.f32.mxu1 %v9593_v3 }
  0xc1   :  { %7781 = vmatmul.mubr.msk.f32.gmra.mrb[90].mxu0 %vm334_vm0, %v9869_v5 }
  0xc2   :  { %7797 = vmatmul.mubr.msk.f32.gmra.mrb[90].mxu1 %vm334_vm0, %v9869_v5  ;;  %1175 = vmatprep.mubr.f32.mxu0 %v9593_v3  ;;  %v42_v5 = vld [vmem:[%s13367_s1 + $0xe0] sm:$0xff] }
  0xc3   :  { %1336 = vmatprep.mubr.f32.mxu1 %v9593_v3 }
  0xc5   :  { %7782 = vmatmul.mubr.msk.f32.gmra.mrb[92].mxu0 %vm334_vm0, %v9880_v6 }
  0xc6   :  { %7798 = vmatmul.mubr.msk.f32.gmra.mrb[92].mxu1 %vm334_vm0, %v9880_v6  ;;  %1181 = vmatprep.mubr.f32.mxu0 %v9593_v3  ;;  %v54_v6 = vld [vmem:[%s13367_s1 + $0x140] sm:$0xff] }
  0xc7   :  { %1342 = vmatprep.mubr.f32.mxu1 %v9593_v3  ;;  %v8414_v15 = vpack.c.bf16 %v54_v6, %v42_v5  ;;  %v134_v6 = vld [vmem:[%s13367_s1 + $0x3c0] sm:$0xff] }
  0xc9   :  { %7783 = vmatmul.mubr.msk.f32.gmra.mrb[94].mxu0 %vm334_vm0, %v9891_v7 }
  0xca   :  { %7799 = vmatmul.mubr.msk.f32.gmra.mrb[94].mxu1 %vm334_vm0, %v9891_v7  ;;  %1461 = vmatprep.mubr.f32.mxu0 %v9593_v3  ;;  %v44_v7 = vld [vmem:[%s13367_s1 + $0xf0] sm:$0xff] }
  0xcb   :  { %1622 = vmatprep.mubr.f32.mxu1 %v9593_v3  ;;  %v8422_v16 = vpack.c.bf16 %v56_v9, %v44_v7  ;;  %v146_v7 = vld [vmem:[%s13367_s1 + $0x420] sm:$0xff] }
  0xcd   :  { %7800 = vmatmul.mubr.msk.f32.vlgmr.msra.gmra.mrb[0].mxu0 %vm334_vm0, %v10208_v62 }
  0xce   :  { %7816 = vmatmul.mubr.msk.f32.vlgmr.msra.gmra.mrb[0].mxu1 %vm334_vm0, %v10208_v62  ;;  %8411 = vmatpush1.bf16.msra.mxu0 %v8410_v63  ;;  %v147_v63 = vld [vmem:[%s13367_s1 + $0x428] sm:$0xff] }
  0xcf   :  { %8419 = vmatpush1.bf16.msra.mxu1 %v8418_v2  ;;  %1467 = vmatprep.mubr.f32.mxu0 %v9593_v3  ;;  %v149_v2 = vld [vmem:[%s13367_s1 + $0x438] sm:$0xff]  ;;  %v8444_v5 = vpack.c.bf16 %v147_v63, %v135_v61  ;;  %v132_v61 = vld [vmem:[%s13367_s1 + $0x3b0] sm:$0xff]  ;;  %v143_v63 = vld [vmem:[%s13367_s1 + $0x408] sm:$0xff] }
  0xd0   :  { %1628 = vmatprep.mubr.f32.mxu1 %v9593_v3  ;;  %8413 = vmatprep.subr.bf16.mxu0 %v8412_v4  ;;  %v8450_v4 = vpack.c.bf16 %v124_v60, %v112_v59  ;;  %v8452_v9 = vpack.c.bf16 %v149_v2, %v137_v1  ;;  %v130_v59 = vld [vmem:[%s13367_s1 + $0x3a0] sm:$0xff]  ;;  %v120_v60 = vld [vmem:[%s13367_s1 + $0x350] sm:$0xff]  ;;  %v145_v2 = vld [vmem:[%s13367_s1 + $0x418] sm:$0xff] }
  0xd1   :  { %7801 = vmatmul.mubr.msk.f32.gmra.mrb[2].mxu0 %vm334_vm0, %v10242_v12  ;;  %8421 = vmatprep.subr.bf16.mxu1 %v8420_v8  ;;  %v136_v8 = vld [vmem:[%s13367_s1 + $0x3d0] sm:$0xff]  ;;  %v8474_v1 = vpack.c.bf16 %v130_v59, %v118_v58 }
  0xd2   :  { %7817 = vmatmul.mubr.msk.f32.gmra.mrb[2].mxu1 %vm334_vm0, %v10242_v12  ;;  %1473 = vmatprep.mubr.f32.mxu0 %v9593_v3  ;;  %v200_v59 = vld [vmem:[%s13367_s1 + $0x5d0] sm:$0xff] }
  0xd3   :  { %1634 = vmatprep.mubr.f32.mxu1 %v9593_v3  ;;  %8415 = vmatpush1.bf16.msra.mxu0 %v8414_v15  ;;  %v129_v15 = vld [vmem:[%s13367_s1 + $0x398] sm:$0xff] }
  0xd4   :  { %8423 = vmatpush1.bf16.msra.mxu1 %v8422_v16  ;;  %8425 = vmatprep.subr.bf16.mxu0 %v8424_v17  ;;  %v8446_v16 = vpack.c.bf16 %v146_v7, %v134_v6  ;;  %v8454_v17 = vpack.c.bf16 %v148_v10, %v136_v8  ;;  %v142_v7 = vld [vmem:[%s13367_s1 + $0x400] sm:$0xff] }
  0xd5   :  { %7802 = vmatmul.mubr.msk.f32.gmra.mrb[4].mxu0 %vm334_vm0, %v10260_v19  ;;  %8433 = vmatprep.subr.bf16.mxu1 %v8432_v18  ;;  %v8456_v18 = vpack.c.bf16 %v127_v13, %v115_v11  ;;  %v154_v8 = vld [vmem:[%s13367_s1 + $0x460] sm:$0xff]  ;;  %v156_v11 = vld [vmem:[%s13367_s1 + $0x470] sm:$0xff]  ;;  %v159_v13 = vld [vmem:[%s13367_s1 + $0x488] sm:$0xff] }
  0xd6   :  { %7818 = vmatmul.mubr.msk.f32.gmra.mrb[4].mxu1 %vm334_vm0, %v10260_v19  ;;  %1479 = vmatprep.mubr.f32.mxu0 %v9593_v3 }
  0xd7   :  { %1640 = vmatprep.mubr.f32.mxu1 %v9593_v3 }
  0xd9   :  { %7803 = vmatmul.mubr.msk.f32.gmra.mrb[6].mxu0 %vm334_vm0, %v10271_v20 }
  0xda   :  { %7819 = vmatmul.mubr.msk.f32.gmra.mrb[6].mxu1 %vm334_vm0, %v10271_v20  ;;  %1485 = vmatprep.mubr.f32.mxu0 %v9593_v3 }
  0xdb   :  { %1646 = vmatprep.mubr.f32.mxu1 %v9593_v3 }
  0xdd   :  { %7804 = vmatmul.mubr.msk.f32.gmra.mrb[8].mxu0 %vm334_vm0, %v10282_v21 }
  0xde   :  { %7820 = vmatmul.mubr.msk.f32.gmra.mrb[8].mxu1 %vm334_vm0, %v10282_v21  ;;  %1491 = vmatprep.mubr.f32.mxu0 %v9593_v3 }
  0xdf   :  { %1652 = vmatprep.mubr.f32.mxu1 %v9593_v3 }
  0xe1   :  { %7805 = vmatmul.mubr.msk.f32.gmra.mrb[10].mxu0 %vm334_vm0, %v10293_v22 }
  0xe2   :  { %7821 = vmatmul.mubr.msk.f32.gmra.mrb[10].mxu1 %vm334_vm0, %v10293_v22  ;;  %1497 = vmatprep.mubr.f32.mxu0 %v9593_v3 }
  0xe3   :  { %1658 = vmatprep.mubr.f32.mxu1 %v9593_v3 }
  0xe5   :  { %7806 = vmatmul.mubr.msk.f32.gmra.mrb[12].mxu0 %vm334_vm0, %v10304_v23 }
  0xe6   :  { %7822 = vmatmul.mubr.msk.f32.gmra.mrb[12].mxu1 %vm334_vm0, %v10304_v23  ;;  %1503 = vmatprep.mubr.f32.mxu0 %v9593_v3 }
  0xe7   :  { %1664 = vmatprep.mubr.f32.mxu1 %v9593_v3 }
  0xe9   :  { %7807 = vmatmul.mubr.msk.f32.gmra.mrb[14].mxu0 %vm334_vm0, %v10315_v24 }
  0xea   :  { %7823 = vmatmul.mubr.msk.f32.gmra.mrb[14].mxu1 %vm334_vm0, %v10315_v24  ;;  %1509 = vmatprep.mubr.f32.mxu0 %v9593_v3 }
  0xeb   :  { %1670 = vmatprep.mubr.f32.mxu1 %v9593_v3 }
  0xed   :  { %7808 = vmatmul.mubr.msk.f32.gmra.mrb[16].mxu0 %vm334_vm0, %v10326_v25 }
  0xee   :  { %7824 = vmatmul.mubr.msk.f32.gmra.mrb[16].mxu1 %vm334_vm0, %v10326_v25  ;;  %1515 = vmatprep.mubr.f32.mxu0 %v9593_v3 }
  0xef   :  { %1676 = vmatprep.mubr.f32.mxu1 %v9593_v3 }
  0xf1   :  { %7809 = vmatmul.mubr.msk.f32.gmra.mrb[18].mxu0 %vm334_vm0, %v10337_v26 }
  0xf2   :  { %7825 = vmatmul.mubr.msk.f32.gmra.mrb[18].mxu1 %vm334_vm0, %v10337_v26  ;;  %1521 = vmatprep.mubr.f32.mxu0 %v9593_v3 }
  0xf3   :  { %1682 = vmatprep.mubr.f32.mxu1 %v9593_v3 }
  0xf5   :  { %7810 = vmatmul.mubr.msk.f32.gmra.mrb[20].mxu0 %vm334_vm0, %v10348_v27 }
  0xf6   :  { %7826 = vmatmul.mubr.msk.f32.gmra.mrb[20].mxu1 %vm334_vm0, %v10348_v27  ;;  %1527 = vmatprep.mubr.f32.mxu0 %v9593_v3 }
  0xf7   :  { %1688 = vmatprep.mubr.f32.mxu1 %v9593_v3 }
  0xf9   :  { %7811 = vmatmul.mubr.msk.f32.gmra.mrb[22].mxu0 %vm334_vm0, %v10359_v28 }
  0xfa   :  { %7827 = vmatmul.mubr.msk.f32.gmra.mrb[22].mxu1 %vm334_vm0, %v10359_v28  ;;  %1533 = vmatprep.mubr.f32.mxu0 %v9593_v3 }
  0xfb   :  { %1694 = vmatprep.mubr.f32.mxu1 %v9593_v3 }
  0xfd   :  { %7812 = vmatmul.mubr.msk.f32.gmra.mrb[24].mxu0 %vm334_vm0, %v10370_v29 }
  0xfe   :  { %7828 = vmatmul.mubr.msk.f32.gmra.mrb[24].mxu1 %vm334_vm0, %v10370_v29  ;;  %1539 = vmatprep.mubr.f32.mxu0 %v9593_v3 }
  0xff   :  { %1700 = vmatprep.mubr.f32.mxu1 %v9593_v3 }
 0x101   :  { %7813 = vmatmul.mubr.msk.f32.gmra.mrb[26].mxu0 %vm334_vm0, %v10381_v30 }
 0x102   :  { %7829 = vmatmul.mubr.msk.f32.gmra.mrb[26].mxu1 %vm334_vm0, %v10381_v30  ;;  %1545 = vmatprep.mubr.f32.mxu0 %v9593_v3 }
 0x103   :  { %1706 = vmatprep.mubr.f32.mxu1 %v9593_v3 }
 0x105   :  { %7814 = vmatmul.mubr.msk.f32.gmra.mrb[28].mxu0 %vm334_vm0, %v10392_v31 }
 0x106   :  { %7830 = vmatmul.mubr.msk.f32.gmra.mrb[28].mxu1 %vm334_vm0, %v10392_v31  ;;  %1551 = vmatprep.mubr.f32.mxu0 %v9593_v3 }
 0x107   :  { %1712 = vmatprep.mubr.f32.mxu1 %v9593_v3 }
 0x109   :  { %7815 = vmatmul.mubr.msk.f32.gmra.mrb[30].mxu0 %vm334_vm0, %v10403_v32 }
 0x10a   :  { %7831 = vmatmul.mubr.msk.f32.gmra.mrb[30].mxu1 %vm334_vm0, %v10403_v32  ;;  %1783 = vmatprep.mubr.f32.mxu0 %v9593_v3 }
 0x10b   :  { %1944 = vmatprep.mubr.f32.mxu1 %v9593_v3 }
 0x10d   :  { %7832 = vmatmul.mubr.msk.f32.vlgmr.msra.gmra.mrb[32].mxu0 %vm334_vm0, %v10208_v62 }
 0x10e   :  { %7848 = vmatmul.mubr.msk.f32.vlgmr.msra.gmra.mrb[32].mxu1 %vm334_vm0, %v10208_v62  ;;  %8427 = vmatpush1.bf16.msra.mxu0 %v8426_v41  ;;  %v133_v41 = vld [vmem:[%s13367_s1 + $0x3b8] sm:$0xff] }
 0x10f   :  { %8435 = vmatpush1.bf16.msra.mxu1 %v8434_v44  ;;  %1789 = vmatprep.mubr.f32.mxu0 %v9593_v3  ;;  %v8472_v44 = vpack.c.bf16 %v131_v37, %v119_v36  ;;  %v196_v36 = vld [vmem:[%s13367_s1 + $0x5b0] sm:$0xff]  ;;  %v163_v37 = vld [vmem:[%s13367_s1 + $0x4a8] sm:$0xff] }
 0x110   :  { %1950 = vmatprep.mubr.f32.mxu1 %v9593_v3  ;;  %8429 = vmatprep.subr.bf16.mxu0 %v8428_v45  ;;  %v8480_v45 = vpack.c.bf16 %v133_v41, %v121_v40  ;;  %v175_v40 = vld [vmem:[%s13367_s1 + $0x508] sm:$0xff]  ;;  %v165_v41 = vld [vmem:[%s13367_s1 + $0x4b8] sm:$0xff] }
 0x111   :  { %7833 = vmatmul.mubr.msk.f32.gmra.mrb[34].mxu0 %vm334_vm0, %v10242_v12  ;;  %8437 = vmatprep.subr.bf16.mxu1 %v8436_v49  ;;  %v10805_v49 = vld [vmem:[%s13368_s0 + $0x59] sm:$0xff] }
 0x112   :  { %7849 = vmatmul.mubr.msk.f32.gmra.mrb[34].mxu1 %vm334_vm0, %v10242_v12  ;;  %1795 = vmatprep.mubr.f32.mxu0 %v9593_v3 }
 0x113   :  { %1956 = vmatprep.mubr.f32.mxu1 %v9593_v3  ;;  %8431 = vmatpush1.bf16.msra.mxu0 %v8430_v56  ;;  %v10871_v56 = vld [vmem:[%s13368_s0 + $0xd1] sm:$0xff] }
 0x114   :  { %8439 = vmatpush1.bf16.msra.mxu1 %v8438_v57  ;;  %8441 = vmatprep.subr.bf16.mxu0 %v8440_v34  ;;  %v10882_v57 = vld [vmem:[%s13368_s0 + $0xf1] sm:$0xff]  ;;  %v10893_v34 = vld [vmem:[%s13368_s0 + $0xf9] sm:$0xff] }
 0x115   :  { %7834 = vmatmul.mubr.msk.f32.gmra.mrb[36].mxu0 %vm334_vm0, %v10260_v19  ;;  %8449 = vmatprep.subr.bf16.mxu1 %v8448_v38  ;;  %v10904_v38 = vld [vmem:[%s13368_s0 + $0x119] sm:$0xff] }
 0x116   :  { %7850 = vmatmul.mubr.msk.f32.gmra.mrb[36].mxu1 %vm334_vm0, %v10260_v19  ;;  %1801 = vmatprep.mubr.f32.mxu0 %v9593_v3 }
 0x117   :  { %1962 = vmatprep.mubr.f32.mxu1 %v9593_v3 }
 0x119   :  { %7835 = vmatmul.mubr.msk.f32.gmra.mrb[38].mxu0 %vm334_vm0, %v10271_v20 }
 0x11a   :  { %7851 = vmatmul.mubr.msk.f32.gmra.mrb[38].mxu1 %vm334_vm0, %v10271_v20  ;;  %1807 = vmatprep.mubr.f32.mxu0 %v9593_v3 }
 0x11b   :  { %1968 = vmatprep.mubr.f32.mxu1 %v9593_v3 }
 0x11d   :  { %7836 = vmatmul.mubr.msk.f32.gmra.mrb[40].mxu0 %vm334_vm0, %v10282_v21 }
 0x11e   :  { %7852 = vmatmul.mubr.msk.f32.gmra.mrb[40].mxu1 %vm334_vm0, %v10282_v21  ;;  %1813 = vmatprep.mubr.f32.mxu0 %v9593_v3 }
 0x11f   :  { %1974 = vmatprep.mubr.f32.mxu1 %v9593_v3 }
 0x121   :  { %7837 = vmatmul.mubr.msk.f32.gmra.mrb[42].mxu0 %vm334_vm0, %v10293_v22 }
 0x122   :  { %7853 = vmatmul.mubr.msk.f32.gmra.mrb[42].mxu1 %vm334_vm0, %v10293_v22  ;;  %1819 = vmatprep.mubr.f32.mxu0 %v9593_v3 }
 0x123   :  { %1980 = vmatprep.mubr.f32.mxu1 %v9593_v3 }
 0x125   :  { %7838 = vmatmul.mubr.msk.f32.gmra.mrb[44].mxu0 %vm334_vm0, %v10304_v23 }
 0x126   :  { %7854 = vmatmul.mubr.msk.f32.gmra.mrb[44].mxu1 %vm334_vm0, %v10304_v23  ;;  %1825 = vmatprep.mubr.f32.mxu0 %v9593_v3 }
 0x127   :  { %1986 = vmatprep.mubr.f32.mxu1 %v9593_v3 }
 0x129   :  { %7839 = vmatmul.mubr.msk.f32.gmra.mrb[46].mxu0 %vm334_vm0, %v10315_v24 }
 0x12a   :  { %7855 = vmatmul.mubr.msk.f32.gmra.mrb[46].mxu1 %vm334_vm0, %v10315_v24  ;;  %1831 = vmatprep.mubr.f32.mxu0 %v9593_v3 }
 0x12b   :  { %1992 = vmatprep.mubr.f32.mxu1 %v9593_v3 }
 0x12d   :  { %7840 = vmatmul.mubr.msk.f32.gmra.mrb[48].mxu0 %vm334_vm0, %v10326_v25 }
 0x12e   :  { %7856 = vmatmul.mubr.msk.f32.gmra.mrb[48].mxu1 %vm334_vm0, %v10326_v25  ;;  %1837 = vmatprep.mubr.f32.mxu0 %v9593_v3 }
 0x12f   :  { %1998 = vmatprep.mubr.f32.mxu1 %v9593_v3 }
 0x131   :  { %7841 = vmatmul.mubr.msk.f32.gmra.mrb[50].mxu0 %vm334_vm0, %v10337_v26 }
 0x132   :  { %7857 = vmatmul.mubr.msk.f32.gmra.mrb[50].mxu1 %vm334_vm0, %v10337_v26  ;;  %1843 = vmatprep.mubr.f32.mxu0 %v9593_v3 }
 0x133   :  { %2004 = vmatprep.mubr.f32.mxu1 %v9593_v3 }
 0x135   :  { %7842 = vmatmul.mubr.msk.f32.gmra.mrb[52].mxu0 %vm334_vm0, %v10348_v27 }
 0x136   :  { %7858 = vmatmul.mubr.msk.f32.gmra.mrb[52].mxu1 %vm334_vm0, %v10348_v27  ;;  %1849 = vmatprep.mubr.f32.mxu0 %v9593_v3 }
 0x137   :  { %2010 = vmatprep.mubr.f32.mxu1 %v9593_v3 }
 0x139   :  { %7843 = vmatmul.mubr.msk.f32.gmra.mrb[54].mxu0 %vm334_vm0, %v10359_v28 }
 0x13a   :  { %7859 = vmatmul.mubr.msk.f32.gmra.mrb[54].mxu1 %vm334_vm0, %v10359_v28  ;;  %1855 = vmatprep.mubr.f32.mxu0 %v9593_v3 }
 0x13b   :  { %2016 = vmatprep.mubr.f32.mxu1 %v9593_v3 }
 0x13d   :  { %7844 = vmatmul.mubr.msk.f32.gmra.mrb[56].mxu0 %vm334_vm0, %v10370_v29 }
 0x13e   :  { %7860 = vmatmul.mubr.msk.f32.gmra.mrb[56].mxu1 %vm334_vm0, %v10370_v29  ;;  %1861 = vmatprep.mubr.f32.mxu0 %v9593_v3 }
 0x13f   :  { %2022 = vmatprep.mubr.f32.mxu1 %v9593_v3 }
 0x141   :  { %7845 = vmatmul.mubr.msk.f32.gmra.mrb[58].mxu0 %vm334_vm0, %v10381_v30 }
 0x142   :  { %7861 = vmatmul.mubr.msk.f32.gmra.mrb[58].mxu1 %vm334_vm0, %v10381_v30  ;;  %1867 = vmatprep.mubr.f32.mxu0 %v9593_v3 }
 0x143   :  { %2028 = vmatprep.mubr.f32.mxu1 %v9593_v3 }
 0x145   :  { %7846 = vmatmul.mubr.msk.f32.gmra.mrb[60].mxu0 %vm334_vm0, %v10392_v31 }
 0x146   :  { %7862 = vmatmul.mubr.msk.f32.gmra.mrb[60].mxu1 %vm334_vm0, %v10392_v31  ;;  %1873 = vmatprep.mubr.f32.mxu0 %v9593_v3 }
 0x147   :  { %2034 = vmatprep.mubr.f32.mxu1 %v9593_v3 }
 0x149   :  { %7847 = vmatmul.mubr.msk.f32.gmra.mrb[62].mxu0 %vm334_vm0, %v10403_v32 }
 0x14a   :  { %7863 = vmatmul.mubr.msk.f32.gmra.mrb[62].mxu1 %vm334_vm0, %v10403_v32  ;;  %2105 = vmatprep.mubr.f32.mxu0 %v9593_v3 }
 0x14b   :  { %2266 = vmatprep.mubr.f32.mxu1 %v9593_v3 }
 0x14d   :  { %7864 = vmatmul.mubr.msk.f32.vlgmr.msra.gmra.mrb[64].mxu0 %vm334_vm0, %v10208_v62 }
 0x14e   :  { %7880 = vmatmul.mubr.msk.f32.vlgmr.msra.gmra.mrb[64].mxu1 %vm334_vm0, %v10208_v62  ;;  %8443 = vmatpush1.bf16.msra.mxu0 %v8442_v0  ;;  %v8464_v62 = vpack.c.bf16 %v129_v15, %v117_v14  ;;  %v155_v0 = vld [vmem:[%s13367_s1 + $0x468] sm:$0xff]  ;;  %v161_v15 = vld [vmem:[%s13367_s1 + $0x498] sm:$0xff] }
 0x14f   :  { %8451 = vmatpush1.bf16.msra.mxu1 %v8450_v4  ;;  %2111 = vmatprep.mubr.f32.mxu0 %v9593_v3  ;;  %v157_v4 = vld [vmem:[%s13367_s1 + $0x478] sm:$0xff]  ;;  %v8476_v6 = vpack.c.bf16 %v155_v0, %v143_v63  ;;  %v171_v14 = vld [vmem:[%s13367_s1 + $0x4e8] sm:$0xff] }
 0x150   :  { %2272 = vmatprep.mubr.f32.mxu1 %v9593_v3  ;;  %8445 = vmatprep.subr.bf16.mxu0 %v8444_v5  ;;  %v8482_v5 = vpack.c.bf16 %v132_v61, %v120_v60  ;;  %v8484_v10 = vpack.c.bf16 %v157_v4, %v145_v2  ;;  %v167_v60 = vld [vmem:[%s13367_s1 + $0x4c8] sm:$0xff]  ;;  %v11266_v63 = vld [vmem:[%s13368_s0 + $0x19] sm:$0xff] }
 0x151   :  { %7865 = vmatmul.mubr.msk.f32.gmra.mrb[66].mxu0 %vm334_vm0, %v10242_v12  ;;  %8453 = vmatprep.subr.bf16.mxu1 %v8452_v9  ;;  %v144_v9 = vld [vmem:[%s13367_s1 + $0x410] sm:$0xff]  ;;  %v179_v61 = vld [vmem:[%s13367_s1 + $0x528] sm:$0xff]  ;;  %v169_v0 = vld [vmem:[%s13367_s1 + $0x4d8] sm:$0xff] }
 0x152   :  { %7881 = vmatmul.mubr.msk.f32.gmra.mrb[66].mxu1 %vm334_vm0, %v10242_v12  ;;  %2117 = vmatprep.mubr.f32.mxu0 %v9593_v3  ;;  %v114_v12 = vld [vmem:[%s13367_s1 + $0x320] sm:$0xff] }
 0x153   :  { %2278 = vmatprep.mubr.f32.mxu1 %v9593_v3  ;;  %8447 = vmatpush1.bf16.msra.mxu0 %v8446_v16  ;;  %v173_v16 = vld [vmem:[%s13367_s1 + $0x4f8] sm:$0xff] }
 0x154   :  { %8455 = vmatpush1.bf16.msra.mxu1 %v8454_v17  ;;  %8457 = vmatprep.subr.bf16.mxu0 %v8456_v18  ;;  %v8478_v17 = vpack.c.bf16 %v154_v8, %v142_v7  ;;  %v8486_v18 = vpack.c.bf16 %v156_v11, %v144_v9  ;;  %v11284_v7 = vld [vmem:[%s13368_s0 + $0x39] sm:$0xff]  ;;  %v11295_v8 = vld [vmem:[%s13368_s0 + $0x41] sm:$0xff]  ;;  %v11328_v11 = vld [vmem:[%s13368_s0 + $0x89] sm:$0xff] }
 0x155   :  { %7866 = vmatmul.mubr.msk.f32.gmra.mrb[68].mxu0 %vm334_vm0, %v10260_v19  ;;  %8465 = vmatprep.subr.bf16.mxu1 %v8464_v62  ;;  %v8488_v62 = vpack.c.bf16 %v171_v14, %v159_v13  ;;  %v11306_v9 = vld [vmem:[%s13368_s0 + $0x61] sm:$0xff]  ;;  %v11339_v13 = vld [vmem:[%s13368_s0 + $0x91] sm:$0xff] }
 0x156   :  { %7882 = vmatmul.mubr.msk.f32.gmra.mrb[68].mxu1 %vm334_vm0, %v10260_v19  ;;  %2123 = vmatprep.mubr.f32.mxu0 %v9593_v3  ;;  %v126_v19 = vld [vmem:[%s13367_s1 + $0x380] sm:$0xff]  ;;  %v11350_v14 = vld [vmem:[%s13368_s0 + $0xb1] sm:$0xff] }
 0x157   :  { %2284 = vmatprep.mubr.f32.mxu1 %v9593_v3 }
 0x159   :  { %7867 = vmatmul.mubr.msk.f32.gmra.mrb[70].mxu0 %vm334_vm0, %v10271_v20 }
 0x15a   :  { %7883 = vmatmul.mubr.msk.f32.gmra.mrb[70].mxu1 %vm334_vm0, %v10271_v20  ;;  %2129 = vmatprep.mubr.f32.mxu0 %v9593_v3  ;;  %v116_v20 = vld [vmem:[%s13367_s1 + $0x330] sm:$0xff] }
 0x15b   :  { %2290 = vmatprep.mubr.f32.mxu1 %v9593_v3 }
 0x15d   :  { %7868 = vmatmul.mubr.msk.f32.gmra.mrb[72].mxu0 %vm334_vm0, %v10282_v21 }
 0x15e   :  { %7884 = vmatmul.mubr.msk.f32.gmra.mrb[72].mxu1 %vm334_vm0, %v10282_v21  ;;  %2135 = vmatprep.mubr.f32.mxu0 %v9593_v3  ;;  %v128_v21 = vld [vmem:[%s13367_s1 + $0x390] sm:$0xff] }
 0x15f   :  { %2296 = vmatprep.mubr.f32.mxu1 %v9593_v3 }
 0x161   :  { %7869 = vmatmul.mubr.msk.f32.gmra.mrb[74].mxu0 %vm334_vm0, %v10293_v22 }
 0x162   :  { %7885 = vmatmul.mubr.msk.f32.gmra.mrb[74].mxu1 %vm334_vm0, %v10293_v22  ;;  %2141 = vmatprep.mubr.f32.mxu0 %v9593_v3  ;;  %v139_v22 = vld [vmem:[%s13367_s1 + $0x3e8] sm:$0xff] }
 0x163   :  { %2302 = vmatprep.mubr.f32.mxu1 %v9593_v3 }
 0x165   :  { %7870 = vmatmul.mubr.msk.f32.gmra.mrb[76].mxu0 %vm334_vm0, %v10304_v23 }
 0x166   :  { %7886 = vmatmul.mubr.msk.f32.gmra.mrb[76].mxu1 %vm334_vm0, %v10304_v23  ;;  %2147 = vmatprep.mubr.f32.mxu0 %v9593_v3  ;;  %v151_v23 = vld [vmem:[%s13367_s1 + $0x448] sm:$0xff] }
 0x167   :  { %2308 = vmatprep.mubr.f32.mxu1 %v9593_v3 }
 0x169   :  { %7871 = vmatmul.mubr.msk.f32.gmra.mrb[78].mxu0 %vm334_vm0, %v10315_v24 }
 0x16a   :  { %7887 = vmatmul.mubr.msk.f32.gmra.mrb[78].mxu1 %vm334_vm0, %v10315_v24  ;;  %2153 = vmatprep.mubr.f32.mxu0 %v9593_v3  ;;  %v10720_v24 = vld [vmem:[%s13368_s0 + $0x1] sm:$0xff] }
 0x16b   :  { %2314 = vmatprep.mubr.f32.mxu1 %v9593_v3 }
 0x16d   :  { %7872 = vmatmul.mubr.msk.f32.gmra.mrb[80].mxu0 %vm334_vm0, %v10326_v25 }
 0x16e   :  { %7888 = vmatmul.mubr.msk.f32.gmra.mrb[80].mxu1 %vm334_vm0, %v10326_v25  ;;  %2159 = vmatprep.mubr.f32.mxu0 %v9593_v3  ;;  %v8458_v25 = vpack.c.bf16 %v126_v19, %v114_v12  ;;  %v8496_v12 = vpack.c.bf16 %v173_v16, %v161_v15  ;;  %v158_v19 = vld [vmem:[%s13367_s1 + $0x480] sm:$0xff] }
 0x16f   :  { %2320 = vmatprep.mubr.f32.mxu1 %v9593_v3  ;;  %v11361_v15 = vld [vmem:[%s13368_s0 + $0xb9] sm:$0xff] }
 0x170   :  { %v11372_v16 = vld [vmem:[%s13368_s0 + $0xd9] sm:$0xff] }
 0x171   :  { %7873 = vmatmul.mubr.msk.f32.gmra.mrb[82].mxu0 %vm334_vm0, %v10337_v26 }
 0x172   :  { %7889 = vmatmul.mubr.msk.f32.gmra.mrb[82].mxu1 %vm334_vm0, %v10337_v26  ;;  %2165 = vmatprep.mubr.f32.mxu0 %v9593_v3  ;;  %v141_v26 = vld [vmem:[%s13367_s1 + $0x3f8] sm:$0xff] }
 0x173   :  { %2326 = vmatprep.mubr.f32.mxu1 %v9593_v3 }
 0x175   :  { %7874 = vmatmul.mubr.msk.f32.gmra.mrb[84].mxu0 %vm334_vm0, %v10348_v27 }
 0x176   :  { %7890 = vmatmul.mubr.msk.f32.gmra.mrb[84].mxu1 %vm334_vm0, %v10348_v27  ;;  %2171 = vmatprep.mubr.f32.mxu0 %v9593_v3  ;;  %v153_v27 = vld [vmem:[%s13367_s1 + $0x458] sm:$0xff] }
 0x177   :  { %2332 = vmatprep.mubr.f32.mxu1 %v9593_v3  ;;  %v8468_v33 = vpack.c.bf16 %v153_v27, %v141_v26  ;;  %v185_v27 = vld [vmem:[%s13367_s1 + $0x558] sm:$0xff] }
 0x179   :  { %7875 = vmatmul.mubr.msk.f32.gmra.mrb[86].mxu0 %vm334_vm0, %v10359_v28 }
 0x17a   :  { %7891 = vmatmul.mubr.msk.f32.gmra.mrb[86].mxu1 %vm334_vm0, %v10359_v28  ;;  %2177 = vmatprep.mubr.f32.mxu0 %v9593_v3  ;;  %v8466_v28 = vpack.c.bf16 %v128_v21, %v116_v20  ;;  %v170_v20 = vld [vmem:[%s13367_s1 + $0x4e0] sm:$0xff]  ;;  %v160_v21 = vld [vmem:[%s13367_s1 + $0x490] sm:$0xff] }
 0x17b   :  { %2338 = vmatprep.mubr.f32.mxu1 %v9593_v3  ;;  %v8490_v26 = vpack.c.bf16 %v170_v20, %v158_v19  ;;  %v11427_v19 = vld [vmem:[%s13368_s0 + $0x131] sm:$0xff]  ;;  %v166_v20 = vld [vmem:[%s13367_s1 + $0x4c0] sm:$0xff] }
 0x17d   :  { %7876 = vmatmul.mubr.msk.f32.gmra.mrb[88].mxu0 %vm334_vm0, %v10370_v29 }
 0x17e   :  { %7892 = vmatmul.mubr.msk.f32.gmra.mrb[88].mxu1 %vm334_vm0, %v10370_v29  ;;  %2183 = vmatprep.mubr.f32.mxu0 %v9593_v3  ;;  %v8460_v29 = vpack.c.bf16 %v151_v23, %v139_v22  ;;  %v172_v22 = vld [vmem:[%s13367_s1 + $0x4f0] sm:$0xff]  ;;  %v183_v23 = vld [vmem:[%s13367_s1 + $0x548] sm:$0xff] }
 0x17f   :  { %2344 = vmatprep.mubr.f32.mxu1 %v9593_v3 }
 0x181   :  { %7877 = vmatmul.mubr.msk.f32.gmra.mrb[90].mxu0 %vm334_vm0, %v10381_v30 }
 0x182   :  { %7893 = vmatmul.mubr.msk.f32.gmra.mrb[90].mxu1 %vm334_vm0, %v10381_v30  ;;  %2189 = vmatprep.mubr.f32.mxu0 %v9593_v3  ;;  %v138_v30 = vld [vmem:[%s13367_s1 + $0x3e0] sm:$0xff] }
 0x183   :  { %2350 = vmatprep.mubr.f32.mxu1 %v9593_v3 }
 0x185   :  { %7878 = vmatmul.mubr.msk.f32.gmra.mrb[92].mxu0 %vm334_vm0, %v10392_v31 }
 0x186   :  { %7894 = vmatmul.mubr.msk.f32.gmra.mrb[92].mxu1 %vm334_vm0, %v10392_v31  ;;  %2195 = vmatprep.mubr.f32.mxu0 %v9593_v3  ;;  %v150_v31 = vld [vmem:[%s13367_s1 + $0x440] sm:$0xff] }
 0x187   :  { %2356 = vmatprep.mubr.f32.mxu1 %v9593_v3  ;;  %v8462_v42 = vpack.c.bf16 %v150_v31, %v138_v30  ;;  %v182_v31 = vld [vmem:[%s13367_s1 + $0x540] sm:$0xff] }
 0x189   :  { %7879 = vmatmul.mubr.msk.f32.gmra.mrb[94].mxu0 %vm334_vm0, %v10403_v32 }
 0x18a   :  { %7895 = vmatmul.mubr.msk.f32.gmra.mrb[94].mxu1 %vm334_vm0, %v10403_v32  ;;  %2491 = vmatprep.mubr.f32.mxu0 %v9593_v3  ;;  %v140_v32 = vld [vmem:[%s13367_s1 + $0x3f0] sm:$0xff] }
 0x18b   :  { %2652 = vmatprep.mubr.f32.mxu1 %v9593_v3  ;;  %v8470_v43 = vpack.c.bf16 %v152_v35, %v140_v32  ;;  %v194_v32 = vld [vmem:[%s13367_s1 + $0x5a0] sm:$0xff] }
 0x18d   :  { %7896 = vmatmul.mubr.msk.f32.vlgmr.msra.gmra.mrb[0].mxu0 %vm334_vm0, %v10720_v24 }
 0x18e   :  { %7912 = vmatmul.mubr.msk.f32.vlgmr.msra.gmra.mrb[0].mxu1 %vm334_vm0, %v10720_v24  ;;  %8459 = vmatpush1.bf16.msra.mxu0 %v8458_v25  ;;  %v195_v25 = vld [vmem:[%s13367_s1 + $0x5a8] sm:$0xff] }
 0x18f   :  { %8467 = vmatpush1.bf16.msra.mxu1 %v8466_v28  ;;  %2497 = vmatprep.mubr.f32.mxu0 %v9593_v3  ;;  %v197_v28 = vld [vmem:[%s13367_s1 + $0x5b8] sm:$0xff]  ;;  %v8492_v30 = vpack.c.bf16 %v195_v25, %v183_v23  ;;  %v180_v23 = vld [vmem:[%s13367_s1 + $0x530] sm:$0xff]  ;;  %v191_v25 = vld [vmem:[%s13367_s1 + $0x588] sm:$0xff] }
 0x190   :  { %2658 = vmatprep.mubr.f32.mxu1 %v9593_v3  ;;  %8461 = vmatprep.subr.bf16.mxu0 %v8460_v29  ;;  %v8498_v29 = vpack.c.bf16 %v172_v22, %v160_v21  ;;  %v8500_v35 = vpack.c.bf16 %v197_v28, %v185_v27  ;;  %v178_v21 = vld [vmem:[%s13367_s1 + $0x520] sm:$0xff]  ;;  %v168_v22 = vld [vmem:[%s13367_s1 + $0x4d0] sm:$0xff]  ;;  %v193_v28 = vld [vmem:[%s13367_s1 + $0x598] sm:$0xff] }
 0x191   :  { %7897 = vmatmul.mubr.msk.f32.gmra.mrb[2].mxu0 %vm334_vm0, %v10754_v39  ;;  %8469 = vmatprep.subr.bf16.mxu1 %v8468_v33  ;;  %v184_v33 = vld [vmem:[%s13367_s1 + $0x550] sm:$0xff]  ;;  %v8522_v27 = vpack.c.bf16 %v178_v21, %v166_v20 }
 0x192   :  { %7913 = vmatmul.mubr.msk.f32.gmra.mrb[2].mxu1 %vm334_vm0, %v10754_v39  ;;  %2503 = vmatprep.mubr.f32.mxu0 %v9593_v3  ;;  %v248_v21 = vld [vmem:[%s13367_s1 + $0x750] sm:$0xff] }
 0x193   :  { %2664 = vmatprep.mubr.f32.mxu1 %v9593_v3  ;;  %8463 = vmatpush1.bf16.msra.mxu0 %v8462_v42  ;;  %v177_v42 = vld [vmem:[%s13367_s1 + $0x518] sm:$0xff] }
 0x194   :  { %8471 = vmatpush1.bf16.msra.mxu1 %v8470_v43  ;;  %8473 = vmatprep.subr.bf16.mxu0 %v8472_v44  ;;  %v8494_v43 = vpack.c.bf16 %v194_v32, %v182_v31  ;;  %v8502_v44 = vpack.c.bf16 %v196_v36, %v184_v33  ;;  %v190_v32 = vld [vmem:[%s13367_s1 + $0x580] sm:$0xff] }
 0x195   :  { %7898 = vmatmul.mubr.msk.f32.gmra.mrb[4].mxu0 %vm334_vm0, %v10772_v46  ;;  %8481 = vmatprep.subr.bf16.mxu1 %v8480_v45  ;;  %v8504_v45 = vpack.c.bf16 %v175_v40, %v163_v37  ;;  %v202_v33 = vld [vmem:[%s13367_s1 + $0x5e0] sm:$0xff]  ;;  %v204_v37 = vld [vmem:[%s13367_s1 + $0x5f0] sm:$0xff]  ;;  %v207_v40 = vld [vmem:[%s13367_s1 + $0x608] sm:$0xff] }
 0x196   :  { %7914 = vmatmul.mubr.msk.f32.gmra.mrb[4].mxu1 %vm334_vm0, %v10772_v46  ;;  %2509 = vmatprep.mubr.f32.mxu0 %v9593_v3 }
 0x197   :  { %2670 = vmatprep.mubr.f32.mxu1 %v9593_v3 }
 0x199   :  { %7899 = vmatmul.mubr.msk.f32.gmra.mrb[6].mxu0 %vm334_vm0, %v10783_v47 }
 0x19a   :  { %7915 = vmatmul.mubr.msk.f32.gmra.mrb[6].mxu1 %vm334_vm0, %v10783_v47  ;;  %2515 = vmatprep.mubr.f32.mxu0 %v9593_v3 }
 0x19b   :  { %2676 = vmatprep.mubr.f32.mxu1 %v9593_v3 }
 0x19d   :  { %7900 = vmatmul.mubr.msk.f32.gmra.mrb[8].mxu0 %vm334_vm0, %v10794_v48 }
 0x19e   :  { %7916 = vmatmul.mubr.msk.f32.gmra.mrb[8].mxu1 %vm334_vm0, %v10794_v48  ;;  %2521 = vmatprep.mubr.f32.mxu0 %v9593_v3 }
 0x19f   :  { %2682 = vmatprep.mubr.f32.mxu1 %v9593_v3 }
 0x1a1   :  { %7901 = vmatmul.mubr.msk.f32.gmra.mrb[10].mxu0 %vm334_vm0, %v10805_v49 }
 0x1a2   :  { %7917 = vmatmul.mubr.msk.f32.gmra.mrb[10].mxu1 %vm334_vm0, %v10805_v49  ;;  %2527 = vmatprep.mubr.f32.mxu0 %v9593_v3 }
 0x1a3   :  { %2688 = vmatprep.mubr.f32.mxu1 %v9593_v3 }
 0x1a5   :  { %7902 = vmatmul.mubr.msk.f32.gmra.mrb[12].mxu0 %vm334_vm0, %v10816_v50 }
 0x1a6   :  { %7918 = vmatmul.mubr.msk.f32.gmra.mrb[12].mxu1 %vm334_vm0, %v10816_v50  ;;  %2533 = vmatprep.mubr.f32.mxu0 %v9593_v3 }
 0x1a7   :  { %2694 = vmatprep.mubr.f32.mxu1 %v9593_v3 }
 0x1a9   :  { %7903 = vmatmul.mubr.msk.f32.gmra.mrb[14].mxu0 %vm334_vm0, %v10827_v52 }
 0x1aa   :  { %7919 = vmatmul.mubr.msk.f32.gmra.mrb[14].mxu1 %vm334_vm0, %v10827_v52  ;;  %2539 = vmatprep.mubr.f32.mxu0 %v9593_v3 }
 0x1ab   :  { %2700 = vmatprep.mubr.f32.mxu1 %v9593_v3 }
 0x1ad   :  { %7904 = vmatmul.mubr.msk.f32.gmra.mrb[16].mxu0 %vm334_vm0, %v10838_v53 }
 0x1ae   :  { %7920 = vmatmul.mubr.msk.f32.gmra.mrb[16].mxu1 %vm334_vm0, %v10838_v53  ;;  %2545 = vmatprep.mubr.f32.mxu0 %v9593_v3 }
 0x1af   :  { %2706 = vmatprep.mubr.f32.mxu1 %v9593_v3 }
 0x1b1   :  { %7905 = vmatmul.mubr.msk.f32.gmra.mrb[18].mxu0 %vm334_vm0, %v10849_v54 }
 0x1b2   :  { %7921 = vmatmul.mubr.msk.f32.gmra.mrb[18].mxu1 %vm334_vm0, %v10849_v54  ;;  %2551 = vmatprep.mubr.f32.mxu0 %v9593_v3 }
 0x1b3   :  { %2712 = vmatprep.mubr.f32.mxu1 %v9593_v3 }
 0x1b5   :  { %7906 = vmatmul.mubr.msk.f32.gmra.mrb[20].mxu0 %vm334_vm0, %v10860_v55 }
 0x1b6   :  { %7922 = vmatmul.mubr.msk.f32.gmra.mrb[20].mxu1 %vm334_vm0, %v10860_v55  ;;  %2557 = vmatprep.mubr.f32.mxu0 %v9593_v3 }
 0x1b7   :  { %2718 = vmatprep.mubr.f32.mxu1 %v9593_v3 }
 0x1b9   :  { %7907 = vmatmul.mubr.msk.f32.gmra.mrb[22].mxu0 %vm334_vm0, %v10871_v56 }
 0x1ba   :  { %7923 = vmatmul.mubr.msk.f32.gmra.mrb[22].mxu1 %vm334_vm0, %v10871_v56  ;;  %2563 = vmatprep.mubr.f32.mxu0 %v9593_v3 }
 0x1bb   :  { %2724 = vmatprep.mubr.f32.mxu1 %v9593_v3 }
 0x1bd   :  { %7908 = vmatmul.mubr.msk.f32.gmra.mrb[24].mxu0 %vm334_vm0, %v10882_v57 }
 0x1be   :  { %7924 = vmatmul.mubr.msk.f32.gmra.mrb[24].mxu1 %vm334_vm0, %v10882_v57  ;;  %2569 = vmatprep.mubr.f32.mxu0 %v9593_v3 }
 0x1bf   :  { %2730 = vmatprep.mubr.f32.mxu1 %v9593_v3 }
 0x1c1   :  { %7909 = vmatmul.mubr.msk.f32.gmra.mrb[26].mxu0 %vm334_vm0, %v10893_v34 }
 0x1c2   :  { %7925 = vmatmul.mubr.msk.f32.gmra.mrb[26].mxu1 %vm334_vm0, %v10893_v34  ;;  %2575 = vmatprep.mubr.f32.mxu0 %v9593_v3 }
 0x1c3   :  { %2736 = vmatprep.mubr.f32.mxu1 %v9593_v3 }
 0x1c5   :  { %7910 = vmatmul.mubr.msk.f32.gmra.mrb[28].mxu0 %vm334_vm0, %v10904_v38 }
 0x1c6   :  { %7926 = vmatmul.mubr.msk.f32.gmra.mrb[28].mxu1 %vm334_vm0, %v10904_v38  ;;  %2581 = vmatprep.mubr.f32.mxu0 %v9593_v3 }
 0x1c7   :  { %2742 = vmatprep.mubr.f32.mxu1 %v9593_v3 }
 0x1c9   :  { %7911 = vmatmul.mubr.msk.f32.gmra.mrb[30].mxu0 %vm334_vm0, %v10915_v51 }
 0x1ca   :  { %7927 = vmatmul.mubr.msk.f32.gmra.mrb[30].mxu1 %vm334_vm0, %v10915_v51  ;;  %2813 = vmatprep.mubr.f32.mxu0 %v9593_v3 }
 0x1cb   :  { %2974 = vmatprep.mubr.f32.mxu1 %v9593_v3 }
 0x1cd   :  { %7928 = vmatmul.mubr.msk.f32.vlgmr.msra.gmra.mrb[32].mxu0 %vm334_vm0, %v10720_v24 }
 0x1ce   :  { %7944 = vmatmul.mubr.msk.f32.vlgmr.msra.gmra.mrb[32].mxu1 %vm334_vm0, %v10720_v24  ;;  %8475 = vmatpush1.bf16.msra.mxu0 %v8474_v1  ;;  %v181_v1 = vld [vmem:[%s13367_s1 + $0x538] sm:$0xff] }
 0x1cf   :  { %8483 = vmatpush1.bf16.msra.mxu1 %v8482_v5  ;;  %2819 = vmatprep.mubr.f32.mxu0 %v9593_v3  ;;  %v8520_v5 = vpack.c.bf16 %v179_v61, %v167_v60  ;;  %v244_v60 = vld [vmem:[%s13367_s1 + $0x730] sm:$0xff]  ;;  %v211_v61 = vld [vmem:[%s13367_s1 + $0x628] sm:$0xff] }
 0x1d0   :  { %2980 = vmatprep.mubr.f32.mxu1 %v9593_v3  ;;  %8477 = vmatprep.subr.bf16.mxu0 %v8476_v6  ;;  %v8528_v6 = vpack.c.bf16 %v181_v1, %v169_v0  ;;  %v223_v0 = vld [vmem:[%s13367_s1 + $0x688] sm:$0xff]  ;;  %v213_v1 = vld [vmem:[%s13367_s1 + $0x638] sm:$0xff] }
 0x1d1   :  { %7929 = vmatmul.mubr.msk.f32.gmra.mrb[34].mxu0 %vm334_vm0, %v10754_v39  ;;  %8485 = vmatprep.subr.bf16.mxu1 %v8484_v10  ;;  %v11317_v10 = vld [vmem:[%s13368_s0 + $0x69] sm:$0xff] }
 0x1d2   :  { %7945 = vmatmul.mubr.msk.f32.gmra.mrb[34].mxu1 %vm334_vm0, %v10754_v39  ;;  %2825 = vmatprep.mubr.f32.mxu0 %v9593_v3 }
 0x1d3   :  { %2986 = vmatprep.mubr.f32.mxu1 %v9593_v3  ;;  %8479 = vmatpush1.bf16.msra.mxu0 %v8478_v17  ;;  %v11383_v17 = vld [vmem:[%s13368_s0 + $0xe1] sm:$0xff] }
 0x1d4   :  { %8487 = vmatpush1.bf16.msra.mxu1 %v8486_v18  ;;  %8489 = vmatprep.subr.bf16.mxu0 %v8488_v62  ;;  %v11394_v18 = vld [vmem:[%s13368_s0 + $0x101] sm:$0xff]  ;;  %v11405_v62 = vld [vmem:[%s13368_s0 + $0x109] sm:$0xff] }
 0x1d5   :  { %7930 = vmatmul.mubr.msk.f32.gmra.mrb[36].mxu0 %vm334_vm0, %v10772_v46  ;;  %8497 = vmatprep.subr.bf16.mxu1 %v8496_v12  ;;  %v11416_v12 = vld [vmem:[%s13368_s0 + $0x129] sm:$0xff] }
 0x1d6   :  { %7946 = vmatmul.mubr.msk.f32.gmra.mrb[36].mxu1 %vm334_vm0, %v10772_v46  ;;  %2831 = vmatprep.mubr.f32.mxu0 %v9593_v3 }
 0x1d7   :  { %2992 = vmatprep.mubr.f32.mxu1 %v9593_v3 }
 0x1d9   :  { %7931 = vmatmul.mubr.msk.f32.gmra.mrb[38].mxu0 %vm334_vm0, %v10783_v47 }
 0x1da   :  { %7947 = vmatmul.mubr.msk.f32.gmra.mrb[38].mxu1 %vm334_vm0, %v10783_v47  ;;  %2837 = vmatprep.mubr.f32.mxu0 %v9593_v3 }
 0x1db   :  { %2998 = vmatprep.mubr.f32.mxu1 %v9593_v3 }
 0x1dd   :  { %7932 = vmatmul.mubr.msk.f32.gmra.mrb[40].mxu0 %vm334_vm0, %v10794_v48 }
 0x1de   :  { %7948 = vmatmul.mubr.msk.f32.gmra.mrb[40].mxu1 %vm334_vm0, %v10794_v48  ;;  %2843 = vmatprep.mubr.f32.mxu0 %v9593_v3 }
 0x1df   :  { %3004 = vmatprep.mubr.f32.mxu1 %v9593_v3 }
 0x1e1   :  { %7933 = vmatmul.mubr.msk.f32.gmra.mrb[42].mxu0 %vm334_vm0, %v10805_v49 }
 0x1e2   :  { %7949 = vmatmul.mubr.msk.f32.gmra.mrb[42].mxu1 %vm334_vm0, %v10805_v49  ;;  %2849 = vmatprep.mubr.f32.mxu0 %v9593_v3 }
 0x1e3   :  { %3010 = vmatprep.mubr.f32.mxu1 %v9593_v3 }
 0x1e5   :  { %7934 = vmatmul.mubr.msk.f32.gmra.mrb[44].mxu0 %vm334_vm0, %v10816_v50 }
 0x1e6   :  { %7950 = vmatmul.mubr.msk.f32.gmra.mrb[44].mxu1 %vm334_vm0, %v10816_v50  ;;  %2855 = vmatprep.mubr.f32.mxu0 %v9593_v3 }
 0x1e7   :  { %3016 = vmatprep.mubr.f32.mxu1 %v9593_v3 }
 0x1e9   :  { %7935 = vmatmul.mubr.msk.f32.gmra.mrb[46].mxu0 %vm334_vm0, %v10827_v52 }
 0x1ea   :  { %7951 = vmatmul.mubr.msk.f32.gmra.mrb[46].mxu1 %vm334_vm0, %v10827_v52  ;;  %2861 = vmatprep.mubr.f32.mxu0 %v9593_v3 }
 0x1eb   :  { %3022 = vmatprep.mubr.f32.mxu1 %v9593_v3 }
 0x1ed   :  { %7936 = vmatmul.mubr.msk.f32.gmra.mrb[48].mxu0 %vm334_vm0, %v10838_v53 }
 0x1ee   :  { %7952 = vmatmul.mubr.msk.f32.gmra.mrb[48].mxu1 %vm334_vm0, %v10838_v53  ;;  %2867 = vmatprep.mubr.f32.mxu0 %v9593_v3 }
 0x1ef   :  { %3028 = vmatprep.mubr.f32.mxu1 %v9593_v3 }
 0x1f1   :  { %7937 = vmatmul.mubr.msk.f32.gmra.mrb[50].mxu0 %vm334_vm0, %v10849_v54 }
 0x1f2   :  { %7953 = vmatmul.mubr.msk.f32.gmra.mrb[50].mxu1 %vm334_vm0, %v10849_v54  ;;  %2873 = vmatprep.mubr.f32.mxu0 %v9593_v3 }
 0x1f3   :  { %3034 = vmatprep.mubr.f32.mxu1 %v9593_v3 }
 0x1f5   :  { %7938 = vmatmul.mubr.msk.f32.gmra.mrb[52].mxu0 %vm334_vm0, %v10860_v55 }
 0x1f6   :  { %7954 = vmatmul.mubr.msk.f32.gmra.mrb[52].mxu1 %vm334_vm0, %v10860_v55  ;;  %2879 = vmatprep.mubr.f32.mxu0 %v9593_v3 }
 0x1f7   :  { %3040 = vmatprep.mubr.f32.mxu1 %v9593_v3 }
 0x1f9   :  { %7939 = vmatmul.mubr.msk.f32.gmra.mrb[54].mxu0 %vm334_vm0, %v10871_v56 }
 0x1fa   :  { %7955 = vmatmul.mubr.msk.f32.gmra.mrb[54].mxu1 %vm334_vm0, %v10871_v56  ;;  %2885 = vmatprep.mubr.f32.mxu0 %v9593_v3 }
 0x1fb   :  { %3046 = vmatprep.mubr.f32.mxu1 %v9593_v3 }
 0x1fd   :  { %7940 = vmatmul.mubr.msk.f32.gmra.mrb[56].mxu0 %vm334_vm0, %v10882_v57 }
 0x1fe   :  { %7956 = vmatmul.mubr.msk.f32.gmra.mrb[56].mxu1 %vm334_vm0, %v10882_v57  ;;  %2891 = vmatprep.mubr.f32.mxu0 %v9593_v3 }
 0x1ff   :  { %3052 = vmatprep.mubr.f32.mxu1 %v9593_v3 }
 0x201   :  { %7941 = vmatmul.mubr.msk.f32.gmra.mrb[58].mxu0 %vm334_vm0, %v10893_v34 }
 0x202   :  { %7957 = vmatmul.mubr.msk.f32.gmra.mrb[58].mxu1 %vm334_vm0, %v10893_v34  ;;  %2897 = vmatprep.mubr.f32.mxu0 %v9593_v3 }
 0x203   :  { %3058 = vmatprep.mubr.f32.mxu1 %v9593_v3 }
 0x205   :  { %7942 = vmatmul.mubr.msk.f32.gmra.mrb[60].mxu0 %vm334_vm0, %v10904_v38 }
 0x206   :  { %7958 = vmatmul.mubr.msk.f32.gmra.mrb[60].mxu1 %vm334_vm0, %v10904_v38  ;;  %2903 = vmatprep.mubr.f32.mxu0 %v9593_v3 }
 0x207   :  { %3064 = vmatprep.mubr.f32.mxu1 %v9593_v3 }
 0x209   :  { %7943 = vmatmul.mubr.msk.f32.gmra.mrb[62].mxu0 %vm334_vm0, %v10915_v51 }
 0x20a   :  { %7959 = vmatmul.mubr.msk.f32.gmra.mrb[62].mxu1 %vm334_vm0, %v10915_v51  ;;  %3135 = vmatprep.mubr.f32.mxu0 %v9593_v3 }
 0x20b   :  { %3296 = vmatprep.mubr.f32.mxu1 %v9593_v3 }
 0x20d   :  { %7960 = vmatmul.mubr.msk.f32.vlgmr.msra.gmra.mrb[64].mxu0 %vm334_vm0, %v10720_v24 }
 0x20e   :  { %7976 = vmatmul.mubr.msk.f32.vlgmr.msra.gmra.mrb[64].mxu1 %vm334_vm0, %v10720_v24  ;;  %8491 = vmatpush1.bf16.msra.mxu0 %v8490_v26  ;;  %v8512_v24 = vpack.c.bf16 %v177_v42, %v165_v41  ;;  %v203_v26 = vld [vmem:[%s13367_s1 + $0x5e8] sm:$0xff]  ;;  %v209_v42 = vld [vmem:[%s13367_s1 + $0x618] sm:$0xff] }
 0x20f   :  { %8499 = vmatpush1.bf16.msra.mxu1 %v8498_v29  ;;  %3141 = vmatprep.mubr.f32.mxu0 %v9593_v3  ;;  %v205_v29 = vld [vmem:[%s13367_s1 + $0x5f8] sm:$0xff]  ;;  %v8524_v31 = vpack.c.bf16 %v203_v26, %v191_v25  ;;  %v219_v41 = vld [vmem:[%s13367_s1 + $0x668] sm:$0xff] }
 0x210   :  { %3302 = vmatprep.mubr.f32.mxu1 %v9593_v3  ;;  %8493 = vmatprep.subr.bf16.mxu0 %v8492_v30  ;;  %v8530_v30 = vpack.c.bf16 %v180_v23, %v168_v22  ;;  %v8532_v36 = vpack.c.bf16 %v205_v29, %v193_v28  ;;  %v215_v22 = vld [vmem:[%s13367_s1 + $0x648] sm:$0xff]  ;;  %v217_v26 = vld [vmem:[%s13367_s1 + $0x658] sm:$0xff] }
 0x211   :  { %7961 = vmatmul.mubr.msk.f32.gmra.mrb[66].mxu0 %vm334_vm0, %v10754_v39  ;;  %8501 = vmatprep.subr.bf16.mxu1 %v8500_v35  ;;  %v192_v35 = vld [vmem:[%s13367_s1 + $0x590] sm:$0xff]  ;;  %v227_v23 = vld [vmem:[%s13367_s1 + $0x6a8] sm:$0xff] }
 0x212   :  { %7977 = vmatmul.mubr.msk.f32.gmra.mrb[66].mxu1 %vm334_vm0, %v10754_v39  ;;  %3147 = vmatprep.mubr.f32.mxu0 %v9593_v3  ;;  %v162_v39 = vld [vmem:[%s13367_s1 + $0x4a0] sm:$0xff]  ;;  %v11778_v25 = vld [vmem:[%s13368_s0 + $0xa] sm:$0xff] }
 0x213   :  { %3308 = vmatprep.mubr.f32.mxu1 %v9593_v3  ;;  %8495 = vmatpush1.bf16.msra.mxu0 %v8494_v43  ;;  %v221_v43 = vld [vmem:[%s13367_s1 + $0x678] sm:$0xff] }
 0x214   :  { %8503 = vmatpush1.bf16.msra.mxu1 %v8502_v44  ;;  %8505 = vmatprep.subr.bf16.mxu0 %v8504_v45  ;;  %v8526_v44 = vpack.c.bf16 %v202_v33, %v190_v32  ;;  %v8534_v45 = vpack.c.bf16 %v204_v37, %v192_v35  ;;  %v11796_v32 = vld [vmem:[%s13368_s0 + $0x2a] sm:$0xff]  ;;  %v11807_v33 = vld [vmem:[%s13368_s0 + $0x32] sm:$0xff]  ;;  %v11840_v37 = vld [vmem:[%s13368_s0 + $0x7a] sm:$0xff] }
 0x215   :  { %7962 = vmatmul.mubr.msk.f32.gmra.mrb[68].mxu0 %vm334_vm0, %v10772_v46  ;;  %8513 = vmatprep.subr.bf16.mxu1 %v8512_v24  ;;  %v8536_v24 = vpack.c.bf16 %v219_v41, %v207_v40  ;;  %v11818_v35 = vld [vmem:[%s13368_s0 + $0x52] sm:$0xff]  ;;  %v11851_v40 = vld [vmem:[%s13368_s0 + $0x82] sm:$0xff] }
 0x216   :  { %7978 = vmatmul.mubr.msk.f32.gmra.mrb[68].mxu1 %vm334_vm0, %v10772_v46  ;;  %3153 = vmatprep.mubr.f32.mxu0 %v9593_v3  ;;  %v174_v46 = vld [vmem:[%s13367_s1 + $0x500] sm:$0xff] }
 0x217   :  { %3314 = vmatprep.mubr.f32.mxu1 %v9593_v3  ;;  %v11862_v41 = vld [vmem:[%s13368_s0 + $0xa2] sm:$0xff] }
 0x219   :  { %7963 = vmatmul.mubr.msk.f32.gmra.mrb[70].mxu0 %vm334_vm0, %v10783_v47 }
 0x21a   :  { %7979 = vmatmul.mubr.msk.f32.gmra.mrb[70].mxu1 %vm334_vm0, %v10783_v47  ;;  %3159 = vmatprep.mubr.f32.mxu0 %v9593_v3  ;;  %v164_v47 = vld [vmem:[%s13367_s1 + $0x4b0] sm:$0xff] }
 0x21b   :  { %3320 = vmatprep.mubr.f32.mxu1 %v9593_v3 }
 0x21d   :  { %7964 = vmatmul.mubr.msk.f32.gmra.mrb[72].mxu0 %vm334_vm0, %v10794_v48 }
 0x21e   :  { %7980 = vmatmul.mubr.msk.f32.gmra.mrb[72].mxu1 %vm334_vm0, %v10794_v48  ;;  %3165 = vmatprep.mubr.f32.mxu0 %v9593_v3  ;;  %v176_v48 = vld [vmem:[%s13367_s1 + $0x510] sm:$0xff] }
 0x21f   :  { %3326 = vmatprep.mubr.f32.mxu1 %v9593_v3 }
 0x221   :  { %7965 = vmatmul.mubr.msk.f32.gmra.mrb[74].mxu0 %vm334_vm0, %v10805_v49 }
 0x222   :  { %7981 = vmatmul.mubr.msk.f32.gmra.mrb[74].mxu1 %vm334_vm0, %v10805_v49  ;;  %3171 = vmatprep.mubr.f32.mxu0 %v9593_v3  ;;  %v187_v49 = vld [vmem:[%s13367_s1 + $0x568] sm:$0xff] }
 0x223   :  { %3332 = vmatprep.mubr.f32.mxu1 %v9593_v3 }
 0x225   :  { %7966 = vmatmul.mubr.msk.f32.gmra.mrb[76].mxu0 %vm334_vm0, %v10816_v50 }
 0x226   :  { %7982 = vmatmul.mubr.msk.f32.gmra.mrb[76].mxu1 %vm334_vm0, %v10816_v50  ;;  %3177 = vmatprep.mubr.f32.mxu0 %v9593_v3  ;;  %v199_v50 = vld [vmem:[%s13367_s1 + $0x5c8] sm:$0xff] }
 0x227   :  { %3338 = vmatprep.mubr.f32.mxu1 %v9593_v3 }
 0x229   :  { %7967 = vmatmul.mubr.msk.f32.gmra.mrb[78].mxu0 %vm334_vm0, %v10827_v52 }
 0x22a   :  { %7983 = vmatmul.mubr.msk.f32.gmra.mrb[78].mxu1 %vm334_vm0, %v10827_v52  ;;  %3183 = vmatprep.mubr.f32.mxu0 %v9593_v3  ;;  %v11232_v52 = vld [vmem:[%s13368_s0 + $0x11] sm:$0xff] }
 0x22b   :  { %3344 = vmatprep.mubr.f32.mxu1 %v9593_v3 }
 0x22d   :  { %7968 = vmatmul.mubr.msk.f32.gmra.mrb[80].mxu0 %vm334_vm0, %v10838_v53 }
 0x22e   :  { %7984 = vmatmul.mubr.msk.f32.gmra.mrb[80].mxu1 %vm334_vm0, %v10838_v53  ;;  %3189 = vmatprep.mubr.f32.mxu0 %v9593_v3  ;;  %v8506_v53 = vpack.c.bf16 %v174_v46, %v162_v39  ;;  %v8544_v39 = vpack.c.bf16 %v221_v43, %v209_v42  ;;  %v206_v46 = vld [vmem:[%s13367_s1 + $0x600] sm:$0xff]  ;;  %v11873_v42 = vld [vmem:[%s13368_s0 + $0xaa] sm:$0xff] }
 0x22f   :  { %3350 = vmatprep.mubr.f32.mxu1 %v9593_v3  ;;  %v11884_v43 = vld [vmem:[%s13368_s0 + $0xca] sm:$0xff] }
 0x231   :  { %7969 = vmatmul.mubr.msk.f32.gmra.mrb[82].mxu0 %vm334_vm0, %v10849_v54 }
 0x232   :  { %7985 = vmatmul.mubr.msk.f32.gmra.mrb[82].mxu1 %vm334_vm0, %v10849_v54  ;;  %3195 = vmatprep.mubr.f32.mxu0 %v9593_v3  ;;  %v189_v54 = vld [vmem:[%s13367_s1 + $0x578] sm:$0xff] }
 0x233   :  { %3356 = vmatprep.mubr.f32.mxu1 %v9593_v3 }
 0x235   :  { %7970 = vmatmul.mubr.msk.f32.gmra.mrb[84].mxu0 %vm334_vm0, %v10860_v55 }
 0x236   :  { %7986 = vmatmul.mubr.msk.f32.gmra.mrb[84].mxu1 %vm334_vm0, %v10860_v55  ;;  %3201 = vmatprep.mubr.f32.mxu0 %v9593_v3  ;;  %v201_v55 = vld [vmem:[%s13367_s1 + $0x5d8] sm:$0xff] }
 0x237   :  { %3362 = vmatprep.mubr.f32.mxu1 %v9593_v3  ;;  %v8516_v58 = vpack.c.bf16 %v201_v55, %v189_v54  ;;  %v233_v55 = vld [vmem:[%s13367_s1 + $0x6d8] sm:$0xff] }
 0x239   :  { %7971 = vmatmul.mubr.msk.f32.gmra.mrb[86].mxu0 %vm334_vm0, %v10871_v56 }
 0x23a   :  { %7987 = vmatmul.mubr.msk.f32.gmra.mrb[86].mxu1 %vm334_vm0, %v10871_v56  ;;  %3207 = vmatprep.mubr.f32.mxu0 %v9593_v3  ;;  %v8514_v56 = vpack.c.bf16 %v176_v48, %v164_v47  ;;  %v218_v47 = vld [vmem:[%s13367_s1 + $0x660] sm:$0xff]  ;;  %v208_v48 = vld [vmem:[%s13367_s1 + $0x610] sm:$0xff] }
 0x23b   :  { %3368 = vmatprep.mubr.f32.mxu1 %v9593_v3  ;;  %v8538_v54 = vpack.c.bf16 %v218_v47, %v206_v46  ;;  %v11939_v46 = vld [vmem:[%s13368_s0 + $0x122] sm:$0xff] }
 0x23c   :  { %v214_v47 = vld [vmem:[%s13367_s1 + $0x640] sm:$0xff] }
 0x23d   :  { %7972 = vmatmul.mubr.msk.f32.gmra.mrb[88].mxu0 %vm334_vm0, %v10882_v57 }
 0x23e   :  { %7988 = vmatmul.mubr.msk.f32.gmra.mrb[88].mxu1 %vm334_vm0, %v10882_v57  ;;  %3213 = vmatprep.mubr.f32.mxu0 %v9593_v3  ;;  %v8508_v57 = vpack.c.bf16 %v199_v50, %v187_v49  ;;  %v220_v49 = vld [vmem:[%s13367_s1 + $0x670] sm:$0xff]  ;;  %v231_v50 = vld [vmem:[%s13367_s1 + $0x6c8] sm:$0xff] }
 0x23f   :  { %3374 = vmatprep.mubr.f32.mxu1 %v9593_v3 }
 0x241   :  { %7973 = vmatmul.mubr.msk.f32.gmra.mrb[90].mxu0 %vm334_vm0, %v10893_v34 }
 0x242   :  { %7989 = vmatmul.mubr.msk.f32.gmra.mrb[90].mxu1 %vm334_vm0, %v10893_v34  ;;  %3219 = vmatprep.mubr.f32.mxu0 %v9593_v3  ;;  %v186_v34 = vld [vmem:[%s13367_s1 + $0x560] sm:$0xff] }
 0x243   :  { %3380 = vmatprep.mubr.f32.mxu1 %v9593_v3 }
 0x245   :  { %7974 = vmatmul.mubr.msk.f32.gmra.mrb[92].mxu0 %vm334_vm0, %v10904_v38 }
 0x246   :  { %7990 = vmatmul.mubr.msk.f32.gmra.mrb[92].mxu1 %vm334_vm0, %v10904_v38  ;;  %3225 = vmatprep.mubr.f32.mxu0 %v9593_v3  ;;  %v198_v38 = vld [vmem:[%s13367_s1 + $0x5c0] sm:$0xff] }
 0x247   :  { %3386 = vmatprep.mubr.f32.mxu1 %v9593_v3  ;;  %v8510_v2 = vpack.c.bf16 %v198_v38, %v186_v34  ;;  %v230_v38 = vld [vmem:[%s13367_s1 + $0x6c0] sm:$0xff] }
 0x249   :  { %7975 = vmatmul.mubr.msk.f32.gmra.mrb[94].mxu0 %vm334_vm0, %v10915_v51 }
 0x24a   :  { %7991 = vmatmul.mubr.msk.f32.gmra.mrb[94].mxu1 %vm334_vm0, %v10915_v51  ;;  %3713 = vmatprep.mubr.f32.mxu0 %v9593_v3  ;;  %v188_v51 = vld [vmem:[%s13367_s1 + $0x570] sm:$0xff] }
 0x24b   :  { %3874 = vmatprep.mubr.f32.mxu1 %v9593_v3  ;;  %v8518_v4 = vpack.c.bf16 %v200_v59, %v188_v51  ;;  %v242_v51 = vld [vmem:[%s13367_s1 + $0x720] sm:$0xff] }
 0x24d   :  { %7992 = vmatmul.mubr.msk.f32.vlgmr.msra.gmra.mrb[0].mxu0 %vm334_vm0, %v11232_v52 }
 0x24e   :  { %8008 = vmatmul.mubr.msk.f32.vlgmr.msra.gmra.mrb[0].mxu1 %vm334_vm0, %v11232_v52  ;;  %8507 = vmatpush1.bf16.msra.mxu0 %v8506_v53  ;;  %v243_v53 = vld [vmem:[%s13367_s1 + $0x728] sm:$0xff] }
 0x24f   :  { %8515 = vmatpush1.bf16.msra.mxu1 %v8514_v56  ;;  %3719 = vmatprep.mubr.f32.mxu0 %v9593_v3  ;;  %v245_v56 = vld [vmem:[%s13367_s1 + $0x738] sm:$0xff]  ;;  %v8540_v34 = vpack.c.bf16 %v243_v53, %v231_v50  ;;  %v228_v50 = vld [vmem:[%s13367_s1 + $0x6b0] sm:$0xff]  ;;  %v239_v53 = vld [vmem:[%s13367_s1 + $0x708] sm:$0xff] }
 0x250   :  { %3880 = vmatprep.mubr.f32.mxu1 %v9593_v3  ;;  %8509 = vmatprep.subr.bf16.mxu0 %v8508_v57  ;;  %v8546_v57 = vpack.c.bf16 %v220_v49, %v208_v48  ;;  %v8548_v59 = vpack.c.bf16 %v245_v56, %v233_v55  ;;  %v226_v48 = vld [vmem:[%s13367_s1 + $0x6a0] sm:$0xff]  ;;  %v216_v49 = vld [vmem:[%s13367_s1 + $0x650] sm:$0xff]  ;;  %v241_v56 = vld [vmem:[%s13367_s1 + $0x718] sm:$0xff] }
 0x251   :  { %7993 = vmatmul.mubr.msk.f32.gmra.mrb[2].mxu0 %vm334_vm0, %v11266_v63  ;;  %8517 = vmatprep.subr.bf16.mxu1 %v8516_v58  ;;  %v232_v58 = vld [vmem:[%s13367_s1 + $0x6d0] sm:$0xff]  ;;  %v8570_v55 = vpack.c.bf16 %v226_v48, %v214_v47 }
 0x252   :  { %8009 = vmatmul.mubr.msk.f32.gmra.mrb[2].mxu1 %vm334_vm0, %v11266_v63  ;;  %3725 = vmatprep.mubr.f32.mxu0 %v9593_v3  ;;  %v296_v48 = vld [vmem:[%s13367_s1 + $0x8d0] sm:$0xff] }
 0x253   :  { %3886 = vmatprep.mubr.f32.mxu1 %v9593_v3  ;;  %8511 = vmatpush1.bf16.msra.mxu0 %v8510_v2  ;;  %v225_v2 = vld [vmem:[%s13367_s1 + $0x698] sm:$0xff] }
 0x254   :  { %8519 = vmatpush1.bf16.msra.mxu1 %v8518_v4  ;;  %8521 = vmatprep.subr.bf16.mxu0 %v8520_v5  ;;  %v8542_v4 = vpack.c.bf16 %v242_v51, %v230_v38  ;;  %v8550_v5 = vpack.c.bf16 %v244_v60, %v232_v58  ;;  %v238_v51 = vld [vmem:[%s13367_s1 + $0x700] sm:$0xff] }
 0x255   :  { %7994 = vmatmul.mubr.msk.f32.gmra.mrb[4].mxu0 %vm334_vm0, %v11284_v7  ;;  %8529 = vmatprep.subr.bf16.mxu1 %v8528_v6  ;;  %v8552_v6 = vpack.c.bf16 %v223_v0, %v211_v61  ;;  %v250_v58 = vld [vmem:[%s13367_s1 + $0x760] sm:$0xff]  ;;  %v252_v61 = vld [vmem:[%s13367_s1 + $0x770] sm:$0xff]  ;;  %v255_v0 = vld [vmem:[%s13367_s1 + $0x788] sm:$0xff] }
 0x256   :  { %8010 = vmatmul.mubr.msk.f32.gmra.mrb[4].mxu1 %vm334_vm0, %v11284_v7  ;;  %3731 = vmatprep.mubr.f32.mxu0 %v9593_v3 }
 0x257   :  { %3892 = vmatprep.mubr.f32.mxu1 %v9593_v3 }
 0x259   :  { %7995 = vmatmul.mubr.msk.f32.gmra.mrb[6].mxu0 %vm334_vm0, %v11295_v8 }
 0x25a   :  { %8011 = vmatmul.mubr.msk.f32.gmra.mrb[6].mxu1 %vm334_vm0, %v11295_v8  ;;  %3737 = vmatprep.mubr.f32.mxu0 %v9593_v3 }
 0x25b   :  { %3898 = vmatprep.mubr.f32.mxu1 %v9593_v3 }
 0x25d   :  { %7996 = vmatmul.mubr.msk.f32.gmra.mrb[8].mxu0 %vm334_vm0, %v11306_v9 }
 0x25e   :  { %8012 = vmatmul.mubr.msk.f32.gmra.mrb[8].mxu1 %vm334_vm0, %v11306_v9  ;;  %3743 = vmatprep.mubr.f32.mxu0 %v9593_v3 }
 0x25f   :  { %3904 = vmatprep.mubr.f32.mxu1 %v9593_v3 }
 0x261   :  { %7997 = vmatmul.mubr.msk.f32.gmra.mrb[10].mxu0 %vm334_vm0, %v11317_v10 }
 0x262   :  { %8013 = vmatmul.mubr.msk.f32.gmra.mrb[10].mxu1 %vm334_vm0, %v11317_v10  ;;  %3749 = vmatprep.mubr.f32.mxu0 %v9593_v3 }
 0x263   :  { %3910 = vmatprep.mubr.f32.mxu1 %v9593_v3 }
 0x265   :  { %7998 = vmatmul.mubr.msk.f32.gmra.mrb[12].mxu0 %vm334_vm0, %v11328_v11 }
 0x266   :  { %8014 = vmatmul.mubr.msk.f32.gmra.mrb[12].mxu1 %vm334_vm0, %v11328_v11  ;;  %3755 = vmatprep.mubr.f32.mxu0 %v9593_v3 }
 0x267   :  { %3916 = vmatprep.mubr.f32.mxu1 %v9593_v3 }
 0x269   :  { %7999 = vmatmul.mubr.msk.f32.gmra.mrb[14].mxu0 %vm334_vm0, %v11339_v13 }
 0x26a   :  { %8015 = vmatmul.mubr.msk.f32.gmra.mrb[14].mxu1 %vm334_vm0, %v11339_v13  ;;  %3761 = vmatprep.mubr.f32.mxu0 %v9593_v3 }
 0x26b   :  { %3922 = vmatprep.mubr.f32.mxu1 %v9593_v3 }
 0x26d   :  { %8000 = vmatmul.mubr.msk.f32.gmra.mrb[16].mxu0 %vm334_vm0, %v11350_v14 }
 0x26e   :  { %8016 = vmatmul.mubr.msk.f32.gmra.mrb[16].mxu1 %vm334_vm0, %v11350_v14  ;;  %3767 = vmatprep.mubr.f32.mxu0 %v9593_v3 }
 0x26f   :  { %3928 = vmatprep.mubr.f32.mxu1 %v9593_v3 }
 0x271   :  { %8001 = vmatmul.mubr.msk.f32.gmra.mrb[18].mxu0 %vm334_vm0, %v11361_v15 }
 0x272   :  { %8017 = vmatmul.mubr.msk.f32.gmra.mrb[18].mxu1 %vm334_vm0, %v11361_v15  ;;  %3773 = vmatprep.mubr.f32.mxu0 %v9593_v3 }
 0x273   :  { %3934 = vmatprep.mubr.f32.mxu1 %v9593_v3 }
 0x275   :  { %8002 = vmatmul.mubr.msk.f32.gmra.mrb[20].mxu0 %vm334_vm0, %v11372_v16 }
 0x276   :  { %8018 = vmatmul.mubr.msk.f32.gmra.mrb[20].mxu1 %vm334_vm0, %v11372_v16  ;;  %3779 = vmatprep.mubr.f32.mxu0 %v9593_v3 }
 0x277   :  { %3940 = vmatprep.mubr.f32.mxu1 %v9593_v3 }
 0x279   :  { %8003 = vmatmul.mubr.msk.f32.gmra.mrb[22].mxu0 %vm334_vm0, %v11383_v17 }
 0x27a   :  { %8019 = vmatmul.mubr.msk.f32.gmra.mrb[22].mxu1 %vm334_vm0, %v11383_v17  ;;  %3785 = vmatprep.mubr.f32.mxu0 %v9593_v3 }
 0x27b   :  { %3946 = vmatprep.mubr.f32.mxu1 %v9593_v3 }
 0x27d   :  { %8004 = vmatmul.mubr.msk.f32.gmra.mrb[24].mxu0 %vm334_vm0, %v11394_v18 }
 0x27e   :  { %8020 = vmatmul.mubr.msk.f32.gmra.mrb[24].mxu1 %vm334_vm0, %v11394_v18  ;;  %3791 = vmatprep.mubr.f32.mxu0 %v9593_v3 }
 0x27f   :  { %3952 = vmatprep.mubr.f32.mxu1 %v9593_v3 }
 0x281   :  { %8005 = vmatmul.mubr.msk.f32.gmra.mrb[26].mxu0 %vm334_vm0, %v11405_v62 }
 0x282   :  { %8021 = vmatmul.mubr.msk.f32.gmra.mrb[26].mxu1 %vm334_vm0, %v11405_v62  ;;  %3797 = vmatprep.mubr.f32.mxu0 %v9593_v3 }
 0x283   :  { %3958 = vmatprep.mubr.f32.mxu1 %v9593_v3 }
 0x285   :  { %8006 = vmatmul.mubr.msk.f32.gmra.mrb[28].mxu0 %vm334_vm0, %v11416_v12 }
 0x286   :  { %8022 = vmatmul.mubr.msk.f32.gmra.mrb[28].mxu1 %vm334_vm0, %v11416_v12  ;;  %3803 = vmatprep.mubr.f32.mxu0 %v9593_v3 }
 0x287   :  { %3964 = vmatprep.mubr.f32.mxu1 %v9593_v3 }
 0x289   :  { %8007 = vmatmul.mubr.msk.f32.gmra.mrb[30].mxu0 %vm334_vm0, %v11427_v19 }
 0x28a   :  { %8023 = vmatmul.mubr.msk.f32.gmra.mrb[30].mxu1 %vm334_vm0, %v11427_v19  ;;  %4035 = vmatprep.mubr.f32.mxu0 %v9593_v3 }
 0x28b   :  { %4196 = vmatprep.mubr.f32.mxu1 %v9593_v3 }
 0x28d   :  { %8024 = vmatmul.mubr.msk.f32.vlgmr.msra.gmra.mrb[32].mxu0 %vm334_vm0, %v11232_v52 }
 0x28e   :  { %8040 = vmatmul.mubr.msk.f32.vlgmr.msra.gmra.mrb[32].mxu1 %vm334_vm0, %v11232_v52  ;;  %8523 = vmatpush1.bf16.msra.mxu0 %v8522_v27  ;;  %v229_v27 = vld [vmem:[%s13367_s1 + $0x6b8] sm:$0xff] }
 0x28f   :  { %8531 = vmatpush1.bf16.msra.mxu1 %v8530_v30  ;;  %4041 = vmatprep.mubr.f32.mxu0 %v9593_v3  ;;  %v8568_v30 = vpack.c.bf16 %v227_v23, %v215_v22  ;;  %v292_v22 = vld [vmem:[%s13367_s1 + $0x8b0] sm:$0xff]  ;;  %v259_v23 = vld [vmem:[%s13367_s1 + $0x7a8] sm:$0xff] }
 0x290   :  { %4202 = vmatprep.mubr.f32.mxu1 %v9593_v3  ;;  %8525 = vmatprep.subr.bf16.mxu0 %v8524_v31  ;;  %v8576_v31 = vpack.c.bf16 %v229_v27, %v217_v26  ;;  %v271_v26 = vld [vmem:[%s13367_s1 + $0x808] sm:$0xff]  ;;  %v261_v27 = vld [vmem:[%s13367_s1 + $0x7b8] sm:$0xff] }
 0x291   :  { %8025 = vmatmul.mubr.msk.f32.gmra.mrb[34].mxu0 %vm334_vm0, %v11266_v63  ;;  %8533 = vmatprep.subr.bf16.mxu1 %v8532_v36  ;;  %v11829_v36 = vld [vmem:[%s13368_s0 + $0x5a] sm:$0xff] }
 0x292   :  { %8041 = vmatmul.mubr.msk.f32.gmra.mrb[34].mxu1 %vm334_vm0, %v11266_v63  ;;  %4047 = vmatprep.mubr.f32.mxu0 %v9593_v3 }
 0x293   :  { %4208 = vmatprep.mubr.f32.mxu1 %v9593_v3  ;;  %8527 = vmatpush1.bf16.msra.mxu0 %v8526_v44  ;;  %v11895_v44 = vld [vmem:[%s13368_s0 + $0xd2] sm:$0xff] }
 0x294   :  { %8535 = vmatpush1.bf16.msra.mxu1 %v8534_v45  ;;  %8537 = vmatprep.subr.bf16.mxu0 %v8536_v24  ;;  %v11906_v45 = vld [vmem:[%s13368_s0 + $0xf2] sm:$0xff]  ;;  %v11917_v24 = vld [vmem:[%s13368_s0 + $0xfa] sm:$0xff] }
 0x295   :  { %8026 = vmatmul.mubr.msk.f32.gmra.mrb[36].mxu0 %vm334_vm0, %v11284_v7  ;;  %8545 = vmatprep.subr.bf16.mxu1 %v8544_v39  ;;  %v11928_v39 = vld [vmem:[%s13368_s0 + $0x11a] sm:$0xff] }
 0x296   :  { %8042 = vmatmul.mubr.msk.f32.gmra.mrb[36].mxu1 %vm334_vm0, %v11284_v7  ;;  %4053 = vmatprep.mubr.f32.mxu0 %v9593_v3 }
 0x297   :  { %4214 = vmatprep.mubr.f32.mxu1 %v9593_v3 }
 0x299   :  { %8027 = vmatmul.mubr.msk.f32.gmra.mrb[38].mxu0 %vm334_vm0, %v11295_v8 }
 0x29a   :  { %8043 = vmatmul.mubr.msk.f32.gmra.mrb[38].mxu1 %vm334_vm0, %v11295_v8  ;;  %4059 = vmatprep.mubr.f32.mxu0 %v9593_v3 }
 0x29b   :  { %4220 = vmatprep.mubr.f32.mxu1 %v9593_v3 }
 0x29d   :  { %8028 = vmatmul.mubr.msk.f32.gmra.mrb[40].mxu0 %vm334_vm0, %v11306_v9 }
 0x29e   :  { %8044 = vmatmul.mubr.msk.f32.gmra.mrb[40].mxu1 %vm334_vm0, %v11306_v9  ;;  %4065 = vmatprep.mubr.f32.mxu0 %v9593_v3 }
 0x29f   :  { %4226 = vmatprep.mubr.f32.mxu1 %v9593_v3 }
 0x2a1   :  { %8029 = vmatmul.mubr.msk.f32.gmra.mrb[42].mxu0 %vm334_vm0, %v11317_v10 }
 0x2a2   :  { %8045 = vmatmul.mubr.msk.f32.gmra.mrb[42].mxu1 %vm334_vm0, %v11317_v10  ;;  %4071 = vmatprep.mubr.f32.mxu0 %v9593_v3 }
 0x2a3   :  { %4232 = vmatprep.mubr.f32.mxu1 %v9593_v3 }
 0x2a5   :  { %8030 = vmatmul.mubr.msk.f32.gmra.mrb[44].mxu0 %vm334_vm0, %v11328_v11 }
 0x2a6   :  { %8046 = vmatmul.mubr.msk.f32.gmra.mrb[44].mxu1 %vm334_vm0, %v11328_v11  ;;  %4077 = vmatprep.mubr.f32.mxu0 %v9593_v3 }
 0x2a7   :  { %4238 = vmatprep.mubr.f32.mxu1 %v9593_v3 }
 0x2a9   :  { %8031 = vmatmul.mubr.msk.f32.gmra.mrb[46].mxu0 %vm334_vm0, %v11339_v13 }
 0x2aa   :  { %8047 = vmatmul.mubr.msk.f32.gmra.mrb[46].mxu1 %vm334_vm0, %v11339_v13  ;;  %4083 = vmatprep.mubr.f32.mxu0 %v9593_v3 }
 0x2ab   :  { %4244 = vmatprep.mubr.f32.mxu1 %v9593_v3 }
 0x2ad   :  { %8032 = vmatmul.mubr.msk.f32.gmra.mrb[48].mxu0 %vm334_vm0, %v11350_v14 }
 0x2ae   :  { %8048 = vmatmul.mubr.msk.f32.gmra.mrb[48].mxu1 %vm334_vm0, %v11350_v14  ;;  %4089 = vmatprep.mubr.f32.mxu0 %v9593_v3 }
 0x2af   :  { %4250 = vmatprep.mubr.f32.mxu1 %v9593_v3 }
 0x2b1   :  { %8033 = vmatmul.mubr.msk.f32.gmra.mrb[50].mxu0 %vm334_vm0, %v11361_v15 }
 0x2b2   :  { %8049 = vmatmul.mubr.msk.f32.gmra.mrb[50].mxu1 %vm334_vm0, %v11361_v15  ;;  %4095 = vmatprep.mubr.f32.mxu0 %v9593_v3 }
 0x2b3   :  { %4256 = vmatprep.mubr.f32.mxu1 %v9593_v3 }
 0x2b5   :  { %8034 = vmatmul.mubr.msk.f32.gmra.mrb[52].mxu0 %vm334_vm0, %v11372_v16 }
 0x2b6   :  { %8050 = vmatmul.mubr.msk.f32.gmra.mrb[52].mxu1 %vm334_vm0, %v11372_v16  ;;  %4101 = vmatprep.mubr.f32.mxu0 %v9593_v3 }
 0x2b7   :  { %4262 = vmatprep.mubr.f32.mxu1 %v9593_v3 }
 0x2b9   :  { %8035 = vmatmul.mubr.msk.f32.gmra.mrb[54].mxu0 %vm334_vm0, %v11383_v17 }
 0x2ba   :  { %8051 = vmatmul.mubr.msk.f32.gmra.mrb[54].mxu1 %vm334_vm0, %v11383_v17  ;;  %4107 = vmatprep.mubr.f32.mxu0 %v9593_v3 }
 0x2bb   :  { %4268 = vmatprep.mubr.f32.mxu1 %v9593_v3 }
 0x2bd   :  { %8036 = vmatmul.mubr.msk.f32.gmra.mrb[56].mxu0 %vm334_vm0, %v11394_v18 }
 0x2be   :  { %8052 = vmatmul.mubr.msk.f32.gmra.mrb[56].mxu1 %vm334_vm0, %v11394_v18  ;;  %4113 = vmatprep.mubr.f32.mxu0 %v9593_v3 }
 0x2bf   :  { %4274 = vmatprep.mubr.f32.mxu1 %v9593_v3 }
 0x2c1   :  { %8037 = vmatmul.mubr.msk.f32.gmra.mrb[58].mxu0 %vm334_vm0, %v11405_v62 }
 0x2c2   :  { %8053 = vmatmul.mubr.msk.f32.gmra.mrb[58].mxu1 %vm334_vm0, %v11405_v62  ;;  %4119 = vmatprep.mubr.f32.mxu0 %v9593_v3 }
 0x2c3   :  { %4280 = vmatprep.mubr.f32.mxu1 %v9593_v3 }
 0x2c5   :  { %8038 = vmatmul.mubr.msk.f32.gmra.mrb[60].mxu0 %vm334_vm0, %v11416_v12 }
 0x2c6   :  { %8054 = vmatmul.mubr.msk.f32.gmra.mrb[60].mxu1 %vm334_vm0, %v11416_v12  ;;  %4125 = vmatprep.mubr.f32.mxu0 %v9593_v3 }
 0x2c7   :  { %4286 = vmatprep.mubr.f32.mxu1 %v9593_v3 }
 0x2c9   :  { %8039 = vmatmul.mubr.msk.f32.gmra.mrb[62].mxu0 %vm334_vm0, %v11427_v19 }
 0x2ca   :  { %8055 = vmatmul.mubr.msk.f32.gmra.mrb[62].mxu1 %vm334_vm0, %v11427_v19  ;;  %4357 = vmatprep.mubr.f32.mxu0 %v9593_v3 }
 0x2cb   :  { %4518 = vmatprep.mubr.f32.mxu1 %v9593_v3 }
 0x2cd   :  { %8056 = vmatmul.mubr.msk.f32.vlgmr.msra.gmra.mrb[64].mxu0 %vm334_vm0, %v11232_v52 }
 0x2ce   :  { %8072 = vmatmul.mubr.msk.f32.vlgmr.msra.gmra.mrb[64].mxu1 %vm334_vm0, %v11232_v52  ;;  %8539 = vmatpush1.bf16.msra.mxu0 %v8538_v54  ;;  %v8560_v52 = vpack.c.bf16 %v225_v2, %v213_v1  ;;  %v251_v54 = vld [vmem:[%s13367_s1 + $0x768] sm:$0xff]  ;;  %v257_v2 = vld [vmem:[%s13367_s1 + $0x798] sm:$0xff] }
 0x2cf   :  { %8547 = vmatpush1.bf16.msra.mxu1 %v8546_v57  ;;  %4363 = vmatprep.mubr.f32.mxu0 %v9593_v3  ;;  %v253_v57 = vld [vmem:[%s13367_s1 + $0x778] sm:$0xff]  ;;  %v8572_v38 = vpack.c.bf16 %v251_v54, %v239_v53  ;;  %v267_v1 = vld [vmem:[%s13367_s1 + $0x7e8] sm:$0xff] }
 0x2d0   :  { %4524 = vmatprep.mubr.f32.mxu1 %v9593_v3  ;;  %8541 = vmatprep.subr.bf16.mxu0 %v8540_v34  ;;  %v8578_v34 = vpack.c.bf16 %v228_v50, %v216_v49  ;;  %v8580_v60 = vpack.c.bf16 %v253_v57, %v241_v56  ;;  %v263_v49 = vld [vmem:[%s13367_s1 + $0x7c8] sm:$0xff]  ;;  %v12290_v53 = vld [vmem:[%s13368_s0 + $0x1a] sm:$0xff] }
 0x2d1   :  { %8057 = vmatmul.mubr.msk.f32.gmra.mrb[66].mxu0 %vm334_vm0, %v11266_v63  ;;  %8549 = vmatprep.subr.bf16.mxu1 %v8548_v59  ;;  %v240_v59 = vld [vmem:[%s13367_s1 + $0x710] sm:$0xff]  ;;  %v275_v50 = vld [vmem:[%s13367_s1 + $0x828] sm:$0xff]  ;;  %v265_v54 = vld [vmem:[%s13367_s1 + $0x7d8] sm:$0xff] }
 0x2d2   :  { %8073 = vmatmul.mubr.msk.f32.gmra.mrb[66].mxu1 %vm334_vm0, %v11266_v63  ;;  %4369 = vmatprep.mubr.f32.mxu0 %v9593_v3  ;;  %v210_v63 = vld [vmem:[%s13367_s1 + $0x620] sm:$0xff] }
 0x2d3   :  { %4530 = vmatprep.mubr.f32.mxu1 %v9593_v3  ;;  %8543 = vmatpush1.bf16.msra.mxu0 %v8542_v4  ;;  %v269_v4 = vld [vmem:[%s13367_s1 + $0x7f8] sm:$0xff] }
 0x2d4   :  { %8551 = vmatpush1.bf16.msra.mxu1 %v8550_v5  ;;  %8553 = vmatprep.subr.bf16.mxu0 %v8552_v6  ;;  %v8574_v5 = vpack.c.bf16 %v250_v58, %v238_v51  ;;  %v8582_v6 = vpack.c.bf16 %v252_v61, %v240_v59  ;;  %v12308_v51 = vld [vmem:[%s13368_s0 + $0x3a] sm:$0xff]  ;;  %v12319_v58 = vld [vmem:[%s13368_s0 + $0x42] sm:$0xff]  ;;  %v12352_v61 = vld [vmem:[%s13368_s0 + $0x8a] sm:$0xff] }
 0x2d5   :  { %8058 = vmatmul.mubr.msk.f32.gmra.mrb[68].mxu0 %vm334_vm0, %v11284_v7  ;;  %8561 = vmatprep.subr.bf16.mxu1 %v8560_v52  ;;  %v8584_v52 = vpack.c.bf16 %v267_v1, %v255_v0  ;;  %v12330_v59 = vld [vmem:[%s13368_s0 + $0x62] sm:$0xff]  ;;  %v12363_v0 = vld [vmem:[%s13368_s0 + $0x92] sm:$0xff] }
 0x2d6   :  { %8074 = vmatmul.mubr.msk.f32.gmra.mrb[68].mxu1 %vm334_vm0, %v11284_v7  ;;  %4375 = vmatprep.mubr.f32.mxu0 %v9593_v3  ;;  %v222_v7 = vld [vmem:[%s13367_s1 + $0x680] sm:$0xff]  ;;  %v12374_v1 = vld [vmem:[%s13368_s0 + $0xb2] sm:$0xff] }
 0x2d7   :  { %4536 = vmatprep.mubr.f32.mxu1 %v9593_v3 }
 0x2d9   :  { %8059 = vmatmul.mubr.msk.f32.gmra.mrb[70].mxu0 %vm334_vm0, %v11295_v8 }
 0x2da   :  { %8075 = vmatmul.mubr.msk.f32.gmra.mrb[70].mxu1 %vm334_vm0, %v11295_v8  ;;  %4381 = vmatprep.mubr.f32.mxu0 %v9593_v3  ;;  %v212_v8 = vld [vmem:[%s13367_s1 + $0x630] sm:$0xff] }
 0x2db   :  { %4542 = vmatprep.mubr.f32.mxu1 %v9593_v3 }
 0x2dd   :  { %8060 = vmatmul.mubr.msk.f32.gmra.mrb[72].mxu0 %vm334_vm0, %v11306_v9 }
 0x2de   :  { %8076 = vmatmul.mubr.msk.f32.gmra.mrb[72].mxu1 %vm334_vm0, %v11306_v9  ;;  %4387 = vmatprep.mubr.f32.mxu0 %v9593_v3  ;;  %v224_v9 = vld [vmem:[%s13367_s1 + $0x690] sm:$0xff] }
 0x2df   :  { %4548 = vmatprep.mubr.f32.mxu1 %v9593_v3 }
 0x2e1   :  { %8061 = vmatmul.mubr.msk.f32.gmra.mrb[74].mxu0 %vm334_vm0, %v11317_v10 }
 0x2e2   :  { %8077 = vmatmul.mubr.msk.f32.gmra.mrb[74].mxu1 %vm334_vm0, %v11317_v10  ;;  %4393 = vmatprep.mubr.f32.mxu0 %v9593_v3  ;;  %v235_v10 = vld [vmem:[%s13367_s1 + $0x6e8] sm:$0xff] }
 0x2e3   :  { %4554 = vmatprep.mubr.f32.mxu1 %v9593_v3 }
 0x2e5   :  { %8062 = vmatmul.mubr.msk.f32.gmra.mrb[76].mxu0 %vm334_vm0, %v11328_v11 }
 0x2e6   :  { %8078 = vmatmul.mubr.msk.f32.gmra.mrb[76].mxu1 %vm334_vm0, %v11328_v11  ;;  %4399 = vmatprep.mubr.f32.mxu0 %v9593_v3  ;;  %v247_v11 = vld [vmem:[%s13367_s1 + $0x748] sm:$0xff] }
 0x2e7   :  { %4560 = vmatprep.mubr.f32.mxu1 %v9593_v3 }
 0x2e9   :  { %8063 = vmatmul.mubr.msk.f32.gmra.mrb[78].mxu0 %vm334_vm0, %v11339_v13 }
 0x2ea   :  { %8079 = vmatmul.mubr.msk.f32.gmra.mrb[78].mxu1 %vm334_vm0, %v11339_v13  ;;  %4405 = vmatprep.mubr.f32.mxu0 %v9593_v3  ;;  %v11744_v13 = vld [vmem:[%s13368_s0 + $0x2] sm:$0xff] }
 0x2eb   :  { %4566 = vmatprep.mubr.f32.mxu1 %v9593_v3 }
 0x2ed   :  { %8064 = vmatmul.mubr.msk.f32.gmra.mrb[80].mxu0 %vm334_vm0, %v11350_v14 }
 0x2ee   :  { %8080 = vmatmul.mubr.msk.f32.gmra.mrb[80].mxu1 %vm334_vm0, %v11350_v14  ;;  %4411 = vmatprep.mubr.f32.mxu0 %v9593_v3  ;;  %v8554_v14 = vpack.c.bf16 %v222_v7, %v210_v63  ;;  %v8592_v63 = vpack.c.bf16 %v269_v4, %v257_v2  ;;  %v254_v7 = vld [vmem:[%s13367_s1 + $0x780] sm:$0xff] }
 0x2ef   :  { %4572 = vmatprep.mubr.f32.mxu1 %v9593_v3  ;;  %v12385_v2 = vld [vmem:[%s13368_s0 + $0xba] sm:$0xff] }
 0x2f0   :  { %v12396_v4 = vld [vmem:[%s13368_s0 + $0xda] sm:$0xff] }
 0x2f1   :  { %8065 = vmatmul.mubr.msk.f32.gmra.mrb[82].mxu0 %vm334_vm0, %v11361_v15 }
 0x2f2   :  { %8081 = vmatmul.mubr.msk.f32.gmra.mrb[82].mxu1 %vm334_vm0, %v11361_v15  ;;  %4417 = vmatprep.mubr.f32.mxu0 %v9593_v3  ;;  %v237_v15 = vld [vmem:[%s13367_s1 + $0x6f8] sm:$0xff] }
 0x2f3   :  { %4578 = vmatprep.mubr.f32.mxu1 %v9593_v3 }
 0x2f5   :  { %8066 = vmatmul.mubr.msk.f32.gmra.mrb[84].mxu0 %vm334_vm0, %v11372_v16 }
 0x2f6   :  { %8082 = vmatmul.mubr.msk.f32.gmra.mrb[84].mxu1 %vm334_vm0, %v11372_v16  ;;  %4423 = vmatprep.mubr.f32.mxu0 %v9593_v3  ;;  %v249_v16 = vld [vmem:[%s13367_s1 + $0x758] sm:$0xff] }
 0x2f7   :  { %4584 = vmatprep.mubr.f32.mxu1 %v9593_v3  ;;  %v8564_v20 = vpack.c.bf16 %v249_v16, %v237_v15  ;;  %v281_v16 = vld [vmem:[%s13367_s1 + $0x858] sm:$0xff] }
 0x2f9   :  { %8067 = vmatmul.mubr.msk.f32.gmra.mrb[86].mxu0 %vm334_vm0, %v11383_v17 }
 0x2fa   :  { %8083 = vmatmul.mubr.msk.f32.gmra.mrb[86].mxu1 %vm334_vm0, %v11383_v17  ;;  %4429 = vmatprep.mubr.f32.mxu0 %v9593_v3  ;;  %v8562_v17 = vpack.c.bf16 %v224_v9, %v212_v8  ;;  %v266_v8 = vld [vmem:[%s13367_s1 + $0x7e0] sm:$0xff]  ;;  %v256_v9 = vld [vmem:[%s13367_s1 + $0x790] sm:$0xff] }
 0x2fb   :  { %4590 = vmatprep.mubr.f32.mxu1 %v9593_v3  ;;  %v8586_v15 = vpack.c.bf16 %v266_v8, %v254_v7  ;;  %v12451_v7 = vld [vmem:[%s13368_s0 + $0x132] sm:$0xff]  ;;  %v262_v8 = vld [vmem:[%s13367_s1 + $0x7c0] sm:$0xff] }
 0x2fd   :  { %8068 = vmatmul.mubr.msk.f32.gmra.mrb[88].mxu0 %vm334_vm0, %v11394_v18 }
 0x2fe   :  { %8084 = vmatmul.mubr.msk.f32.gmra.mrb[88].mxu1 %vm334_vm0, %v11394_v18  ;;  %4435 = vmatprep.mubr.f32.mxu0 %v9593_v3  ;;  %v8556_v18 = vpack.c.bf16 %v247_v11, %v235_v10  ;;  %v268_v10 = vld [vmem:[%s13367_s1 + $0x7f0] sm:$0xff]  ;;  %v279_v11 = vld [vmem:[%s13367_s1 + $0x848] sm:$0xff] }
 0x2ff   :  { %4596 = vmatprep.mubr.f32.mxu1 %v9593_v3 }
 0x301   :  { %8069 = vmatmul.mubr.msk.f32.gmra.mrb[90].mxu0 %vm334_vm0, %v11405_v62 }
 0x302   :  { %8085 = vmatmul.mubr.msk.f32.gmra.mrb[90].mxu1 %vm334_vm0, %v11405_v62  ;;  %4441 = vmatprep.mubr.f32.mxu0 %v9593_v3  ;;  %v234_v62 = vld [vmem:[%s13367_s1 + $0x6e0] sm:$0xff] }
 0x303   :  { %4602 = vmatprep.mubr.f32.mxu1 %v9593_v3 }
 0x305   :  { %8070 = vmatmul.mubr.msk.f32.gmra.mrb[92].mxu0 %vm334_vm0, %v11416_v12 }
 0x306   :  { %8086 = vmatmul.mubr.msk.f32.gmra.mrb[92].mxu1 %vm334_vm0, %v11416_v12  ;;  %4447 = vmatprep.mubr.f32.mxu0 %v9593_v3  ;;  %v246_v12 = vld [vmem:[%s13367_s1 + $0x740] sm:$0xff] }
 0x307   :  { %4608 = vmatprep.mubr.f32.mxu1 %v9593_v3  ;;  %v8558_v28 = vpack.c.bf16 %v246_v12, %v234_v62  ;;  %v278_v12 = vld [vmem:[%s13367_s1 + $0x840] sm:$0xff] }
 0x309   :  { %8071 = vmatmul.mubr.msk.f32.gmra.mrb[94].mxu0 %vm334_vm0, %v11427_v19 }
 0x30a   :  { %8087 = vmatmul.mubr.msk.f32.gmra.mrb[94].mxu1 %vm334_vm0, %v11427_v19  ;;  %4935 = vmatprep.mubr.f32.mxu0 %v9593_v3  ;;  %v236_v19 = vld [vmem:[%s13367_s1 + $0x6f0] sm:$0xff] }
 0x30b   :  { %5096 = vmatprep.mubr.f32.mxu1 %v9593_v3  ;;  %v8566_v29 = vpack.c.bf16 %v248_v21, %v236_v19  ;;  %v290_v19 = vld [vmem:[%s13367_s1 + $0x8a0] sm:$0xff] }
 0x30d   :  { %8088 = vmatmul.mubr.msk.f32.vlgmr.msra.gmra.mrb[0].mxu0 %vm334_vm0, %v11744_v13 }
 0x30e   :  { %8104 = vmatmul.mubr.msk.f32.vlgmr.msra.gmra.mrb[0].mxu1 %vm334_vm0, %v11744_v13  ;;  %8555 = vmatpush1.bf16.msra.mxu0 %v8554_v14  ;;  %v291_v14 = vld [vmem:[%s13367_s1 + $0x8a8] sm:$0xff] }
 0x30f   :  { %8563 = vmatpush1.bf16.msra.mxu1 %v8562_v17  ;;  %4941 = vmatprep.mubr.f32.mxu0 %v9593_v3  ;;  %v293_v17 = vld [vmem:[%s13367_s1 + $0x8b8] sm:$0xff]  ;;  %v8588_v62 = vpack.c.bf16 %v291_v14, %v279_v11  ;;  %v276_v11 = vld [vmem:[%s13367_s1 + $0x830] sm:$0xff]  ;;  %v287_v14 = vld [vmem:[%s13367_s1 + $0x888] sm:$0xff] }
 0x310   :  { %5102 = vmatprep.mubr.f32.mxu1 %v9593_v3  ;;  %8557 = vmatprep.subr.bf16.mxu0 %v8556_v18  ;;  %v8594_v18 = vpack.c.bf16 %v268_v10, %v256_v9  ;;  %v8596_v21 = vpack.c.bf16 %v293_v17, %v281_v16  ;;  %v274_v9 = vld [vmem:[%s13367_s1 + $0x820] sm:$0xff]  ;;  %v264_v10 = vld [vmem:[%s13367_s1 + $0x7d0] sm:$0xff]  ;;  %v289_v17 = vld [vmem:[%s13367_s1 + $0x898] sm:$0xff] }
 0x311   :  { %8089 = vmatmul.mubr.msk.f32.gmra.mrb[2].mxu0 %vm334_vm0, %v11778_v25  ;;  %8565 = vmatprep.subr.bf16.mxu1 %v8564_v20  ;;  %v280_v20 = vld [vmem:[%s13367_s1 + $0x850] sm:$0xff]  ;;  %v8618_v16 = vpack.c.bf16 %v274_v9, %v262_v8 }
 0x312   :  { %8105 = vmatmul.mubr.msk.f32.gmra.mrb[2].mxu1 %vm334_vm0, %v11778_v25  ;;  %4947 = vmatprep.mubr.f32.mxu0 %v9593_v3 }
 0x313   :  { %5108 = vmatprep.mubr.f32.mxu1 %v9593_v3  ;;  %8559 = vmatpush1.bf16.msra.mxu0 %v8558_v28  ;;  %v273_v28 = vld [vmem:[%s13367_s1 + $0x818] sm:$0xff] }
 0x314   :  { %8567 = vmatpush1.bf16.msra.mxu1 %v8566_v29  ;;  %8569 = vmatprep.subr.bf16.mxu0 %v8568_v30  ;;  %v8590_v29 = vpack.c.bf16 %v290_v19, %v278_v12  ;;  %v8598_v30 = vpack.c.bf16 %v292_v22, %v280_v20  ;;  %v286_v19 = vld [vmem:[%s13367_s1 + $0x880] sm:$0xff]  ;;  %v288_v22 = vld [vmem:[%s13367_s1 + $0x890] sm:$0xff] }
 0x315   :  { %8090 = vmatmul.mubr.msk.f32.gmra.mrb[4].mxu0 %vm334_vm0, %v11796_v32  ;;  %8577 = vmatprep.subr.bf16.mxu1 %v8576_v31  ;;  %v8600_v31 = vpack.c.bf16 %v271_v26, %v259_v23  ;;  %v298_v20 = vld [vmem:[%s13367_s1 + $0x8e0] sm:$0xff]  ;;  %v300_v23 = vld [vmem:[%s13367_s1 + $0x8f0] sm:$0xff] }
 0x316   :  { %8106 = vmatmul.mubr.msk.f32.gmra.mrb[4].mxu1 %vm334_vm0, %v11796_v32  ;;  %4953 = vmatprep.mubr.f32.mxu0 %v9593_v3  ;;  %v8622_v26 = vpack.c.bf16 %v298_v20, %v286_v19 }
 0x317   :  { %5114 = vmatprep.mubr.f32.mxu1 %v9593_v3 }
 0x319   :  { %8091 = vmatmul.mubr.msk.f32.gmra.mrb[6].mxu0 %vm334_vm0, %v11807_v33 }
 0x31a   :  { %8107 = vmatmul.mubr.msk.f32.gmra.mrb[6].mxu1 %vm334_vm0, %v11807_v33  ;;  %4959 = vmatprep.mubr.f32.mxu0 %v9593_v3 }
 0x31b   :  { %5120 = vmatprep.mubr.f32.mxu1 %v9593_v3 }
 0x31d   :  { %8092 = vmatmul.mubr.msk.f32.gmra.mrb[8].mxu0 %vm334_vm0, %v11818_v35 }
 0x31e   :  { %8108 = vmatmul.mubr.msk.f32.gmra.mrb[8].mxu1 %vm334_vm0, %v11818_v35  ;;  %4965 = vmatprep.mubr.f32.mxu0 %v9593_v3 }
 0x31f   :  { %5126 = vmatprep.mubr.f32.mxu1 %v9593_v3 }
 0x321   :  { %8093 = vmatmul.mubr.msk.f32.gmra.mrb[10].mxu0 %vm334_vm0, %v11829_v36 }
 0x322   :  { %8109 = vmatmul.mubr.msk.f32.gmra.mrb[10].mxu1 %vm334_vm0, %v11829_v36  ;;  %4971 = vmatprep.mubr.f32.mxu0 %v9593_v3 }
 0x323   :  { %5132 = vmatprep.mubr.f32.mxu1 %v9593_v3 }
 0x325   :  { %8094 = vmatmul.mubr.msk.f32.gmra.mrb[12].mxu0 %vm334_vm0, %v11840_v37 }
 0x326   :  { %8110 = vmatmul.mubr.msk.f32.gmra.mrb[12].mxu1 %vm334_vm0, %v11840_v37  ;;  %4977 = vmatprep.mubr.f32.mxu0 %v9593_v3 }
 0x327   :  { %5138 = vmatprep.mubr.f32.mxu1 %v9593_v3 }
 0x329   :  { %8095 = vmatmul.mubr.msk.f32.gmra.mrb[14].mxu0 %vm334_vm0, %v11851_v40 }
 0x32a   :  { %8111 = vmatmul.mubr.msk.f32.gmra.mrb[14].mxu1 %vm334_vm0, %v11851_v40  ;;  %4983 = vmatprep.mubr.f32.mxu0 %v9593_v3 }
 0x32b   :  { %5144 = vmatprep.mubr.f32.mxu1 %v9593_v3 }
 0x32d   :  { %8096 = vmatmul.mubr.msk.f32.gmra.mrb[16].mxu0 %vm334_vm0, %v11862_v41 }
 0x32e   :  { %8112 = vmatmul.mubr.msk.f32.gmra.mrb[16].mxu1 %vm334_vm0, %v11862_v41  ;;  %4989 = vmatprep.mubr.f32.mxu0 %v9593_v3 }
 0x32f   :  { %5150 = vmatprep.mubr.f32.mxu1 %v9593_v3 }
 0x331   :  { %8097 = vmatmul.mubr.msk.f32.gmra.mrb[18].mxu0 %vm334_vm0, %v11873_v42 }
 0x332   :  { %8113 = vmatmul.mubr.msk.f32.gmra.mrb[18].mxu1 %vm334_vm0, %v11873_v42  ;;  %4995 = vmatprep.mubr.f32.mxu0 %v9593_v3 }
 0x333   :  { %5156 = vmatprep.mubr.f32.mxu1 %v9593_v3 }
 0x335   :  { %8098 = vmatmul.mubr.msk.f32.gmra.mrb[20].mxu0 %vm334_vm0, %v11884_v43 }
 0x336   :  { %8114 = vmatmul.mubr.msk.f32.gmra.mrb[20].mxu1 %vm334_vm0, %v11884_v43  ;;  %5001 = vmatprep.mubr.f32.mxu0 %v9593_v3 }
 0x337   :  { %5162 = vmatprep.mubr.f32.mxu1 %v9593_v3 }
 0x339   :  { %8099 = vmatmul.mubr.msk.f32.gmra.mrb[22].mxu0 %vm334_vm0, %v11895_v44 }
 0x33a   :  { %8115 = vmatmul.mubr.msk.f32.gmra.mrb[22].mxu1 %vm334_vm0, %v11895_v44  ;;  %5007 = vmatprep.mubr.f32.mxu0 %v9593_v3 }
 0x33b   :  { %5168 = vmatprep.mubr.f32.mxu1 %v9593_v3 }
 0x33d   :  { %8100 = vmatmul.mubr.msk.f32.gmra.mrb[24].mxu0 %vm334_vm0, %v11906_v45 }
 0x33e   :  { %8116 = vmatmul.mubr.msk.f32.gmra.mrb[24].mxu1 %vm334_vm0, %v11906_v45  ;;  %5013 = vmatprep.mubr.f32.mxu0 %v9593_v3 }
 0x33f   :  { %5174 = vmatprep.mubr.f32.mxu1 %v9593_v3 }
 0x341   :  { %8101 = vmatmul.mubr.msk.f32.gmra.mrb[26].mxu0 %vm334_vm0, %v11917_v24 }
 0x342   :  { %8117 = vmatmul.mubr.msk.f32.gmra.mrb[26].mxu1 %vm334_vm0, %v11917_v24  ;;  %5019 = vmatprep.mubr.f32.mxu0 %v9593_v3 }
 0x343   :  { %5180 = vmatprep.mubr.f32.mxu1 %v9593_v3 }
 0x345   :  { %8102 = vmatmul.mubr.msk.f32.gmra.mrb[28].mxu0 %vm334_vm0, %v11928_v39 }
 0x346   :  { %8118 = vmatmul.mubr.msk.f32.gmra.mrb[28].mxu1 %vm334_vm0, %v11928_v39  ;;  %5025 = vmatprep.mubr.f32.mxu0 %v9593_v3 }
 0x347   :  { %5186 = vmatprep.mubr.f32.mxu1 %v9593_v3 }
 0x349   :  { %8103 = vmatmul.mubr.msk.f32.gmra.mrb[30].mxu0 %vm334_vm0, %v11939_v46 }
 0x34a   :  { %8119 = vmatmul.mubr.msk.f32.gmra.mrb[30].mxu1 %vm334_vm0, %v11939_v46  ;;  %5257 = vmatprep.mubr.f32.mxu0 %v9593_v3 }
 0x34b   :  { %5418 = vmatprep.mubr.f32.mxu1 %v9593_v3 }
 0x34d   :  { %8120 = vmatmul.mubr.msk.f32.vlgmr.msra.gmra.mrb[32].mxu0 %vm334_vm0, %v11744_v13 }
 0x34e   :  { %8136 = vmatmul.mubr.msk.f32.vlgmr.msra.gmra.mrb[32].mxu1 %vm334_vm0, %v11744_v13  ;;  %8571 = vmatpush1.bf16.msra.mxu0 %v8570_v55  ;;  %v277_v55 = vld [vmem:[%s13367_s1 + $0x838] sm:$0xff] }
 0x34f   :  { %8579 = vmatpush1.bf16.msra.mxu1 %v8578_v34  ;;  %5263 = vmatprep.mubr.f32.mxu0 %v9593_v3  ;;  %v8616_v34 = vpack.c.bf16 %v275_v50, %v263_v49 }
 0x350   :  { %5424 = vmatprep.mubr.f32.mxu1 %v9593_v3  ;;  %8573 = vmatprep.subr.bf16.mxu0 %v8572_v38  ;;  %v8624_v38 = vpack.c.bf16 %v277_v55, %v265_v54 }
 0x351   :  { %8121 = vmatmul.mubr.msk.f32.gmra.mrb[34].mxu0 %vm334_vm0, %v11778_v25  ;;  %8581 = vmatprep.subr.bf16.mxu1 %v8580_v60  ;;  %v12341_v60 = vld [vmem:[%s13368_s0 + $0x6a] sm:$0xff] }
 0x352   :  { %8137 = vmatmul.mubr.msk.f32.gmra.mrb[34].mxu1 %vm334_vm0, %v11778_v25  ;;  %5269 = vmatprep.mubr.f32.mxu0 %v9593_v3 }
 0x353   :  { %5430 = vmatprep.mubr.f32.mxu1 %v9593_v3  ;;  %8575 = vmatpush1.bf16.msra.mxu0 %v8574_v5  ;;  %v12407_v5 = vld [vmem:[%s13368_s0 + $0xe2] sm:$0xff] }
 0x354   :  { %8583 = vmatpush1.bf16.msra.mxu1 %v8582_v6  ;;  %8585 = vmatprep.subr.bf16.mxu0 %v8584_v52  ;;  %v12418_v6 = vld [vmem:[%s13368_s0 + $0x102] sm:$0xff]  ;;  %v12429_v52 = vld [vmem:[%s13368_s0 + $0x10a] sm:$0xff] }
 0x355   :  { %8122 = vmatmul.mubr.msk.f32.gmra.mrb[36].mxu0 %vm334_vm0, %v11796_v32  ;;  %8593 = vmatprep.subr.bf16.mxu1 %v8592_v63  ;;  %v12440_v63 = vld [vmem:[%s13368_s0 + $0x12a] sm:$0xff] }
 0x356   :  { %8138 = vmatmul.mubr.msk.f32.gmra.mrb[36].mxu1 %vm334_vm0, %v11796_v32  ;;  %5275 = vmatprep.mubr.f32.mxu0 %v9593_v3 }
 0x357   :  { %5436 = vmatprep.mubr.f32.mxu1 %v9593_v3 }
 0x359   :  { %8123 = vmatmul.mubr.msk.f32.gmra.mrb[38].mxu0 %vm334_vm0, %v11807_v33 }
 0x35a   :  { %8139 = vmatmul.mubr.msk.f32.gmra.mrb[38].mxu1 %vm334_vm0, %v11807_v33  ;;  %5281 = vmatprep.mubr.f32.mxu0 %v9593_v3 }
 0x35b   :  { %5442 = vmatprep.mubr.f32.mxu1 %v9593_v3 }
 0x35d   :  { %8124 = vmatmul.mubr.msk.f32.gmra.mrb[40].mxu0 %vm334_vm0, %v11818_v35 }
 0x35e   :  { %8140 = vmatmul.mubr.msk.f32.gmra.mrb[40].mxu1 %vm334_vm0, %v11818_v35  ;;  %5287 = vmatprep.mubr.f32.mxu0 %v9593_v3 }
 0x35f   :  { %5448 = vmatprep.mubr.f32.mxu1 %v9593_v3 }
 0x361   :  { %8125 = vmatmul.mubr.msk.f32.gmra.mrb[42].mxu0 %vm334_vm0, %v11829_v36 }
 0x362   :  { %8141 = vmatmul.mubr.msk.f32.gmra.mrb[42].mxu1 %vm334_vm0, %v11829_v36  ;;  %5293 = vmatprep.mubr.f32.mxu0 %v9593_v3 }
 0x363   :  { %5454 = vmatprep.mubr.f32.mxu1 %v9593_v3 }
 0x365   :  { %8126 = vmatmul.mubr.msk.f32.gmra.mrb[44].mxu0 %vm334_vm0, %v11840_v37 }
 0x366   :  { %8142 = vmatmul.mubr.msk.f32.gmra.mrb[44].mxu1 %vm334_vm0, %v11840_v37  ;;  %5299 = vmatprep.mubr.f32.mxu0 %v9593_v3 }
 0x367   :  { %5460 = vmatprep.mubr.f32.mxu1 %v9593_v3 }
 0x369   :  { %8127 = vmatmul.mubr.msk.f32.gmra.mrb[46].mxu0 %vm334_vm0, %v11851_v40 }
 0x36a   :  { %8143 = vmatmul.mubr.msk.f32.gmra.mrb[46].mxu1 %vm334_vm0, %v11851_v40  ;;  %5305 = vmatprep.mubr.f32.mxu0 %v9593_v3 }
 0x36b   :  { %5466 = vmatprep.mubr.f32.mxu1 %v9593_v3 }
 0x36d   :  { %8128 = vmatmul.mubr.msk.f32.gmra.mrb[48].mxu0 %vm334_vm0, %v11862_v41 }
 0x36e   :  { %8144 = vmatmul.mubr.msk.f32.gmra.mrb[48].mxu1 %vm334_vm0, %v11862_v41  ;;  %5311 = vmatprep.mubr.f32.mxu0 %v9593_v3 }
 0x36f   :  { %5472 = vmatprep.mubr.f32.mxu1 %v9593_v3 }
 0x371   :  { %8129 = vmatmul.mubr.msk.f32.gmra.mrb[50].mxu0 %vm334_vm0, %v11873_v42 }
 0x372   :  { %8145 = vmatmul.mubr.msk.f32.gmra.mrb[50].mxu1 %vm334_vm0, %v11873_v42  ;;  %5317 = vmatprep.mubr.f32.mxu0 %v9593_v3 }
 0x373   :  { %5478 = vmatprep.mubr.f32.mxu1 %v9593_v3 }
 0x375   :  { %8130 = vmatmul.mubr.msk.f32.gmra.mrb[52].mxu0 %vm334_vm0, %v11884_v43 }
 0x376   :  { %8146 = vmatmul.mubr.msk.f32.gmra.mrb[52].mxu1 %vm334_vm0, %v11884_v43  ;;  %5323 = vmatprep.mubr.f32.mxu0 %v9593_v3 }
 0x377   :  { %5484 = vmatprep.mubr.f32.mxu1 %v9593_v3 }
 0x379   :  { %8131 = vmatmul.mubr.msk.f32.gmra.mrb[54].mxu0 %vm334_vm0, %v11895_v44 }
 0x37a   :  { %8147 = vmatmul.mubr.msk.f32.gmra.mrb[54].mxu1 %vm334_vm0, %v11895_v44  ;;  %5329 = vmatprep.mubr.f32.mxu0 %v9593_v3 }
 0x37b   :  { %5490 = vmatprep.mubr.f32.mxu1 %v9593_v3 }
 0x37d   :  { %8132 = vmatmul.mubr.msk.f32.gmra.mrb[56].mxu0 %vm334_vm0, %v11906_v45 }
 0x37e   :  { %8148 = vmatmul.mubr.msk.f32.gmra.mrb[56].mxu1 %vm334_vm0, %v11906_v45  ;;  %5335 = vmatprep.mubr.f32.mxu0 %v9593_v3 }
 0x37f   :  { %5496 = vmatprep.mubr.f32.mxu1 %v9593_v3 }
 0x381   :  { %8133 = vmatmul.mubr.msk.f32.gmra.mrb[58].mxu0 %vm334_vm0, %v11917_v24 }
 0x382   :  { %8149 = vmatmul.mubr.msk.f32.gmra.mrb[58].mxu1 %vm334_vm0, %v11917_v24  ;;  %5341 = vmatprep.mubr.f32.mxu0 %v9593_v3 }
 0x383   :  { %5502 = vmatprep.mubr.f32.mxu1 %v9593_v3 }
 0x385   :  { %8134 = vmatmul.mubr.msk.f32.gmra.mrb[60].mxu0 %vm334_vm0, %v11928_v39 }
 0x386   :  { %8150 = vmatmul.mubr.msk.f32.gmra.mrb[60].mxu1 %vm334_vm0, %v11928_v39  ;;  %5347 = vmatprep.mubr.f32.mxu0 %v9593_v3 }
 0x387   :  { %5508 = vmatprep.mubr.f32.mxu1 %v9593_v3 }
 0x389   :  { %8135 = vmatmul.mubr.msk.f32.gmra.mrb[62].mxu0 %vm334_vm0, %v11939_v46 }
 0x38a   :  { %8151 = vmatmul.mubr.msk.f32.gmra.mrb[62].mxu1 %vm334_vm0, %v11939_v46  ;;  %5579 = vmatprep.mubr.f32.mxu0 %v9593_v3 }
 0x38b   :  { %5740 = vmatprep.mubr.f32.mxu1 %v9593_v3 }
 0x38d   :  { %8152 = vmatmul.mubr.msk.f32.vlgmr.msra.gmra.mrb[64].mxu0 %vm334_vm0, %v11744_v13 }
 0x38e   :  { %8168 = vmatmul.mubr.msk.f32.vlgmr.msra.gmra.mrb[64].mxu1 %vm334_vm0, %v11744_v13  ;;  %8587 = vmatpush1.bf16.msra.mxu0 %v8586_v15  ;;  %v8608_v13 = vpack.c.bf16 %v273_v28, %v261_v27  ;;  %v299_v15 = vld [vmem:[%s13367_s1 + $0x8e8] sm:$0xff]  ;;  %v8630_v27 = vpack.c.bf16 %v300_v23, %v288_v22 }
 0x38f   :  { %8595 = vmatpush1.bf16.msra.mxu1 %v8594_v18  ;;  %5585 = vmatprep.mubr.f32.mxu0 %v9593_v3  ;;  %v301_v18 = vld [vmem:[%s13367_s1 + $0x8f8] sm:$0xff]  ;;  %v8620_v12 = vpack.c.bf16 %v299_v15, %v287_v14 }
 0x390   :  { %5746 = vmatprep.mubr.f32.mxu1 %v9593_v3  ;;  %8589 = vmatprep.subr.bf16.mxu0 %v8588_v62  ;;  %v8626_v62 = vpack.c.bf16 %v276_v11, %v264_v10 }
 0x391   :  { %8153 = vmatmul.mubr.msk.f32.gmra.mrb[66].mxu0 %vm334_vm0, %v11778_v25  ;;  %8597 = vmatprep.subr.bf16.mxu1 %v8596_v21  ;;  %v8628_v21 = vpack.c.bf16 %v301_v18, %v289_v17 }
 0x392   :  { %8169 = vmatmul.mubr.msk.f32.gmra.mrb[66].mxu1 %vm334_vm0, %v11778_v25  ;;  %5591 = vmatprep.mubr.f32.mxu0 %v9593_v3  ;;  %v258_v25 = vld [vmem:[%s13367_s1 + $0x7a0] sm:$0xff] }
 0x393   :  { %5752 = vmatprep.mubr.f32.mxu1 %v9593_v3  ;;  %8591 = vmatpush1.bf16.msra.mxu0 %v8590_v29 }
 0x394   :  { %8599 = vmatpush1.bf16.msra.mxu1 %v8598_v30  ;;  %8601 = vmatprep.subr.bf16.mxu0 %v8600_v31 }
 0x395   :  { %8154 = vmatmul.mubr.msk.f32.gmra.mrb[68].mxu0 %vm334_vm0, %v11796_v32  ;;  %8609 = vmatprep.subr.bf16.mxu1 %v8608_v13 }
 0x396   :  { %8170 = vmatmul.mubr.msk.f32.gmra.mrb[68].mxu1 %vm334_vm0, %v11796_v32  ;;  %5597 = vmatprep.mubr.f32.mxu0 %v9593_v3  ;;  %v270_v32 = vld [vmem:[%s13367_s1 + $0x800] sm:$0xff] }
 0x397   :  { %5758 = vmatprep.mubr.f32.mxu1 %v9593_v3 }
 0x399   :  { %8155 = vmatmul.mubr.msk.f32.gmra.mrb[70].mxu0 %vm334_vm0, %v11807_v33 }
 0x39a   :  { %8171 = vmatmul.mubr.msk.f32.gmra.mrb[70].mxu1 %vm334_vm0, %v11807_v33  ;;  %5603 = vmatprep.mubr.f32.mxu0 %v9593_v3  ;;  %v260_v33 = vld [vmem:[%s13367_s1 + $0x7b0] sm:$0xff] }
 0x39b   :  { %5764 = vmatprep.mubr.f32.mxu1 %v9593_v3 }
 0x39d   :  { %8156 = vmatmul.mubr.msk.f32.gmra.mrb[72].mxu0 %vm334_vm0, %v11818_v35 }
 0x39e   :  { %8172 = vmatmul.mubr.msk.f32.gmra.mrb[72].mxu1 %vm334_vm0, %v11818_v35  ;;  %5609 = vmatprep.mubr.f32.mxu0 %v9593_v3  ;;  %v272_v35 = vld [vmem:[%s13367_s1 + $0x810] sm:$0xff] }
 0x39f   :  { %5770 = vmatprep.mubr.f32.mxu1 %v9593_v3 }
 0x3a1   :  { %8157 = vmatmul.mubr.msk.f32.gmra.mrb[74].mxu0 %vm334_vm0, %v11829_v36 }
 0x3a2   :  { %8173 = vmatmul.mubr.msk.f32.gmra.mrb[74].mxu1 %vm334_vm0, %v11829_v36  ;;  %5615 = vmatprep.mubr.f32.mxu0 %v9593_v3  ;;  %v283_v36 = vld [vmem:[%s13367_s1 + $0x868] sm:$0xff] }
 0x3a3   :  { %5776 = vmatprep.mubr.f32.mxu1 %v9593_v3 }
 0x3a5   :  { %8158 = vmatmul.mubr.msk.f32.gmra.mrb[76].mxu0 %vm334_vm0, %v11840_v37 }
 0x3a6   :  { %8174 = vmatmul.mubr.msk.f32.gmra.mrb[76].mxu1 %vm334_vm0, %v11840_v37  ;;  %5621 = vmatprep.mubr.f32.mxu0 %v9593_v3  ;;  %v295_v37 = vld [vmem:[%s13367_s1 + $0x8c8] sm:$0xff] }
 0x3a7   :  { %5782 = vmatprep.mubr.f32.mxu1 %v9593_v3 }
 0x3a9   :  { %8159 = vmatmul.mubr.msk.f32.gmra.mrb[78].mxu0 %vm334_vm0, %v11851_v40 }
 0x3aa   :  { %8175 = vmatmul.mubr.msk.f32.gmra.mrb[78].mxu1 %vm334_vm0, %v11851_v40  ;;  %5627 = vmatprep.mubr.f32.mxu0 %v9593_v3  ;;  %v12256_v40 = vld [vmem:[%s13368_s0 + $0x12] sm:$0xff] }
 0x3ab   :  { %5788 = vmatprep.mubr.f32.mxu1 %v9593_v3 }
 0x3ad   :  { %8160 = vmatmul.mubr.msk.f32.gmra.mrb[80].mxu0 %vm334_vm0, %v11862_v41 }
 0x3ae   :  { %8176 = vmatmul.mubr.msk.f32.gmra.mrb[80].mxu1 %vm334_vm0, %v11862_v41  ;;  %5633 = vmatprep.mubr.f32.mxu0 %v9593_v3  ;;  %v8602_v41 = vpack.c.bf16 %v270_v32, %v258_v25 }
 0x3af   :  { %5794 = vmatprep.mubr.f32.mxu1 %v9593_v3 }
 0x3b1   :  { %8161 = vmatmul.mubr.msk.f32.gmra.mrb[82].mxu0 %vm334_vm0, %v11873_v42 }
 0x3b2   :  { %8177 = vmatmul.mubr.msk.f32.gmra.mrb[82].mxu1 %vm334_vm0, %v11873_v42  ;;  %5639 = vmatprep.mubr.f32.mxu0 %v9593_v3  ;;  %v285_v42 = vld [vmem:[%s13367_s1 + $0x878] sm:$0xff] }
 0x3b3   :  { %5800 = vmatprep.mubr.f32.mxu1 %v9593_v3 }
 0x3b5   :  { %8162 = vmatmul.mubr.msk.f32.gmra.mrb[84].mxu0 %vm334_vm0, %v11884_v43 }
 0x3b6   :  { %8178 = vmatmul.mubr.msk.f32.gmra.mrb[84].mxu1 %vm334_vm0, %v11884_v43  ;;  %5645 = vmatprep.mubr.f32.mxu0 %v9593_v3  ;;  %v297_v43 = vld [vmem:[%s13367_s1 + $0x8d8] sm:$0xff] }
 0x3b7   :  { %5806 = vmatprep.mubr.f32.mxu1 %v9593_v3  ;;  %v8612_v47 = vpack.c.bf16 %v297_v43, %v285_v42 }
 0x3b9   :  { %8163 = vmatmul.mubr.msk.f32.gmra.mrb[86].mxu0 %vm334_vm0, %v11895_v44 }
 0x3ba   :  { %8179 = vmatmul.mubr.msk.f32.gmra.mrb[86].mxu1 %vm334_vm0, %v11895_v44  ;;  %5651 = vmatprep.mubr.f32.mxu0 %v9593_v3  ;;  %v8610_v44 = vpack.c.bf16 %v272_v35, %v260_v33 }
 0x3bb   :  { %5812 = vmatprep.mubr.f32.mxu1 %v9593_v3 }
 0x3bd   :  { %8164 = vmatmul.mubr.msk.f32.gmra.mrb[88].mxu0 %vm334_vm0, %v11906_v45 }
 0x3be   :  { %8180 = vmatmul.mubr.msk.f32.gmra.mrb[88].mxu1 %vm334_vm0, %v11906_v45  ;;  %5657 = vmatprep.mubr.f32.mxu0 %v9593_v3  ;;  %v8604_v45 = vpack.c.bf16 %v295_v37, %v283_v36 }
 0x3bf   :  { %5818 = vmatprep.mubr.f32.mxu1 %v9593_v3 }
 0x3c1   :  { %8165 = vmatmul.mubr.msk.f32.gmra.mrb[90].mxu0 %vm334_vm0, %v11917_v24 }
 0x3c2   :  { %8181 = vmatmul.mubr.msk.f32.gmra.mrb[90].mxu1 %vm334_vm0, %v11917_v24  ;;  %5663 = vmatprep.mubr.f32.mxu0 %v9593_v3  ;;  %v282_v24 = vld [vmem:[%s13367_s1 + $0x860] sm:$0xff] }
 0x3c3   :  { %5824 = vmatprep.mubr.f32.mxu1 %v9593_v3 }
 0x3c5   :  { %8166 = vmatmul.mubr.msk.f32.gmra.mrb[92].mxu0 %vm334_vm0, %v11928_v39 }
 0x3c6   :  { %8182 = vmatmul.mubr.msk.f32.gmra.mrb[92].mxu1 %vm334_vm0, %v11928_v39  ;;  %5669 = vmatprep.mubr.f32.mxu0 %v9593_v3  ;;  %v294_v39 = vld [vmem:[%s13367_s1 + $0x8c0] sm:$0xff] }
 0x3c7   :  { %5830 = vmatprep.mubr.f32.mxu1 %v9593_v3  ;;  %v8606_v56 = vpack.c.bf16 %v294_v39, %v282_v24 }
 0x3c9   :  { %8167 = vmatmul.mubr.msk.f32.gmra.mrb[94].mxu0 %vm334_vm0, %v11939_v46 }
 0x3ca   :  { %8183 = vmatmul.mubr.msk.f32.gmra.mrb[94].mxu1 %vm334_vm0, %v11939_v46  ;;  %6157 = vmatprep.mubr.f32.mxu0 %v9593_v3  ;;  %v284_v46 = vld [vmem:[%s13367_s1 + $0x870] sm:$0xff] }
 0x3cb   :  { %6318 = vmatprep.mubr.f32.mxu1 %v9593_v3  ;;  %v8614_v57 = vpack.c.bf16 %v296_v48, %v284_v46 }
 0x3cd   :  { %8184 = vmatmul.mubr.msk.f32.vlgmr.msra.gmra.mrb[0].mxu0 %vm334_vm0, %v12256_v40 }
 0x3ce   :  { %8200 = vmatmul.mubr.msk.f32.vlgmr.msra.gmra.mrb[0].mxu1 %vm334_vm0, %v12256_v40  ;;  %8603 = vmatpush1.bf16.msra.mxu0 %v8602_v41 }
 0x3cf   :  { %8611 = vmatpush1.bf16.msra.mxu1 %v8610_v44  ;;  %6163 = vmatprep.mubr.f32.mxu0 %v9593_v3 }
 0x3d0   :  { %6324 = vmatprep.mubr.f32.mxu1 %v9593_v3  ;;  %8605 = vmatprep.subr.bf16.mxu0 %v8604_v45 }
 0x3d1   :  { %8185 = vmatmul.mubr.msk.f32.gmra.mrb[2].mxu0 %vm334_vm0, %v12290_v53  ;;  %8613 = vmatprep.subr.bf16.mxu1 %v8612_v47 }
 0x3d2   :  { %8201 = vmatmul.mubr.msk.f32.gmra.mrb[2].mxu1 %vm334_vm0, %v12290_v53  ;;  %6169 = vmatprep.mubr.f32.mxu0 %v9593_v3 }
 0x3d3   :  { %6330 = vmatprep.mubr.f32.mxu1 %v9593_v3  ;;  %8607 = vmatpush1.bf16.msra.mxu0 %v8606_v56 }
 0x3d4   :  { %8615 = vmatpush1.bf16.msra.mxu1 %v8614_v57  ;;  %8617 = vmatprep.subr.bf16.mxu0 %v8616_v34 }
 0x3d5   :  { %8186 = vmatmul.mubr.msk.f32.gmra.mrb[4].mxu0 %vm334_vm0, %v12308_v51  ;;  %8625 = vmatprep.subr.bf16.mxu1 %v8624_v38 }
 0x3d6   :  { %8202 = vmatmul.mubr.msk.f32.gmra.mrb[4].mxu1 %vm334_vm0, %v12308_v51  ;;  %6175 = vmatprep.mubr.f32.mxu0 %v9593_v3 }
 0x3d7   :  { %6336 = vmatprep.mubr.f32.mxu1 %v9593_v3 }
 0x3d9   :  { %8187 = vmatmul.mubr.msk.f32.gmra.mrb[6].mxu0 %vm334_vm0, %v12319_v58 }
 0x3da   :  { %8203 = vmatmul.mubr.msk.f32.gmra.mrb[6].mxu1 %vm334_vm0, %v12319_v58  ;;  %6181 = vmatprep.mubr.f32.mxu0 %v9593_v3 }
 0x3db   :  { %6342 = vmatprep.mubr.f32.mxu1 %v9593_v3 }
 0x3dd   :  { %8188 = vmatmul.mubr.msk.f32.gmra.mrb[8].mxu0 %vm334_vm0, %v12330_v59 }
 0x3de   :  { %8204 = vmatmul.mubr.msk.f32.gmra.mrb[8].mxu1 %vm334_vm0, %v12330_v59  ;;  %6187 = vmatprep.mubr.f32.mxu0 %v9593_v3 }
 0x3df   :  { %6348 = vmatprep.mubr.f32.mxu1 %v9593_v3 }
 0x3e1   :  { %8189 = vmatmul.mubr.msk.f32.gmra.mrb[10].mxu0 %vm334_vm0, %v12341_v60 }
 0x3e2   :  { %8205 = vmatmul.mubr.msk.f32.gmra.mrb[10].mxu1 %vm334_vm0, %v12341_v60  ;;  %6193 = vmatprep.mubr.f32.mxu0 %v9593_v3 }
 0x3e3   :  { %6354 = vmatprep.mubr.f32.mxu1 %v9593_v3 }
 0x3e5   :  { %8190 = vmatmul.mubr.msk.f32.gmra.mrb[12].mxu0 %vm334_vm0, %v12352_v61 }
 0x3e6   :  { %8206 = vmatmul.mubr.msk.f32.gmra.mrb[12].mxu1 %vm334_vm0, %v12352_v61  ;;  %6199 = vmatprep.mubr.f32.mxu0 %v9593_v3 }
 0x3e7   :  { %6360 = vmatprep.mubr.f32.mxu1 %v9593_v3 }
 0x3e9   :  { %8191 = vmatmul.mubr.msk.f32.gmra.mrb[14].mxu0 %vm334_vm0, %v12363_v0 }
 0x3ea   :  { %8207 = vmatmul.mubr.msk.f32.gmra.mrb[14].mxu1 %vm334_vm0, %v12363_v0  ;;  %6205 = vmatprep.mubr.f32.mxu0 %v9593_v3 }
 0x3eb   :  { %6366 = vmatprep.mubr.f32.mxu1 %v9593_v3 }
 0x3ed   :  { %8192 = vmatmul.mubr.msk.f32.gmra.mrb[16].mxu0 %vm334_vm0, %v12374_v1 }
 0x3ee   :  { %8208 = vmatmul.mubr.msk.f32.gmra.mrb[16].mxu1 %vm334_vm0, %v12374_v1  ;;  %6211 = vmatprep.mubr.f32.mxu0 %v9593_v3 }
 0x3ef   :  { %6372 = vmatprep.mubr.f32.mxu1 %v9593_v3 }
 0x3f1   :  { %8193 = vmatmul.mubr.msk.f32.gmra.mrb[18].mxu0 %vm334_vm0, %v12385_v2 }
 0x3f2   :  { %8209 = vmatmul.mubr.msk.f32.gmra.mrb[18].mxu1 %vm334_vm0, %v12385_v2  ;;  %6217 = vmatprep.mubr.f32.mxu0 %v9593_v3 }
 0x3f3   :  { %6378 = vmatprep.mubr.f32.mxu1 %v9593_v3 }
 0x3f5   :  { %8194 = vmatmul.mubr.msk.f32.gmra.mrb[20].mxu0 %vm334_vm0, %v12396_v4 }
 0x3f6   :  { %8210 = vmatmul.mubr.msk.f32.gmra.mrb[20].mxu1 %vm334_vm0, %v12396_v4  ;;  %6223 = vmatprep.mubr.f32.mxu0 %v9593_v3 }
 0x3f7   :  { %6384 = vmatprep.mubr.f32.mxu1 %v9593_v3 }
 0x3f9   :  { %8195 = vmatmul.mubr.msk.f32.gmra.mrb[22].mxu0 %vm334_vm0, %v12407_v5 }
 0x3fa   :  { %8211 = vmatmul.mubr.msk.f32.gmra.mrb[22].mxu1 %vm334_vm0, %v12407_v5  ;;  %6229 = vmatprep.mubr.f32.mxu0 %v9593_v3 }
 0x3fb   :  { %6390 = vmatprep.mubr.f32.mxu1 %v9593_v3 }
 0x3fd   :  { %8196 = vmatmul.mubr.msk.f32.gmra.mrb[24].mxu0 %vm334_vm0, %v12418_v6 }
 0x3fe   :  { %8212 = vmatmul.mubr.msk.f32.gmra.mrb[24].mxu1 %vm334_vm0, %v12418_v6  ;;  %6235 = vmatprep.mubr.f32.mxu0 %v9593_v3 }
 0x3ff   :  { %6396 = vmatprep.mubr.f32.mxu1 %v9593_v3 }
 0x401   :  { %8197 = vmatmul.mubr.msk.f32.gmra.mrb[26].mxu0 %vm334_vm0, %v12429_v52 }
 0x402   :  { %8213 = vmatmul.mubr.msk.f32.gmra.mrb[26].mxu1 %vm334_vm0, %v12429_v52  ;;  %6241 = vmatprep.mubr.f32.mxu0 %v9593_v3 }
 0x403   :  { %6402 = vmatprep.mubr.f32.mxu1 %v9593_v3 }
 0x405   :  { %8198 = vmatmul.mubr.msk.f32.gmra.mrb[28].mxu0 %vm334_vm0, %v12440_v63 }
 0x406   :  { %8214 = vmatmul.mubr.msk.f32.gmra.mrb[28].mxu1 %vm334_vm0, %v12440_v63  ;;  %6247 = vmatprep.mubr.f32.mxu0 %v9593_v3 }
 0x407   :  { %6408 = vmatprep.mubr.f32.mxu1 %v9593_v3 }
 0x409   :  { %8199 = vmatmul.mubr.msk.f32.gmra.mrb[30].mxu0 %vm334_vm0, %v12451_v7 }
 0x40a   :  { %8215 = vmatmul.mubr.msk.f32.gmra.mrb[30].mxu1 %vm334_vm0, %v12451_v7  ;;  %6479 = vmatprep.mubr.f32.mxu0 %v9593_v3 }
 0x40b   :  { %6640 = vmatprep.mubr.f32.mxu1 %v9593_v3 }
 0x40d   :  { %8216 = vmatmul.mubr.msk.f32.vlgmr.msra.gmra.mrb[32].mxu0 %vm334_vm0, %v12256_v40 }
 0x40e   :  { %8232 = vmatmul.mubr.msk.f32.vlgmr.msra.gmra.mrb[32].mxu1 %vm334_vm0, %v12256_v40  ;;  %8619 = vmatpush1.bf16.msra.mxu0 %v8618_v16 }
 0x40f   :  { %8627 = vmatpush1.bf16.msra.mxu1 %v8626_v62  ;;  %6485 = vmatprep.mubr.f32.mxu0 %v9593_v3 }
 0x410   :  { %6646 = vmatprep.mubr.f32.mxu1 %v9593_v3  ;;  %8621 = vmatprep.subr.bf16.mxu0 %v8620_v12 }
 0x411   :  { %8217 = vmatmul.mubr.msk.f32.gmra.mrb[34].mxu0 %vm334_vm0, %v12290_v53  ;;  %8629 = vmatprep.subr.bf16.mxu1 %v8628_v21 }
 0x412   :  { %8233 = vmatmul.mubr.msk.f32.gmra.mrb[34].mxu1 %vm334_vm0, %v12290_v53  ;;  %6491 = vmatprep.mubr.f32.mxu0 %v9593_v3 }
 0x413   :  { %6652 = vmatprep.mubr.f32.mxu1 %v9593_v3  ;;  %8623 = vmatpush1.bf16.msra.mxu0 %v8622_v26 }
 0x414   :  { %8631 = vmatpush1.bf16.msra.mxu1 %v8630_v27 }
 0x415   :  { %8218 = vmatmul.mubr.msk.f32.gmra.mrb[36].mxu0 %vm334_vm0, %v12308_v51 }
 0x416   :  { %8234 = vmatmul.mubr.msk.f32.gmra.mrb[36].mxu1 %vm334_vm0, %v12308_v51  ;;  %6497 = vmatprep.mubr.f32.mxu0 %v9593_v3 }
 0x417   :  { %6658 = vmatprep.mubr.f32.mxu1 %v9593_v3 }
 0x419   :  { %8219 = vmatmul.mubr.msk.f32.gmra.mrb[38].mxu0 %vm334_vm0, %v12319_v58 }
 0x41a   :  { %8235 = vmatmul.mubr.msk.f32.gmra.mrb[38].mxu1 %vm334_vm0, %v12319_v58  ;;  %6503 = vmatprep.mubr.f32.mxu0 %v9593_v3 }
 0x41b   :  { %6664 = vmatprep.mubr.f32.mxu1 %v9593_v3 }
 0x41d   :  { %8220 = vmatmul.mubr.msk.f32.gmra.mrb[40].mxu0 %vm334_vm0, %v12330_v59 }
 0x41e   :  { %8236 = vmatmul.mubr.msk.f32.gmra.mrb[40].mxu1 %vm334_vm0, %v12330_v59  ;;  %6509 = vmatprep.mubr.f32.mxu0 %v9593_v3 }
 0x41f   :  { %6670 = vmatprep.mubr.f32.mxu1 %v9593_v3 }
 0x421   :  { %8221 = vmatmul.mubr.msk.f32.gmra.mrb[42].mxu0 %vm334_vm0, %v12341_v60 }
 0x422   :  { %8237 = vmatmul.mubr.msk.f32.gmra.mrb[42].mxu1 %vm334_vm0, %v12341_v60  ;;  %6515 = vmatprep.mubr.f32.mxu0 %v9593_v3 }
 0x423   :  { %6676 = vmatprep.mubr.f32.mxu1 %v9593_v3 }
 0x425   :  { %8222 = vmatmul.mubr.msk.f32.gmra.mrb[44].mxu0 %vm334_vm0, %v12352_v61 }
 0x426   :  { %8238 = vmatmul.mubr.msk.f32.gmra.mrb[44].mxu1 %vm334_vm0, %v12352_v61  ;;  %6521 = vmatprep.mubr.f32.mxu0 %v9593_v3 }
 0x427   :  { %6682 = vmatprep.mubr.f32.mxu1 %v9593_v3 }
 0x429   :  { %8223 = vmatmul.mubr.msk.f32.gmra.mrb[46].mxu0 %vm334_vm0, %v12363_v0 }
 0x42a   :  { %8239 = vmatmul.mubr.msk.f32.gmra.mrb[46].mxu1 %vm334_vm0, %v12363_v0  ;;  %6527 = vmatprep.mubr.f32.mxu0 %v9593_v3 }
 0x42b   :  { %6688 = vmatprep.mubr.f32.mxu1 %v9593_v3 }
 0x42d   :  { %8224 = vmatmul.mubr.msk.f32.gmra.mrb[48].mxu0 %vm334_vm0, %v12374_v1 }
 0x42e   :  { %8240 = vmatmul.mubr.msk.f32.gmra.mrb[48].mxu1 %vm334_vm0, %v12374_v1  ;;  %6533 = vmatprep.mubr.f32.mxu0 %v9593_v3 }
 0x42f   :  { %6694 = vmatprep.mubr.f32.mxu1 %v9593_v3 }
 0x431   :  { %8225 = vmatmul.mubr.msk.f32.gmra.mrb[50].mxu0 %vm334_vm0, %v12385_v2 }
 0x432   :  { %8241 = vmatmul.mubr.msk.f32.gmra.mrb[50].mxu1 %vm334_vm0, %v12385_v2  ;;  %6539 = vmatprep.mubr.f32.mxu0 %v9593_v3 }
 0x433   :  { %6700 = vmatprep.mubr.f32.mxu1 %v9593_v3 }
 0x435   :  { %8226 = vmatmul.mubr.msk.f32.gmra.mrb[52].mxu0 %vm334_vm0, %v12396_v4 }
 0x436   :  { %8242 = vmatmul.mubr.msk.f32.gmra.mrb[52].mxu1 %vm334_vm0, %v12396_v4  ;;  %6545 = vmatprep.mubr.f32.mxu0 %v9593_v3 }
 0x437   :  { %6706 = vmatprep.mubr.f32.mxu1 %v9593_v3 }
 0x439   :  { %8227 = vmatmul.mubr.msk.f32.gmra.mrb[54].mxu0 %vm334_vm0, %v12407_v5 }
 0x43a   :  { %8243 = vmatmul.mubr.msk.f32.gmra.mrb[54].mxu1 %vm334_vm0, %v12407_v5  ;;  %6551 = vmatprep.mubr.f32.mxu0 %v9593_v3 }
 0x43b   :  { %6712 = vmatprep.mubr.f32.mxu1 %v9593_v3 }
 0x43d   :  { %8228 = vmatmul.mubr.msk.f32.gmra.mrb[56].mxu0 %vm334_vm0, %v12418_v6 }
 0x43e   :  { %8244 = vmatmul.mubr.msk.f32.gmra.mrb[56].mxu1 %vm334_vm0, %v12418_v6  ;;  %6557 = vmatprep.mubr.f32.mxu0 %v9593_v3 }
 0x43f   :  { %6718 = vmatprep.mubr.f32.mxu1 %v9593_v3 }
 0x441   :  { %8229 = vmatmul.mubr.msk.f32.gmra.mrb[58].mxu0 %vm334_vm0, %v12429_v52 }
 0x442   :  { %8245 = vmatmul.mubr.msk.f32.gmra.mrb[58].mxu1 %vm334_vm0, %v12429_v52  ;;  %6563 = vmatprep.mubr.f32.mxu0 %v9593_v3 }
 0x443   :  { %6724 = vmatprep.mubr.f32.mxu1 %v9593_v3 }
 0x445   :  { %8230 = vmatmul.mubr.msk.f32.gmra.mrb[60].mxu0 %vm334_vm0, %v12440_v63 }
 0x446   :  { %8246 = vmatmul.mubr.msk.f32.gmra.mrb[60].mxu1 %vm334_vm0, %v12440_v63  ;;  %6569 = vmatprep.mubr.f32.mxu0 %v9593_v3 }
 0x447   :  { %6730 = vmatprep.mubr.f32.mxu1 %v9593_v3 }
 0x449   :  { %8231 = vmatmul.mubr.msk.f32.gmra.mrb[62].mxu0 %vm334_vm0, %v12451_v7 }
 0x44a   :  { %8247 = vmatmul.mubr.msk.f32.gmra.mrb[62].mxu1 %vm334_vm0, %v12451_v7  ;;  %6801 = vmatprep.mubr.f32.mxu0 %v9593_v3 }
 0x44b   :  { %6962 = vmatprep.mubr.f32.mxu1 %v9593_v3 }
 0x44d   :  { %8248 = vmatmul.mubr.msk.f32.vlgmr.msra.gmra.mrb[64].mxu0 %vm334_vm0, %v12256_v40 }
 0x44e   :  { %8264 = vmatmul.mubr.msk.f32.vlgmr.msra.gmra.mrb[64].mxu1 %vm334_vm0, %v12256_v40  ;;  %6807 = vmatprep.mubr.f32.mxu0 %v9593_v3 }
 0x44f   :  { %6968 = vmatprep.mubr.f32.mxu1 %v9593_v3 }
 0x451   :  { %8249 = vmatmul.mubr.msk.f32.gmra.mrb[66].mxu0 %vm334_vm0, %v12290_v53 }
 0x452   :  { %8265 = vmatmul.mubr.msk.f32.gmra.mrb[66].mxu1 %vm334_vm0, %v12290_v53  ;;  %6813 = vmatprep.mubr.f32.mxu0 %v9593_v3 }
 0x453   :  { %6974 = vmatprep.mubr.f32.mxu1 %v9593_v3 }
 0x455   :  { %8250 = vmatmul.mubr.msk.f32.gmra.mrb[68].mxu0 %vm334_vm0, %v12308_v51 }
 0x456   :  { %8266 = vmatmul.mubr.msk.f32.gmra.mrb[68].mxu1 %vm334_vm0, %v12308_v51  ;;  %6819 = vmatprep.mubr.f32.mxu0 %v9593_v3 }
 0x457   :  { %6980 = vmatprep.mubr.f32.mxu1 %v9593_v3 }
 0x459   :  { %8251 = vmatmul.mubr.msk.f32.gmra.mrb[70].mxu0 %vm334_vm0, %v12319_v58 }
 0x45a   :  { %8267 = vmatmul.mubr.msk.f32.gmra.mrb[70].mxu1 %vm334_vm0, %v12319_v58  ;;  %6825 = vmatprep.mubr.f32.mxu0 %v9593_v3 }
 0x45b   :  { %6986 = vmatprep.mubr.f32.mxu1 %v9593_v3 }
 0x45d   :  { %8252 = vmatmul.mubr.msk.f32.gmra.mrb[72].mxu0 %vm334_vm0, %v12330_v59 }
 0x45e   :  { %8268 = vmatmul.mubr.msk.f32.gmra.mrb[72].mxu1 %vm334_vm0, %v12330_v59  ;;  %6831 = vmatprep.mubr.f32.mxu0 %v9593_v3 }
 0x45f   :  { %6992 = vmatprep.mubr.f32.mxu1 %v9593_v3 }
 0x461   :  { %8253 = vmatmul.mubr.msk.f32.gmra.mrb[74].mxu0 %vm334_vm0, %v12341_v60 }
 0x462   :  { %8269 = vmatmul.mubr.msk.f32.gmra.mrb[74].mxu1 %vm334_vm0, %v12341_v60  ;;  %6837 = vmatprep.mubr.f32.mxu0 %v9593_v3 }
 0x463   :  { %6998 = vmatprep.mubr.f32.mxu1 %v9593_v3 }
 0x465   :  { %8254 = vmatmul.mubr.msk.f32.gmra.mrb[76].mxu0 %vm334_vm0, %v12352_v61 }
 0x466   :  { %8270 = vmatmul.mubr.msk.f32.gmra.mrb[76].mxu1 %vm334_vm0, %v12352_v61  ;;  %6843 = vmatprep.mubr.f32.mxu0 %v9593_v3 }
 0x467   :  { %7004 = vmatprep.mubr.f32.mxu1 %v9593_v3 }
 0x469   :  { %8255 = vmatmul.mubr.msk.f32.gmra.mrb[78].mxu0 %vm334_vm0, %v12363_v0 }
 0x46a   :  { %8271 = vmatmul.mubr.msk.f32.gmra.mrb[78].mxu1 %vm334_vm0, %v12363_v0  ;;  %6849 = vmatprep.mubr.f32.mxu0 %v9593_v3 }
 0x46b   :  { %7010 = vmatprep.mubr.f32.mxu1 %v9593_v3 }
 0x46d   :  { %8256 = vmatmul.mubr.msk.f32.gmra.mrb[80].mxu0 %vm334_vm0, %v12374_v1 }
 0x46e   :  { %8272 = vmatmul.mubr.msk.f32.gmra.mrb[80].mxu1 %vm334_vm0, %v12374_v1  ;;  %6855 = vmatprep.mubr.f32.mxu0 %v9593_v3 }
 0x46f   :  { %7016 = vmatprep.mubr.f32.mxu1 %v9593_v3 }
 0x471   :  { %8257 = vmatmul.mubr.msk.f32.gmra.mrb[82].mxu0 %vm334_vm0, %v12385_v2 }
 0x472   :  { %8273 = vmatmul.mubr.msk.f32.gmra.mrb[82].mxu1 %vm334_vm0, %v12385_v2  ;;  %6861 = vmatprep.mubr.f32.mxu0 %v9593_v3 }
 0x473   :  { %7022 = vmatprep.mubr.f32.mxu1 %v9593_v3 }
 0x475   :  { %8258 = vmatmul.mubr.msk.f32.gmra.mrb[84].mxu0 %vm334_vm0, %v12396_v4 }
 0x476   :  { %8274 = vmatmul.mubr.msk.f32.gmra.mrb[84].mxu1 %vm334_vm0, %v12396_v4  ;;  %6867 = vmatprep.mubr.f32.mxu0 %v9593_v3 }
 0x477   :  { %7028 = vmatprep.mubr.f32.mxu1 %v9593_v3 }
 0x479   :  { %8259 = vmatmul.mubr.msk.f32.gmra.mrb[86].mxu0 %vm334_vm0, %v12407_v5 }
 0x47a   :  { %8275 = vmatmul.mubr.msk.f32.gmra.mrb[86].mxu1 %vm334_vm0, %v12407_v5  ;;  %6873 = vmatprep.mubr.f32.mxu0 %v9593_v3 }
 0x47b   :  { %7034 = vmatprep.mubr.f32.mxu1 %v9593_v3 }
 0x47d   :  { %8260 = vmatmul.mubr.msk.f32.gmra.mrb[88].mxu0 %vm334_vm0, %v12418_v6 }
 0x47e   :  { %8276 = vmatmul.mubr.msk.f32.gmra.mrb[88].mxu1 %vm334_vm0, %v12418_v6  ;;  %6879 = vmatprep.mubr.f32.mxu0 %v9593_v3 }
 0x47f   :  { %7040 = vmatprep.mubr.f32.mxu1 %v9593_v3 }
 0x481   :  { %8261 = vmatmul.mubr.msk.f32.gmra.mrb[90].mxu0 %vm334_vm0, %v12429_v52 }
 0x482   :  { %8277 = vmatmul.mubr.msk.f32.gmra.mrb[90].mxu1 %vm334_vm0, %v12429_v52  ;;  %6885 = vmatprep.mubr.f32.mxu0 %v9593_v3 }
 0x483   :  { %7046 = vmatprep.mubr.f32.mxu1 %v9593_v3 }
 0x485   :  { %8262 = vmatmul.mubr.msk.f32.gmra.mrb[92].mxu0 %vm334_vm0, %v12440_v63 }
 0x486   :  { %8278 = vmatmul.mubr.msk.f32.gmra.mrb[92].mxu1 %vm334_vm0, %v12440_v63  ;;  %6891 = vmatprep.mubr.f32.mxu0 %v9593_v3 }
 0x487   :  { %7052 = vmatprep.mubr.f32.mxu1 %v9593_v3 }
 0x489   :  { %8263 = vmatmul.mubr.msk.f32.gmra.mrb[94].mxu0 %vm334_vm0, %v12451_v7 }
 0x48a   :  { %8279 = vmatmul.mubr.msk.f32.gmra.mrb[94].mxu1 %vm334_vm0, %v12451_v7 }
 0x4a0   :  { %v12686_v28 = vpop.f32.mrb[0].mxu0 }
 0x4a1   :  { %v12688_v29 = vpop.f32.mrb[0].mxu1  ;;  %v12690_v30 = vpop.f32.mrb[1].mxu0 }
 0x4a2   :  { %v12692_v31 = vpop.f32.mrb[1].mxu1 }
 0x4a4   :  { %v12696_v25 = vpop.f32.mrb[2].mxu0 }
 0x4a5   :  { %v12698_v3 = vpop.f32.mrb[2].mxu1  ;;  %v12700_v32 = vpop.f32.mrb[3].mxu0 }
 0x4a6   :  { %v12702_v33 = vpop.f32.mrb[3].mxu1 }
 0x4a8   :  { %v12706_v36 = vpop.f32.mrb[4].mxu0 }
 0x4a9   :  { %v12708_v37 = vpop.f32.mrb[4].mxu1  ;;  %v12710_v40 = vpop.f32.mrb[5].mxu0 }
 0x4aa   :  { %v12712_v41 = vpop.f32.mrb[5].mxu1 }
 0x4ac   :  { %v12716_v43 = vpop.f32.mrb[6].mxu0 }
 0x4ad   :  { %v12718_v44 = vpop.f32.mrb[6].mxu1  ;;  %v12720_v45 = vpop.f32.mrb[7].mxu0 }
 0x4ae   :  { %13445 = vst [vmem:[#allocation2_spill] sm:$0xff] %v12718_v44  ;;  %v12722_v24 = vpop.f32.mrb[7].mxu1 }
 0x4b0   :  { %v12726_v46 = vpop.f32.mrb[8].mxu0 }
 0x4b1   :  { %13446 = vst [vmem:[#allocation3_spill] sm:$0xff] %v12726_v46  ;;  %v12728_v47 = vpop.f32.mrb[8].mxu1  ;;  %v12730_v48 = vpop.f32.mrb[9].mxu0 }
 0x4b2   :  { %13447 = vst [vmem:[#allocation4_spill] sm:$0xff] %v12728_v47  ;;  %13448 = vst [vmem:[#allocation5_spill] sm:$0xff] %v12730_v48  ;;  %v12732_v49 = vpop.f32.mrb[9].mxu1 }
 0x4b3   :  { %13449 = vst [vmem:[#allocation6_spill] sm:$0xff] %v12732_v49 }
 0x4b4   :  { %v12736_v53 = vpop.f32.mrb[10].mxu0 }
 0x4b5   :  { %13450 = vst [vmem:[#allocation7_spill] sm:$0xff] %v12736_v53  ;;  %v12738_v54 = vpop.f32.mrb[10].mxu1  ;;  %v12740_v55 = vpop.f32.mrb[11].mxu0 }
 0x4b6   :  { %13451 = vst [vmem:[#allocation8_spill] sm:$0xff] %v12738_v54  ;;  %13452 = vst [vmem:[#allocation9_spill] sm:$0xff] %v12740_v55  ;;  %v12742_v56 = vpop.f32.mrb[11].mxu1 }
 0x4b7   :  { %13453 = vst [vmem:[#allocation10_spill] sm:$0xff] %v12742_v56 }
 0x4b8   :  { %v12746_v34 = vpop.f32.mrb[12].mxu0 }
 0x4b9   :  { %13454 = vst [vmem:[#allocation11_spill] sm:$0xff] %v12746_v34  ;;  %v12748_v38 = vpop.f32.mrb[12].mxu1  ;;  %v12750_v51 = vpop.f32.mrb[13].mxu0 }
 0x4ba   :  { %13455 = vst [vmem:[#allocation12_spill] sm:$0xff] %v12748_v38  ;;  %13456 = vst [vmem:[#allocation13_spill] sm:$0xff] %v12750_v51  ;;  %v12752_v58 = vpop.f32.mrb[13].mxu1 }
 0x4bb   :  { %13457 = vst [vmem:[#allocation14_spill] sm:$0xff] %v12752_v58 }
 0x4bc   :  { %v12756_v60 = vpop.f32.mrb[14].mxu0 }
 0x4bd   :  { %13458 = vst [vmem:[#allocation15_spill] sm:$0xff] %v12756_v60  ;;  %v12758_v61 = vpop.f32.mrb[14].mxu1  ;;  %v12760_v0 = vpop.f32.mrb[15].mxu0 }
 0x4be   :  { %13459 = vst [vmem:[#allocation16_spill] sm:$0xff] %v12758_v61  ;;  %13460 = vst [vmem:[#allocation17_spill] sm:$0xff] %v12760_v0  ;;  %v12762_v1 = vpop.f32.mrb[15].mxu1 }
 0x4bf   :  { %13461 = vst [vmem:[#allocation18_spill] sm:$0xff] %v12762_v1 }
 0x4c0   :  { %v12766_v4 = vpop.f32.mrb[16].mxu0 }
 0x4c1   :  { %13462 = vst [vmem:[#allocation19_spill] sm:$0xff] %v12766_v4  ;;  %v12768_v5 = vpop.f32.mrb[16].mxu1  ;;  %v12770_v6 = vpop.f32.mrb[17].mxu0 }
 0x4c2   :  { %13463 = vst [vmem:[#allocation20_spill] sm:$0xff] %v12768_v5  ;;  %13464 = vst [vmem:[#allocation21_spill] sm:$0xff] %v12770_v6  ;;  %v12772_v52 = vpop.f32.mrb[17].mxu1 }
 0x4c3   :  { %13465 = vst [vmem:[#allocation22_spill] sm:$0xff] %v12772_v52 }
 0x4c4   :  { %v12776_v7 = vpop.f32.mrb[18].mxu0 }
 0x4c5   :  { %13466 = vst [vmem:[#allocation23_spill] sm:$0xff] %v12776_v7  ;;  %v12778_v8 = vpop.f32.mrb[18].mxu1  ;;  %v12780_v9 = vpop.f32.mrb[19].mxu0 }
 0x4c6   :  { %13467 = vst [vmem:[#allocation24_spill] sm:$0xff] %v12778_v8  ;;  %13468 = vst [vmem:[#allocation25_spill] sm:$0xff] %v12780_v9  ;;  %v12782_v10 = vpop.f32.mrb[19].mxu1 }
 0x4c7   :  { %13469 = vst [vmem:[#allocation26_spill] sm:$0xff] %v12782_v10 }
 0x4c8   :  { %v12786_v14 = vpop.f32.mrb[20].mxu0 }
 0x4c9   :  { %13470 = vst [vmem:[#allocation27_spill] sm:$0xff] %v12786_v14  ;;  %v12788_v15 = vpop.f32.mrb[20].mxu1  ;;  %v12790_v16 = vpop.f32.mrb[21].mxu0 }
 0x4ca   :  { %13471 = vst [vmem:[#allocation28_spill] sm:$0xff] %v12788_v15  ;;  %13472 = vst [vmem:[#allocation29_spill] sm:$0xff] %v12790_v16  ;;  %v12792_v17 = vpop.f32.mrb[21].mxu1 }
 0x4cb   :  { %13473 = vst [vmem:[#allocation30_spill] sm:$0xff] %v12792_v17 }
 0x4cc   :  { %v12796_v62 = vpop.f32.mrb[22].mxu0 }
 0x4cd   :  { %13474 = vst [vmem:[#allocation31_spill] sm:$0xff] %v12796_v62  ;;  %v12798_v12 = vpop.f32.mrb[22].mxu1  ;;  %v12800_v19 = vpop.f32.mrb[23].mxu0 }
 0x4ce   :  { %13475 = vst [vmem:[#allocation32_spill] sm:$0xff] %v12798_v12  ;;  %13476 = vst [vmem:[#allocation33_spill] sm:$0xff] %v12800_v19  ;;  %v12802_v20 = vpop.f32.mrb[23].mxu1 }
 0x4cf   :  { %13477 = vst [vmem:[#allocation34_spill] sm:$0xff] %v12802_v20 }
 0x4d0   :  { %v12806_v22 = vpop.f32.mrb[24].mxu0 }
 0x4d1   :  { %13478 = vst [vmem:[#allocation35_spill] sm:$0xff] %v12806_v22  ;;  %v12808_v23 = vpop.f32.mrb[24].mxu1  ;;  %v12810_v26 = vpop.f32.mrb[25].mxu0 }
 0x4d2   :  { %13479 = vst [vmem:[#allocation36_spill] sm:$0xff] %v12808_v23  ;;  %13480 = vst [vmem:[#allocation37_spill] sm:$0xff] %v12810_v26  ;;  %v12812_v27 = vpop.f32.mrb[25].mxu1  ;;  %v7397_v26 = vlaneseq }
 0x4d3   :  { %13481 = vst [vmem:[#allocation38_spill] sm:$0xff] %v12812_v27 }
 0x4d4   :  { %v12816_v11 = vpop.f32.mrb[26].mxu0 }
 0x4d5   :  { %13482 = vst [vmem:[#allocation39_spill] sm:$0xff] %v12816_v11  ;;  %v12818_v63 = vpop.f32.mrb[26].mxu1  ;;  %v12820_v2 = vpop.f32.mrb[27].mxu0 }
 0x4d6   :  { %13483 = vst [vmem:[#allocation40_spill] sm:$0xff] %v12818_v63  ;;  %13484 = vst [vmem:[#allocation41_spill] sm:$0xff] %v12820_v2  ;;  %v12822_v59 = vpop.f32.mrb[27].mxu1  ;;  %v7398_v2 = vshrl.u32 %v7397_v26, 7  ;;  %v7395_v26 = vld [vmem:[%s13369_s2] sm:$0x7] }
 0x4d7   :  { %13485 = vst [vmem:[#allocation42_spill] sm:$0xff] %v12822_v59 }
 0x4d8   :  { %v12826_v57 = vpop.f32.mrb[28].mxu0  ;;  %v7407_v17 = vsub.s32 2, %v7398_v2 }
 0x4d9   :  { %13486 = vst [vmem:[#allocation43_spill] sm:$0xff] %v12826_v57  ;;  %v12828_v50 = vpop.f32.mrb[28].mxu1  ;;  %v12830_v39 = vpop.f32.mrb[29].mxu0 }
 0x4da   :  { %13487 = vst [vmem:[#allocation44_spill] sm:$0xff] %v12828_v50  ;;  %13488 = vst [vmem:[#allocation45_spill] sm:$0xff] %v12830_v39  ;;  %v12832_v42 = vpop.f32.mrb[29].mxu1  ;;  %v7403_v39 = vsub.s32 1, %v7398_v2 }
 0x4db   :  { %13489 = vst [vmem:[#allocation46_spill] sm:$0xff] %v12832_v42 }
 0x4dc   :  { %v12836_v35 = vpop.f32.mrb[30].mxu0 }
 0x4dd   :  { %13490 = vst [vmem:[#allocation47_spill] sm:$0xff] %v12836_v35  ;;  %v12838_v13 = vpop.f32.mrb[30].mxu1  ;;  %v12840_v27 = vpop.f32.mrb[31].mxu0 }
 0x4de   :  { %13491 = vst [vmem:[#allocation48_spill] sm:$0xff] %v12838_v13  ;;  %13492 = vst [vmem:[#allocation49_spill] sm:$0xff] %v12840_v27  ;;  %v12842_v22 = vpop.f32.mrb[31].mxu1  ;;  %v13047_v13 = vrot.slane %v7395_v26, %v7407_v17 }
 0x4df   :  { %13493 = vst [vmem:[#allocation50_spill] sm:$0xff] %v12842_v22 }
 0x4e0   :  { %v12846_v59 = vpop.f32.mrb[32].mxu0 }
 0x4e1   :  { %v12850_v20 = vpop.f32.mrb[32].mxu1  ;;  %v12852_v62 = vpop.f32.mrb[33].mxu0 }
 0x4e2   :  { %v12856_v42 = vpop.f32.mrb[33].mxu1 }
 0x4e4   :  { %v12858_v57 = vpop.f32.mrb[34].mxu0 }
 0x4e5   :  { %v12862_v21 = vpop.f32.mrb[34].mxu1  ;;  %v12864_v22 = vpop.f32.mrb[35].mxu0 }
 0x4e6   :  { %v12868_v35 = vpop.f32.mrb[35].mxu1 }
 0x4e8   :  { %v12870_v14 = vpop.f32.mrb[36].mxu0 }
 0x4e9   :  { %v12874_v10 = vpop.f32.mrb[36].mxu1  ;;  %v12876_v7 = vpop.f32.mrb[37].mxu0 }
 0x4ea   :  { %v12880_v52 = vpop.f32.mrb[37].mxu1 }
 0x4ec   :  { %v12882_v4 = vpop.f32.mrb[38].mxu0 }
 0x4ed   :  { %v12886_v1 = vpop.f32.mrb[38].mxu1  ;;  %v12888_v60 = vpop.f32.mrb[39].mxu0 }
 0x4ee   :  { %13494 = vst [vmem:[#allocation51_spill] sm:$0xff] %v12888_v60  ;;  %v12892_v58 = vpop.f32.mrb[39].mxu1 }
 0x4f0   :  { %v12894_v34 = vpop.f32.mrb[40].mxu0 }
 0x4f1   :  { %13495 = vst [vmem:[#allocation52_spill] sm:$0xff] %v12894_v34  ;;  %v12898_v56 = vpop.f32.mrb[40].mxu1  ;;  %v12900_v53 = vpop.f32.mrb[41].mxu0 }
 0x4f2   :  { %13496 = vst [vmem:[#allocation53_spill] sm:$0xff] %v12900_v53  ;;  %v12904_v49 = vpop.f32.mrb[41].mxu1 }
 0x4f4   :  { %v12906_v46 = vpop.f32.mrb[42].mxu0 }
 0x4f5   :  { %13497 = vst [vmem:[#allocation54_spill] sm:$0xff] %v12906_v46  ;;  %v12910_v60 = vpop.f32.mrb[42].mxu1  ;;  %v12912_v44 = vpop.f32.mrb[43].mxu0 }
 0x4f6   :  { %13498 = vst [vmem:[#allocation55_spill] sm:$0xff] %v12912_v44  ;;  %v12916_v34 = vpop.f32.mrb[43].mxu1 }
 0x4f8   :  { %v12918_v48 = vpop.f32.mrb[44].mxu0 }
 0x4f9   :  { %13499 = vst [vmem:[#allocation56_spill] sm:$0xff] %v12918_v48  ;;  %v12922_v53 = vpop.f32.mrb[44].mxu1  ;;  %v12924_v47 = vpop.f32.mrb[45].mxu0 }
 0x4fa   :  { %13500 = vst [vmem:[#allocation57_spill] sm:$0xff] %v12924_v47  ;;  %v12928_v46 = vpop.f32.mrb[45].mxu1 }
 0x4fc   :  { %v12930_v55 = vpop.f32.mrb[46].mxu0 }
 0x4fd   :  { %13501 = vst [vmem:[#allocation58_spill] sm:$0xff] %v12930_v55  ;;  %v12934_v44 = vpop.f32.mrb[46].mxu1  ;;  %v12936_v54 = vpop.f32.mrb[47].mxu0 }
 0x4fe   :  { %13502 = vst [vmem:[#allocation59_spill] sm:$0xff] %v12936_v54  ;;  %v12940_v48 = vpop.f32.mrb[47].mxu1 }
 0x500   :  { %v12942_v51 = vpop.f32.mrb[48].mxu0 }
 0x501   :  { %13503 = vst [vmem:[#allocation60_spill] sm:$0xff] %v12942_v51  ;;  %v12946_v47 = vpop.f32.mrb[48].mxu1  ;;  %v12948_v38 = vpop.f32.mrb[49].mxu0 }
 0x502   :  { %13504 = vst [vmem:[#allocation61_spill] sm:$0xff] %v12948_v38  ;;  %v12952_v55 = vpop.f32.mrb[49].mxu1 }
 0x504   :  { %v12954_v0 = vpop.f32.mrb[50].mxu0 }
 0x505   :  { %13505 = vst [vmem:[#allocation62_spill] sm:$0xff] %v12954_v0  ;;  %v12958_v54 = vpop.f32.mrb[50].mxu1  ;;  %v12960_v61 = vpop.f32.mrb[51].mxu0 }
 0x506   :  { %13506 = vst [vmem:[#allocation63_spill] sm:$0xff] %v12960_v61  ;;  %v12964_v51 = vpop.f32.mrb[51].mxu1 }
 0x508   :  { %v12966_v6 = vpop.f32.mrb[52].mxu0 }
 0x509   :  { %13507 = vst [vmem:[#allocation64_spill] sm:$0xff] %v12966_v6  ;;  %v12970_v38 = vpop.f32.mrb[52].mxu1  ;;  %v12972_v5 = vpop.f32.mrb[53].mxu0 }
 0x50a   :  { %13508 = vst [vmem:[#allocation65_spill] sm:$0xff] %v12972_v5  ;;  %v12976_v0 = vpop.f32.mrb[53].mxu1 }
 0x50c   :  { %v12978_v9 = vpop.f32.mrb[54].mxu0 }
 0x50d   :  { %13509 = vst [vmem:[#allocation66_spill] sm:$0xff] %v12978_v9  ;;  %v12982_v61 = vpop.f32.mrb[54].mxu1  ;;  %v12984_v8 = vpop.f32.mrb[55].mxu0 }
 0x50e   :  { %13510 = vst [vmem:[#allocation67_spill] sm:$0xff] %v12982_v61  ;;  %13511 = vst [vmem:[#allocation68_spill] sm:$0xff] %v12984_v8  ;;  %v12988_v6 = vpop.f32.mrb[55].mxu1 }
 0x510   :  { %v12990_v16 = vpop.f32.mrb[56].mxu0 }
 0x511   :  { %13512 = vst [vmem:[#allocation69_spill] sm:$0xff] %v12990_v16  ;;  %v12994_v5 = vpop.f32.mrb[56].mxu1  ;;  %v12996_v15 = vpop.f32.mrb[57].mxu0 }
 0x512   :  { %13513 = vst [vmem:[#allocation70_spill] sm:$0xff] %v12994_v5  ;;  %13514 = vst [vmem:[#allocation71_spill] sm:$0xff] %v12996_v15  ;;  %v13000_v9 = vpop.f32.mrb[57].mxu1 }
 0x513   :  { %13515 = vst [vmem:[#allocation72_spill] sm:$0xff] %v13000_v9 }
 0x514   :  { %v13002_v19 = vpop.f32.mrb[58].mxu0 }
 0x515   :  { %13516 = vst [vmem:[#allocation73_spill] sm:$0xff] %v13002_v19  ;;  %v13006_v8 = vpop.f32.mrb[58].mxu1  ;;  %v13008_v12 = vpop.f32.mrb[59].mxu0 }
 0x516   :  { %13517 = vst [vmem:[#allocation74_spill] sm:$0xff] %v13006_v8  ;;  %13518 = vst [vmem:[#allocation75_spill] sm:$0xff] %v13008_v12  ;;  %v13012_v16 = vpop.f32.mrb[59].mxu1 }
 0x517   :  { %13519 = vst [vmem:[#allocation76_spill] sm:$0xff] %v13012_v16 }
 0x518   :  { %v13014_v5 = vpop.f32.mrb[60].mxu0 }
 0x519   :  { %13520 = vst [vmem:[#allocation77_spill] sm:$0xff] %v13014_v5  ;;  %v13018_v15 = vpop.f32.mrb[60].mxu1  ;;  %v13020_v23 = vpop.f32.mrb[61].mxu0 }
 0x51a   :  { %13521 = vst [vmem:[#allocation78_spill] sm:$0xff] %v13018_v15  ;;  %13522 = vst [vmem:[#allocation79_spill] sm:$0xff] %v13020_v23  ;;  %v13024_v19 = vpop.f32.mrb[61].mxu1  ;;  %v7399_v15 = vsub.s32 0, %v7398_v2  ;;  %v13529_v2 = vmax.f32 %v12686_v28, %v12692_v31 }
 0x51b   :  { %13523 = vst [vmem:[#allocation80_spill] sm:$0xff] %v13024_v19 }
 0x51c   :  { %v13026_v8 = vpop.f32.mrb[62].mxu0 }
 0x51d   :  { %13524 = vst [vmem:[#allocation81_spill] sm:$0xff] %v13026_v8  ;;  %v13030_v12 = vpop.f32.mrb[62].mxu1  ;;  %v13032_v63 = vpop.f32.mrb[63].mxu0  ;;  %v13042_v8 = vrot.slane %v7395_v26, %v7403_v39 }
 0x51e   :  { %13525 = vst [vmem:[#allocation82_spill] sm:$0xff] %v13030_v12  ;;  %13526 = vst [vmem:[#allocation83_spill] sm:$0xff] %v13032_v63  ;;  %v13036_v5 = vpop.f32.mrb[63].mxu1  ;;  %v13045_v12 = vrot.slane %v7395_v26, %v7399_v15 }
 0x51f   :  { %13527 = vst [vmem:[#allocation84_spill] sm:$0xff] %v13036_v5  ;;  %v13528_v5 = vmax.f32 %v12690_v30, %v12846_v59 }
 0x520   :  { %v6803_v23 = vpop.f32.mrb[64].mxu0 }
 0x521   :  { %v6964_v50 = vpop.f32.mrb[64].mxu1  ;;  %v6805_v19 = vpop.f32.mrb[65].mxu0 }
 0x522   :  { %v7300_v11 = vmax.f32 %v12856_v42, %v6964_v50  ;;  %v7299_v27 = vmax.f32 %v12850_v20, %v6805_v19  ;;  %v6966_v18 = vpop.f32.mrb[65].mxu1  ;;  %v13530_v42 = vmax.f32 %v12688_v29, %v12852_v62  ;;  %v13531_v29 = vmax.f32 %v12700_v32, %v12858_v57 }
 0x523   :  { %v7301_v63 = vmax.f32 %v6803_v23, %v6966_v18  ;;  %v13532_v62 = vmax.f32 %v12696_v25, %v12702_v33 }
 0x524   :  { %v7348_v16 = vmax.f32 %v13528_v5, %v7300_v11  ;;  %v7347_v9 = vmax.f32 %v13529_v2, %v7299_v27  ;;  %v6809_v61 = vpop.f32.mrb[66].mxu0 }
 0x525   :  { %v7349_v39 = vmax.f32 %v13530_v42, %v7301_v63  ;;  %v6970_v50 = vpop.f32.mrb[66].mxu1  ;;  %v6811_v15 = vpop.f32.mrb[67].mxu0 }
 0x526   :  { %v7413_v19 = vadd.f32 %v13042_v8, %v7348_v16  ;;  %v7412_v17 = vadd.f32 %v13045_v12, %v7347_v9  ;;  %v7303_v18 = vmax.f32 %v12868_v35, %v6970_v50  ;;  %v7302_v30 = vmax.f32 %v12862_v21, %v6811_v15  ;;  %v6972_v59 = vpop.f32.mrb[67].mxu1 }
 0x527   :  { %v7414_v5 = vadd.f32 %v13047_v13, %v7349_v39  ;;  %v7304_v28 = vmax.f32 %v6809_v61, %v6972_v59  ;;  %v13533_v35 = vmax.f32 %v12698_v3, %v12864_v22  ;;  %v13534_v50 = vmax.f32 %v12710_v40, %v12870_v14 }
 0x528   :  { %v7461_v31 = vmax.f32 %v7413_v19, 0.0  ;;  %v7460_v11 = vmax.f32 %v7412_v17, 0.0  ;;  %v7351_v63 = vmax.f32 %v13531_v29, %v7303_v18  ;;  %v7350_v16 = vmax.f32 %v13532_v62, %v7302_v30  ;;  %v6815_v20 = vpop.f32.mrb[68].mxu0 }
 0x529   :  { %v7462_v9 = vmax.f32 %v7414_v5, 0.0  ;;  %v7352_v21 = vmax.f32 %v13533_v35, %v7304_v28  ;;  %v6976_v23 = vpop.f32.mrb[68].mxu1  ;;  %v6817_v27 = vpop.f32.mrb[69].mxu0  ;;  %v13536_v18 = vmax.f32 %v12708_v37, %v12876_v7  ;;  %v13537_v7 = vmax.f32 %v12720_v45, %v12882_v4  ;;  %v13539_v35 = vld [vmem:[#allocation2_spill] sm:$0xff] }
 0x52a   :  { %v8312_v26 = vpack.c.bf16 %v7461_v31, %v7460_v11  ;;  %v7416_v61 = vadd.f32 %v13042_v8, %v7351_v63  ;;  %v7415_v2 = vadd.f32 %v13045_v12, %v7350_v16  ;;  %v7306_v32 = vmax.f32 %v12880_v52, %v6976_v23  ;;  %v6978_v57 = vpop.f32.mrb[69].mxu1 }
 0x52b   :  { %v8313_v42 = vpack.c.bf16 %v7462_v9, %v7462_v9  ;;  %v7417_v25 = vadd.f32 %v13047_v13, %v7352_v21  ;;  %v7305_v33 = vmax.f32 %v12874_v10, %v6817_v27  ;;  %v7307_v39 = vmax.f32 %v6815_v20, %v6978_v57  ;;  %v13540_v21 = vld [vmem:[#allocation51_spill] sm:$0xff] }
 0x52c   :  { %7668 = vst [vmem:[%s13370_s3] sm:$0xff] %v8312_v26  ;;  %v7464_v3 = vmax.f32 %v7416_v61, 0.0  ;;  %v7463_v22 = vmax.f32 %v7415_v2, 0.0  ;;  %v7354_v15 = vmax.f32 %v13534_v50, %v7306_v32  ;;  %v6821_v19 = vpop.f32.mrb[70].mxu0  ;;  %v13535_v10 = vmax.f32 %v12706_v36, %v12712_v41 }
 0x52d   :  { %7669 = vst [vmem:[%s13370_s3 + $0x8] sm:$0xf] %v8313_v42  ;;  %v7465_v52 = vmax.f32 %v7417_v25, 0.0  ;;  %v7355_v30 = vmax.f32 %v13536_v18, %v7307_v39  ;;  %v6982_v59 = vpop.f32.mrb[70].mxu1  ;;  %v6823_v5 = vpop.f32.mrb[71].mxu0  ;;  %v13541_v23 = vmax.f32 %v13539_v35, %v13540_v21  ;;  %v13554_v21 = vld [vmem:[#allocation7_spill] sm:$0xff] }
 0x52e   :  { %v7353_v17 = vmax.f32 %v13535_v10, %v7305_v33  ;;  %v8314_v28 = vpack.c.bf16 %v7464_v3, %v7463_v22  ;;  %v7419_v40 = vadd.f32 %v13042_v8, %v7354_v15  ;;  %v7309_v14 = vmax.f32 %v12892_v58, %v6982_v59  ;;  %v6984_v11 = vpop.f32.mrb[71].mxu1  ;;  %v13542_v3 = vld [vmem:[#allocation5_spill] sm:$0xff]  ;;  %v13543_v22 = vld [vmem:[#allocation52_spill] sm:$0xff] }
 0x52f   :  { %v7308_v31 = vmax.f32 %v12886_v1, %v6823_v5  ;;  %v8315_v29 = vpack.c.bf16 %v7465_v52, %v7465_v52  ;;  %v7420_v36 = vadd.f32 %v13047_v13, %v7355_v30  ;;  %v7310_v41 = vmax.f32 %v6821_v19, %v6984_v11  ;;  %v13545_v19 = vld [vmem:[#allocation3_spill] sm:$0xff]  ;;  %v13546_v52 = vld [vmem:[#allocation6_spill] sm:$0xff]  ;;  %v13549_v30 = vld [vmem:[#allocation53_spill] sm:$0xff] }
 0x530   :  { %v7418_v63 = vadd.f32 %v13045_v12, %v7353_v17  ;;  %7670 = vst [vmem:[%s13370_s3 + $0xc] sm:$0x33] %v8314_v28  ;;  %v7467_v37 = vmax.f32 %v7419_v40, 0.0  ;;  %v7357_v62 = vmax.f32 %v13537_v7, %v7309_v14  ;;  %v13538_v58 = vmax.f32 %v12716_v43, %v12722_v24  ;;  %v6827_v16 = vpop.f32.mrb[72].mxu0 }
 0x531   :  { %7671 = vst [vmem:[%s13370_s3 + $0x14] sm:$0x3] %v8315_v29  ;;  %v7468_v9 = vmax.f32 %v7420_v36, 0.0  ;;  %v7358_v27 = vmax.f32 %v13541_v23, %v7310_v41  ;;  %v6988_v26 = vpop.f32.mrb[72].mxu1  ;;  %v6829_v61 = vpop.f32.mrb[73].mxu0  ;;  %v13544_v50 = vmax.f32 %v13542_v3, %v13543_v22  ;;  %v13547_v10 = vmax.f32 %v13545_v19, %v13546_v52  ;;  %v13555_v23 = vld [vmem:[#allocation10_spill] sm:$0xff] }
 0x532   :  { %v7356_v1 = vmax.f32 %v13538_v58, %v7308_v31  ;;  %v7466_v20 = vmax.f32 %v7418_v63, 0.0  ;;  %v7422_v45 = vadd.f32 %v13042_v8, %v7357_v62  ;;  %v7312_v43 = vmax.f32 %v12904_v49, %v6988_v26  ;;  %v6990_v2 = vpop.f32.mrb[73].mxu1  ;;  %v13557_v26 = vld [vmem:[#allocation8_spill] sm:$0xff] }
 0x533   :  { %v7311_v24 = vmax.f32 %v12898_v56, %v6829_v61  ;;  %v8317_v57 = vpack.c.bf16 %v7468_v9, %v7468_v9  ;;  %v7423_v42 = vadd.f32 %v13047_v13, %v7358_v27  ;;  %v7313_v25 = vmax.f32 %v6827_v16, %v6990_v2  ;;  %v13548_v56 = vld [vmem:[#allocation4_spill] sm:$0xff]  ;;  %v13552_v16 = vld [vmem:[#allocation54_spill] sm:$0xff]  ;;  %v13558_v61 = vld [vmem:[#allocation55_spill] sm:$0xff] }
 0x534   :  { %v7421_v4 = vadd.f32 %v13045_v12, %v7356_v1  ;;  %v8316_v32 = vpack.c.bf16 %v7467_v37, %v7466_v20  ;;  %v7470_v33 = vmax.f32 %v7422_v45, 0.0  ;;  %v7360_v15 = vmax.f32 %v13544_v50, %v7312_v43  ;;  %v6833_v18 = vpop.f32.mrb[74].mxu0  ;;  %v13551_v1 = vld [vmem:[#allocation9_spill] sm:$0xff]  ;;  %v13561_v19 = vld [vmem:[#allocation56_spill] sm:$0xff] }
 0x535   :  { %v7359_v17 = vmax.f32 %v13547_v10, %v7311_v24  ;;  %7673 = vst [vmem:[%s13370_s3 + $0x20] sm:$0xf] %v8317_v57  ;;  %v7471_v49 = vmax.f32 %v7423_v42, 0.0  ;;  %v13550_v59 = vmax.f32 %v13548_v56, %v13549_v30  ;;  %v6994_v28 = vpop.f32.mrb[74].mxu1  ;;  %v6835_v40 = vpop.f32.mrb[75].mxu0  ;;  %v13553_v20 = vmax.f32 %v13551_v1, %v13552_v16 }
 0x536   :  { %v7469_v39 = vmax.f32 %v7421_v4, 0.0  ;;  %7672 = vst [vmem:[%s13370_s3 + $0x18] sm:$0xff] %v8316_v32  ;;  %v7425_v31 = vadd.f32 %v13042_v8, %v7360_v15  ;;  %v7315_v29 = vmax.f32 %v12916_v34, %v6994_v28  ;;  %v6996_v63 = vpop.f32.mrb[75].mxu1  ;;  %v7314_v37 = vmax.f32 %v12910_v60, %v6835_v40  ;;  %v13560_v15 = vld [vmem:[#allocation13_spill] sm:$0xff] }
 0x537   :  { %v7361_v5 = vmax.f32 %v13550_v59, %v7313_v25  ;;  %v7424_v11 = vadd.f32 %v13045_v12, %v7359_v17  ;;  %v8319_v36 = vpack.c.bf16 %v7471_v49, %v7471_v49  ;;  %v7316_v7 = vmax.f32 %v6833_v18, %v6996_v63  ;;  %v13563_v17 = vld [vmem:[#allocation11_spill] sm:$0xff]  ;;  %v13566_v59 = vld [vmem:[#allocation12_spill] sm:$0xff] }
 0x538   :  { %v8318_v14 = vpack.c.bf16 %v7470_v33, %v7469_v39  ;;  %v7473_v62 = vmax.f32 %v7425_v31, 0.0  ;;  %v7363_v9 = vmax.f32 %v13553_v20, %v7315_v29  ;;  %v6839_v35 = vpop.f32.mrb[76].mxu0  ;;  %v13556_v60 = vmax.f32 %v13554_v21, %v13555_v23  ;;  %v13569_v20 = vld [vmem:[#allocation17_spill] sm:$0xff]  ;;  %v13572_v21 = vld [vmem:[#allocation15_spill] sm:$0xff]  ;;  %v13573_v23 = vld [vmem:[#allocation18_spill] sm:$0xff] }
 0x539   :  { %v7426_v41 = vadd.f32 %v13047_v13, %v7361_v5  ;;  %v7472_v58 = vmax.f32 %v7424_v11, 0.0  ;;  %7675 = vst [vmem:[%s13370_s3 + $0x2c] sm:$0x3] %v8319_v36  ;;  %v13559_v45 = vmax.f32 %v13557_v26, %v13558_v61  ;;  %v7000_v43 = vpop.f32.mrb[76].mxu1  ;;  %v6841_v24 = vpop.f32.mrb[77].mxu0  ;;  %v13562_v52 = vmax.f32 %v13560_v15, %v13561_v19  ;;  %v13567_v5 = vld [vmem:[#allocation57_spill] sm:$0xff] }
 0x53a   :  { %7674 = vst [vmem:[%s13370_s3 + $0x24] sm:$0x33] %v8318_v14  ;;  %v7362_v27 = vmax.f32 %v13556_v60, %v7314_v37  ;;  %v7428_v32 = vadd.f32 %v13042_v8, %v7363_v9  ;;  %v7318_v57 = vmax.f32 %v12928_v46, %v7000_v43  ;;  %v7317_v42 = vmax.f32 %v12922_v53, %v6841_v24  ;;  %v7002_v25 = vpop.f32.mrb[77].mxu1  ;;  %v13564_v46 = vld [vmem:[#allocation14_spill] sm:$0xff]  ;;  %v13576_v61 = vld [vmem:[#allocation59_spill] sm:$0xff]  ;;  %v13578_v19 = vld [vmem:[#allocation21_spill] sm:$0xff] }
 0x53b   :  { %v7474_v34 = vmax.f32 %v7426_v41, 0.0  ;;  %v7364_v4 = vmax.f32 %v13559_v45, %v7316_v7  ;;  %v8320_v2 = vpack.c.bf16 %v7473_v62, %v7472_v58  ;;  %v7319_v22 = vmax.f32 %v6839_v35, %v7002_v25  ;;  %v13570_v9 = vld [vmem:[#allocation58_spill] sm:$0xff] }
 0x53c   :  { %v7427_v39 = vadd.f32 %v13045_v12, %v7362_v27  ;;  %v7476_v50 = vmax.f32 %v7428_v32, 0.0  ;;  %v7366_v10 = vmax.f32 %v13562_v52, %v7318_v57  ;;  %v13565_v18 = vmax.f32 %v13563_v17, %v13564_v46  ;;  %v6845_v49 = vpop.f32.mrb[78].mxu0  ;;  %v13579_v52 = vld [vmem:[#allocation60_spill] sm:$0xff] }
 0x53d   :  { %v8321_v33 = vpack.c.bf16 %v7474_v34, %v7474_v34  ;;  %v7429_v3 = vadd.f32 %v13047_v13, %v7364_v4  ;;  %7676 = vst [vmem:[%s13370_s3 + $0x30] sm:$0xff] %v8320_v2  ;;  %v13568_v28 = vmax.f32 %v13566_v59, %v13567_v5  ;;  %v7006_v14 = vpop.f32.mrb[78].mxu1  ;;  %v6847_v31 = vpop.f32.mrb[79].mxu0  ;;  %v13571_v35 = vmax.f32 %v13569_v20, %v13570_v9  ;;  %v13590_v9 = vld [vmem:[#allocation23_spill] sm:$0xff] }
 0x53e   :  { %v7365_v53 = vmax.f32 %v13565_v18, %v7317_v42  ;;  %v7475_v56 = vmax.f32 %v7427_v39, 0.0  ;;  %v7431_v11 = vadd.f32 %v13042_v8, %v7366_v10  ;;  %v7321_v63 = vmax.f32 %v12940_v48, %v7006_v14  ;;  %v7008_v41 = vpop.f32.mrb[79].mxu1  ;;  %v13575_v48 = vld [vmem:[#allocation16_spill] sm:$0xff]  ;;  %v13581_v18 = vld [vmem:[#allocation19_spill] sm:$0xff] }
 0x53f   :  { %7677 = vst [vmem:[%s13370_s3 + $0x38] sm:$0xf] %v8321_v33  ;;  %v7477_v30 = vmax.f32 %v7429_v3, 0.0  ;;  %v7367_v40 = vmax.f32 %v13568_v28, %v7319_v22  ;;  %v7320_v36 = vmax.f32 %v12934_v44, %v6847_v31  ;;  %v7322_v58 = vmax.f32 %v6845_v49, %v7008_v41 }
 0x540   :  { %v7430_v29 = vadd.f32 %v13045_v12, %v7365_v53  ;;  %v8322_v37 = vpack.c.bf16 %v7476_v50, %v7475_v56  ;;  %v7479_v1 = vmax.f32 %v7431_v11, 0.0  ;;  %v7369_v34 = vmax.f32 %v13571_v35, %v7321_v63  ;;  %v6851_v26 = vpop.f32.mrb[80].mxu0  ;;  %v13582_v53 = vld [vmem:[#allocation22_spill] sm:$0xff]  ;;  %v13584_v56 = vld [vmem:[#allocation20_spill] sm:$0xff] }
 0x541   :  { %v8323_v7 = vpack.c.bf16 %v7477_v30, %v7477_v30  ;;  %v7432_v62 = vadd.f32 %v13047_v13, %v7367_v40  ;;  %v13574_v60 = vmax.f32 %v13572_v21, %v13573_v23  ;;  %v13577_v45 = vmax.f32 %v13575_v48, %v13576_v61  ;;  %v7012_v43 = vpop.f32.mrb[80].mxu1  ;;  %v6853_v24 = vpop.f32.mrb[81].mxu0  ;;  %v13585_v30 = vld [vmem:[#allocation61_spill] sm:$0xff] }
 0x542   :  { %v7478_v16 = vmax.f32 %v7430_v29, 0.0  ;;  %7678 = vst [vmem:[%s13370_s3 + $0x3c] sm:$0x33] %v8322_v37  ;;  %v7434_v32 = vadd.f32 %v13042_v8, %v7369_v34  ;;  %v7324_v42 = vmax.f32 %v12952_v55, %v7012_v43  ;;  %v7014_v25 = vpop.f32.mrb[81].mxu1  ;;  %v7323_v3 = vmax.f32 %v12946_v47, %v6853_v24 }
 0x543   :  { %v7368_v27 = vmax.f32 %v13574_v60, %v7320_v36  ;;  %7679 = vst [vmem:[%s13370_s3 + $0x44] sm:$0x3] %v8323_v7  ;;  %v7480_v44 = vmax.f32 %v7432_v62, 0.0  ;;  %v7370_v4 = vmax.f32 %v13577_v45, %v7322_v58  ;;  %v7325_v22 = vmax.f32 %v6851_v26, %v7014_v25  ;;  %v13587_v58 = vld [vmem:[#allocation25_spill] sm:$0xff]  ;;  %v13593_v60 = vld [vmem:[#allocation24_spill] sm:$0xff] }
 0x544   :  { %v8324_v2 = vpack.c.bf16 %v7479_v1, %v7478_v16  ;;  %v7482_v50 = vmax.f32 %v7434_v32, 0.0  ;;  %v13580_v10 = vmax.f32 %v13578_v19, %v13579_v52  ;;  %v6857_v46 = vpop.f32.mrb[82].mxu0  ;;  %v13583_v47 = vmax.f32 %v13581_v18, %v13582_v53  ;;  %v13588_v1 = vld [vmem:[#allocation62_spill] sm:$0xff]  ;;  %v13599_v19 = vld [vmem:[#allocation27_spill] sm:$0xff] }
 0x545   :  { %v7433_v57 = vadd.f32 %v13045_v12, %v7368_v27  ;;  %v8325_v33 = vpack.c.bf16 %v7480_v44, %v7480_v44  ;;  %v7435_v39 = vadd.f32 %v13047_v13, %v7370_v4  ;;  %v13586_v59 = vmax.f32 %v13584_v56, %v13585_v30  ;;  %v7018_v28 = vpop.f32.mrb[82].mxu1  ;;  %v6859_v40 = vpop.f32.mrb[83].mxu0  ;;  %v13594_v27 = vld [vmem:[#allocation63_spill] sm:$0xff]  ;;  %v13600_v52 = vld [vmem:[#allocation30_spill] sm:$0xff] }
 0x546   :  { %7680 = vst [vmem:[%s13370_s3 + $0x48] sm:$0xff] %v8324_v2  ;;  %v7372_v17 = vmax.f32 %v13580_v10, %v7324_v42  ;;  %v7371_v49 = vmax.f32 %v13583_v47, %v7323_v3  ;;  %v7327_v11 = vmax.f32 %v12964_v51, %v7018_v28  ;;  %v7326_v29 = vmax.f32 %v12958_v54, %v6859_v40  ;;  %v7020_v63 = vpop.f32.mrb[83].mxu1  ;;  %v13591_v51 = vld [vmem:[#allocation26_spill] sm:$0xff]  ;;  %v13596_v3 = vld [vmem:[#allocation29_spill] sm:$0xff] }
 0x547   :  { %v7481_v15 = vmax.f32 %v7433_v57, 0.0  ;;  %7681 = vst [vmem:[%s13370_s3 + $0x50] sm:$0xf] %v8325_v33  ;;  %v7483_v55 = vmax.f32 %v7435_v39, 0.0  ;;  %v7373_v5 = vmax.f32 %v13586_v59, %v7325_v22  ;;  %v7328_v7 = vmax.f32 %v6857_v46, %v7020_v63  ;;  %v13597_v22 = vld [vmem:[#allocation64_spill] sm:$0xff] }
 0x548   :  { %v7437_v31 = vadd.f32 %v13042_v8, %v7372_v17  ;;  %v7436_v41 = vadd.f32 %v13045_v12, %v7371_v49  ;;  %v13589_v16 = vmax.f32 %v13587_v58, %v13588_v1  ;;  %v13592_v35 = vmax.f32 %v13590_v9, %v13591_v51  ;;  %v6863_v34 = vpop.f32.mrb[84].mxu0  ;;  %v13609_v1 = vld [vmem:[#allocation31_spill] sm:$0xff]  ;;  %v13612_v51 = vld [vmem:[#allocation32_spill] sm:$0xff] }
 0x549   :  { %v8326_v14 = vpack.c.bf16 %v7482_v50, %v7481_v15  ;;  %v8327_v36 = vpack.c.bf16 %v7483_v55, %v7483_v55  ;;  %v7438_v37 = vadd.f32 %v13047_v13, %v7373_v5  ;;  %v13595_v26 = vmax.f32 %v13593_v60, %v13594_v27  ;;  %v7024_v48 = vpop.f32.mrb[84].mxu1  ;;  %v6865_v61 = vpop.f32.mrb[85].mxu0  ;;  %v13603_v55 = vld [vmem:[#allocation65_spill] sm:$0xff] }
 0x54a   :  { %v7485_v62 = vmax.f32 %v7437_v31, 0.0  ;;  %v7375_v20 = vmax.f32 %v13589_v16, %v7327_v11  ;;  %v7374_v54 = vmax.f32 %v13592_v35, %v7326_v29  ;;  %v7484_v21 = vmax.f32 %v7436_v41, 0.0  ;;  %v7026_v2 = vpop.f32.mrb[85].mxu1  ;;  %v13605_v31 = vld [vmem:[#allocation67_spill] sm:$0xff]  ;;  %v13606_v41 = vld [vmem:[#allocation33_spill] sm:$0xff]  ;;  %v13610_v16 = vld [vmem:[#allocation34_spill] sm:$0xff] }
 0x54b   :  { %7682 = vst [vmem:[%s13370_s3 + $0x54] sm:$0x33] %v8326_v14  ;;  %7683 = vst [vmem:[%s13370_s3 + $0x5c] sm:$0x3] %v8327_v36  ;;  %v7486_v23 = vmax.f32 %v7438_v37, 0.0  ;;  %v7376_v44 = vmax.f32 %v13595_v26, %v7328_v7  ;;  %v7330_v43 = vmax.f32 %v12976_v0, %v7024_v48  ;;  %v7329_v24 = vmax.f32 %v12970_v38, %v6865_v61  ;;  %v13602_v0 = vld [vmem:[#allocation28_spill] sm:$0xff] }
 0x54c   :  { %v7440_v45 = vadd.f32 %v13042_v8, %v7375_v20  ;;  %v7439_v4 = vadd.f32 %v13045_v12, %v7374_v54  ;;  %v8328_v32 = vpack.c.bf16 %v7485_v62, %v7484_v21  ;;  %v7331_v25 = vmax.f32 %v6863_v34, %v7026_v2  ;;  %v6869_v46 = vpop.f32.mrb[86].mxu0  ;;  %v13607_v37 = vld [vmem:[#allocation66_spill] sm:$0xff]  ;;  %v13613_v35 = vld [vmem:[#allocation68_spill] sm:$0xff] }
 0x54d   :  { %v8329_v57 = vpack.c.bf16 %v7486_v23, %v7486_v23  ;;  %v7441_v42 = vadd.f32 %v13047_v13, %v7376_v44  ;;  %v13598_v50 = vmax.f32 %v13596_v3, %v13597_v22  ;;  %v13601_v10 = vmax.f32 %v13599_v19, %v13600_v52  ;;  %v7030_v47 = vpop.f32.mrb[86].mxu1  ;;  %v6871_v49 = vpop.f32.mrb[87].mxu0  ;;  %v13615_v26 = vld [vmem:[#allocation72_spill] sm:$0xff]  ;;  %v13616_v48 = vld [vmem:[#allocation70_spill] sm:$0xff] }
 0x54e   :  { %v7488_v33 = vmax.f32 %v7440_v45, 0.0  ;;  %v7487_v39 = vmax.f32 %v7439_v4, 0.0  ;;  %7684 = vst [vmem:[%s13370_s3 + $0x60] sm:$0xff] %v8328_v32  ;;  %v13604_v18 = vmax.f32 %v13602_v0, %v13603_v55  ;;  %v7333_v5 = vmax.f32 %v12988_v6, %v7030_v47  ;;  %v7032_v28 = vpop.f32.mrb[87].mxu1  ;;  %v13621_v3 = vld [vmem:[#allocation38_spill] sm:$0xff]  ;;  %v13626_v47 = vld [vmem:[#allocation76_spill] sm:$0xff] }
 0x54f   :  { %v7378_v15 = vmax.f32 %v13598_v50, %v7330_v43  ;;  %v7377_v17 = vmax.f32 %v13601_v10, %v7329_v24  ;;  %7685 = vst [vmem:[%s13370_s3 + $0x68] sm:$0xf] %v8329_v57  ;;  %v7489_v38 = vmax.f32 %v7441_v42, 0.0  ;;  %v7332_v11 = vmax.f32 %v13605_v31, %v6871_v49  ;;  %v13617_v57 = vld [vmem:[#allocation37_spill] sm:$0xff]  ;;  %v13623_v10 = vld [vmem:[#allocation36_spill] sm:$0xff] }
 0x550   :  { %v7379_v53 = vmax.f32 %v13604_v18, %v7331_v25  ;;  %v8330_v56 = vpack.c.bf16 %v7488_v33, %v7487_v39  ;;  %v7334_v29 = vmax.f32 %v6869_v46, %v7032_v28  ;;  %v13608_v7 = vmax.f32 %v13606_v41, %v13607_v37  ;;  %v6875_v58 = vpop.f32.mrb[88].mxu0  ;;  %v13618_v42 = vld [vmem:[#allocation69_spill] sm:$0xff]  ;;  %v13620_v39 = vld [vmem:[#allocation35_spill] sm:$0xff] }
 0x551   :  { %v7443_v30 = vadd.f32 %v13042_v8, %v7378_v15  ;;  %v7442_v59 = vadd.f32 %v13045_v12, %v7377_v17  ;;  %v8331_v40 = vpack.c.bf16 %v7489_v38, %v7489_v38  ;;  %v13611_v20 = vmax.f32 %v13609_v1, %v13610_v16  ;;  %v7036_v21 = vpop.f32.mrb[88].mxu1  ;;  %v6877_v23 = vpop.f32.mrb[89].mxu0  ;;  %v13624_v17 = vld [vmem:[#allocation71_spill] sm:$0xff]  ;;  %v13634_v16 = vld [vmem:[#allocation40_spill] sm:$0xff] }
 0x552   :  { %v7444_v14 = vadd.f32 %v13047_v13, %v7379_v53  ;;  %7686 = vst [vmem:[%s13370_s3 + $0x6c] sm:$0x33] %v8330_v56  ;;  %v7381_v62 = vmax.f32 %v13608_v7, %v7333_v5  ;;  %v13614_v54 = vmax.f32 %v13612_v51, %v13613_v35  ;;  %v7336_v44 = vmax.f32 %v13615_v26, %v7036_v21  ;;  %v7038_v45 = vpop.f32.mrb[89].mxu1  ;;  %v13627_v56 = vld [vmem:[#allocation74_spill] sm:$0xff]  ;;  %v13631_v37 = vld [vmem:[#allocation39_spill] sm:$0xff] }
 0x553   :  { %v7491_v63 = vmax.f32 %v7443_v30, 0.0  ;;  %v7490_v36 = vmax.f32 %v7442_v59, 0.0  ;;  %7687 = vst [vmem:[%s13370_s3 + $0x74] sm:$0x3] %v8331_v40  ;;  %v7380_v9 = vmax.f32 %v13611_v20, %v7332_v11  ;;  %v7335_v61 = vmax.f32 %v13616_v48, %v6877_v23  ;;  %v13632_v7 = vld [vmem:[#allocation42_spill] sm:$0xff]  ;;  %v13635_v20 = vld [vmem:[#allocation75_spill] sm:$0xff] }
 0x554   :  { %v7492_v6 = vmax.f32 %v7444_v14, 0.0  ;;  %v7382_v34 = vmax.f32 %v13614_v54, %v7334_v29  ;;  %v7446_v27 = vadd.f32 %v13042_v8, %v7381_v62  ;;  %v7337_v2 = vmax.f32 %v6875_v58, %v7038_v45  ;;  %v6881_v15 = vpop.f32.mrb[90].mxu0  ;;  %v13628_v29 = vld [vmem:[#allocation41_spill] sm:$0xff] }
 0x555   :  { %v8332_v60 = vpack.c.bf16 %v7491_v63, %v7490_v36  ;;  %v7445_v43 = vadd.f32 %v13045_v12, %v7380_v9  ;;  %v13619_v25 = vmax.f32 %v13617_v57, %v13618_v42  ;;  %v13622_v22 = vmax.f32 %v13620_v39, %v13621_v3  ;;  %v7042_v0 = vpop.f32.mrb[90].mxu1  ;;  %v6883_v55 = vpop.f32.mrb[91].mxu0  ;;  %v13629_v63 = vld [vmem:[#allocation73_spill] sm:$0xff]  ;;  %v13642_v39 = vld [vmem:[#allocation43_spill] sm:$0xff]  ;;  %v13643_v3 = vld [vmem:[#allocation46_spill] sm:$0xff] }
 0x556   :  { %v8333_v4 = vpack.c.bf16 %v7492_v6, %v7492_v6  ;;  %v7447_v24 = vadd.f32 %v13047_v13, %v7382_v34  ;;  %v7494_v32 = vmax.f32 %v7446_v27, 0.0  ;;  %v13625_v46 = vmax.f32 %v13623_v10, %v13624_v17  ;;  %v7044_v59 = vpop.f32.mrb[91].mxu1 }
 0x557   :  { %7688 = vst [vmem:[%s13370_s3 + $0x78] sm:$0xff] %v8332_v60  ;;  %v7384_v33 = vmax.f32 %v13619_v25, %v7336_v44  ;;  %v7383_v50 = vmax.f32 %v13622_v22, %v7335_v61  ;;  %v7493_v19 = vmax.f32 %v7445_v43, 0.0  ;;  %v7339_v49 = vmax.f32 %v13626_v47, %v7042_v0  ;;  %v13637_v60 = vld [vmem:[#allocation80_spill] sm:$0xff]  ;;  %v13638_v61 = vld [vmem:[#allocation78_spill] sm:$0xff] }
 0x558   :  { %7689 = vst [vmem:[%s13370_s3 + $0x80] sm:$0xf] %v8333_v4  ;;  %v7495_v52 = vmax.f32 %v7447_v24, 0.0  ;;  %v7385_v38 = vmax.f32 %v13625_v46, %v7337_v2  ;;  %v7338_v30 = vmax.f32 %v13627_v56, %v6883_v55  ;;  %v7340_v14 = vmax.f32 %v6881_v15, %v7044_v59  ;;  %v6887_v6 = vpop.f32.mrb[92].mxu0  ;;  %v13639_v2 = vld [vmem:[#allocation45_spill] sm:$0xff]  ;;  %v13645_v15 = vld [vmem:[#allocation44_spill] sm:$0xff] }
 0x559   :  { %v7449_v18 = vadd.f32 %v13042_v8, %v7384_v33  ;;  %v7448_v53 = vadd.f32 %v13045_v12, %v7383_v50  ;;  %v8334_v5 = vpack.c.bf16 %v7494_v32, %v7493_v19  ;;  %v13630_v36 = vmax.f32 %v13628_v29, %v13629_v63  ;;  %v7048_v35 = vpop.f32.mrb[92].mxu1  ;;  %v6889_v54 = vpop.f32.mrb[93].mxu0  ;;  %v13640_v32 = vld [vmem:[#allocation77_spill] sm:$0xff]  ;;  %v13646_v19 = vld [vmem:[#allocation79_spill] sm:$0xff]  ;;  %v13648_v55 = vld [vmem:[#allocation84_spill] sm:$0xff] }
 0x55a   :  { %v8335_v28 = vpack.c.bf16 %v7495_v52, %v7495_v52  ;;  %v7450_v40 = vadd.f32 %v13047_v13, %v7385_v38  ;;  %v13633_v62 = vmax.f32 %v13631_v37, %v13632_v7  ;;  %v13636_v9 = vmax.f32 %v13634_v16, %v13635_v20  ;;  %v7050_v26 = vpop.f32.mrb[93].mxu1  ;;  %v13653_v29 = vld [vmem:[#allocation47_spill] sm:$0xff]  ;;  %v13654_v63 = vld [vmem:[#allocation50_spill] sm:$0xff] }
 0x55b   :  { %v7497_v31 = vmax.f32 %v7449_v18, 0.0  ;;  %v7496_v11 = vmax.f32 %v7448_v53, 0.0  ;;  %v7387_v41 = vmax.f32 %v13630_v36, %v7339_v49  ;;  %7690 = vst [vmem:[%s13370_s3 + $0x84] sm:$0x33] %v8334_v5  ;;  %v7342_v27 = vmax.f32 %v13637_v60, %v7048_v35  ;;  %v13649_v53 = vld [vmem:[#allocation82_spill] sm:$0xff] }
 0x55c   :  { %v7386_v58 = vmax.f32 %v13633_v62, %v7338_v30  ;;  %7691 = vst [vmem:[%s13370_s3 + $0x8c] sm:$0x3] %v8335_v28  ;;  %v7498_v1 = vmax.f32 %v7450_v40, 0.0  ;;  %v7388_v51 = vmax.f32 %v13636_v9, %v7340_v14  ;;  %v7341_v45 = vmax.f32 %v13638_v61, %v6889_v54  ;;  %v6893_v25 = vpop.f32.mrb[94].mxu0  ;;  %v13650_v40 = vld [vmem:[#allocation49_spill] sm:$0xff]  ;;  %v13656_v62 = vld [vmem:[#allocation48_spill] sm:$0xff] }
 0x55d   :  { %v8336_v34 = vpack.c.bf16 %v7497_v31, %v7496_v11  ;;  %v7452_v21 = vadd.f32 %v13042_v8, %v7387_v41  ;;  %v7343_v4 = vmax.f32 %v6887_v6, %v7050_v26  ;;  %v13641_v57 = vmax.f32 %v13639_v2, %v13640_v32  ;;  %v7054_v17 = vpop.f32.mrb[94].mxu1  ;;  %v6895_v46 = vpop.f32.mrb[95].mxu0  ;;  %v13651_v14 = vld [vmem:[#allocation81_spill] sm:$0xff] }
 0x55e   :  { %v7451_v23 = vadd.f32 %v13045_v12, %v7386_v58  ;;  %v8337_v44 = vpack.c.bf16 %v7498_v1, %v7498_v1  ;;  %v7453_v48 = vadd.f32 %v13047_v13, %v7388_v51  ;;  %v13644_v22 = vmax.f32 %v13642_v39, %v13643_v3  ;;  %v7056_v49 = vpop.f32.mrb[95].mxu1  ;;  %v13657_v58 = vld [vmem:[#allocation83_spill] sm:$0xff] }
 0x55f   :  { %7692 = vst [vmem:[%s13370_s3 + $0x90] sm:$0xff] %v8336_v34  ;;  %v7500_v43 = vmax.f32 %v7452_v21, 0.0  ;;  %v7390_v42 = vmax.f32 %v13641_v57, %v7342_v27  ;;  %v13647_v52 = vmax.f32 %v13645_v15, %v13646_v19  ;;  %v7345_v18 = vmax.f32 %v13648_v55, %v7054_v17 }
 0x560   :  { %v7499_v24 = vmax.f32 %v7451_v23, 0.0  ;;  %7693 = vst [vmem:[%s13370_s3 + $0x98] sm:$0xf] %v8337_v44  ;;  %v7501_v33 = vmax.f32 %v7453_v48, 0.0  ;;  %v7389_v50 = vmax.f32 %v13644_v22, %v7341_v45  ;;  %v7344_v47 = vmax.f32 %v13649_v53, %v6895_v46 }
 0x561   :  { %v7391_v10 = vmax.f32 %v13647_v52, %v7343_v4  ;;  %v7455_v0 = vadd.f32 %v13042_v8, %v7390_v42  ;;  %v7346_v5 = vmax.f32 %v6893_v25, %v7056_v49  ;;  %v13652_v31 = vmax.f32 %v13650_v40, %v13651_v14 }
 0x562   :  { %v8338_v38 = vpack.c.bf16 %v7500_v43, %v7499_v24  ;;  %v8339_v56 = vpack.c.bf16 %v7501_v33, %v7501_v33  ;;  %v7454_v30 = vadd.f32 %v13045_v12, %v7389_v50  ;;  %v13655_v36 = vmax.f32 %v13653_v29, %v13654_v63 }
 0x563   :  { %v7456_v59 = vadd.f32 %v13047_v13, %v7391_v10  ;;  %v7503_v28 = vmax.f32 %v7455_v0, 0.0  ;;  %v7393_v11 = vmax.f32 %v13652_v31, %v7345_v18  ;;  %v13658_v6 = vmax.f32 %v13656_v62, %v13657_v58 }
 0x564   :  { %7694 = vst [vmem:[%s13370_s3 + $0x9c] sm:$0x33] %v8338_v38  ;;  %v7392_v41 = vmax.f32 %v13655_v36, %v7344_v47  ;;  %7695 = vst [vmem:[%s13370_s3 + $0xa4] sm:$0x3] %v8339_v56  ;;  %v7502_v37 = vmax.f32 %v7454_v30, 0.0 }
 0x565   :  { %v7504_v7 = vmax.f32 %v7456_v59, 0.0  ;;  %v7394_v1 = vmax.f32 %v13658_v6, %v7346_v5  ;;  %v7458_v16 = vadd.f32 %v13042_v8, %v7393_v11 }
 0x566   :  { %v7457_v20 = vadd.f32 %v13045_v12, %v7392_v41  ;;  %v8340_v9 = vpack.c.bf16 %v7503_v28, %v7502_v37 }
 0x567   :  { %v8341_v51 = vpack.c.bf16 %v7504_v7, %v7504_v7  ;;  %v7459_v35 = vadd.f32 %v13047_v13, %v7394_v1  ;;  %v7506_v54 = vmax.f32 %v7458_v16, 0.0 }
 0x568   :  { %v7505_v34 = vmax.f32 %v7457_v20, 0.0  ;;  %7696 = vst [vmem:[%s13370_s3 + $0xa8] sm:$0xff] %v8340_v9 }
 0x569   :  { %7697 = vst [vmem:[%s13370_s3 + $0xb0] sm:$0xf] %v8341_v51  ;;  %v7507_v21 = vmax.f32 %v7459_v35, 0.0 }
 0x56a   :  { %v8342_v23 = vpack.c.bf16 %v7506_v54, %v7505_v34 }
 0x56b   :  { %v8343_v60 = vpack.c.bf16 %v7507_v21, %v7507_v21 }
 0x56c   :  { %7698 = vst [vmem:[%s13370_s3 + $0xb4] sm:$0x33] %v8342_v23 }
 0x56d   :  { %7699 = vst [vmem:[%s13370_s3 + $0xbc] sm:$0x3] %v8343_v60 }

// kernel: target_model_forward.3
= control target key start
LH: loop header
LB: loop body
LE: loop exit
PB: predicated region body
PF: predicated region fallthrough
CT: control target
= control target key end

     0   :  { %vm4421_vm0 = vmmov 0   ;;  %s5431_s1 = inlined_call_operand.vmem [shape: bf16[4608,128], index: 1, kind: input, shape index: {}]   ;;  %s5432_s0 = inlined_call_operand.vmem [shape: bf16[8,4608], index: 0, kind: input, shape index: {}]   ;;  %s5433_s2 = inlined_call_operand.vmem [shape: f32[1,128], index: 2, kind: input, shape index: {}]   ;;  %s5434_s3 = inlined_call_operand.vmem [shape: f32[128,128], index: 3, kind: input, shape index: {}]   ;;  %s5435_s4 = inlined_call_operand.vmem [shape: f32[1,128], index: 4, kind: input, shape index: {}]   ;;  %s5436_s5 = inlined_call_operand.vmem [shape: f32[8,128], index: 5, kind: output, shape index: {}]  }
   0x1   :  { %v4096_v0 = vld [vmem:[%s5431_s1 + $0x40] sm:$0xff]   ;;  %v4100_v4 = vld [vmem:[%s5431_s1 + $0x48] sm:$0xff]   ;;  %v4104_v8 = vld [vmem:[%s5431_s1 + $0x50] sm:$0xff]  }
   0x2   :  { %v4097_v1 = vld [vmem:[%s5431_s1 + $0xc0] sm:$0xff]   ;;  %3621 = vmatprep.subr.bf16.mxu0 %v4096_v0  ;;  %v4101_v5 = vld [vmem:[%s5431_s1 + $0xc8] sm:$0xff]   ;;  %v4105_v9 = vld [vmem:[%s5431_s1 + $0xd0] sm:$0xff]  }
   0x3   :  { %v4098_v2 = vld [vmem:[%s5431_s1] sm:$0xff]   ;;  %3643 = vmatprep.subr.bf16.mxu1 %v4097_v1  ;;  %v4102_v6 = vld [vmem:[%s5431_s1 + $0x8] sm:$0xff]   ;;  %v4106_v10 = vld [vmem:[%s5431_s1 + $0x10] sm:$0xff]  }
   0x4   :  { %v4099_v3 = vld [vmem:[%s5431_s1 + $0x80] sm:$0xff]   ;;  %3622 = vmatpush3.bf16.msra.mxu0 %v4098_v2  ;;  %v4103_v7 = vld [vmem:[%s5431_s1 + $0x88] sm:$0xff]   ;;  %v4107_v11 = vld [vmem:[%s5431_s1 + $0x90] sm:$0xff]  }
   0x5   :  { %3644 = vmatpush3.bf16.msra.mxu1 %v4099_v3  ;;  %3623 = vmatprep.subr.bf16.mxu0 %v4100_v4  ;;  %v4108_v12 = vld [vmem:[%s5431_s1 + $0x58] sm:$0xff]   ;;  %v4112_v16 = vld [vmem:[%s5431_s1 + $0x60] sm:$0xff]   ;;  %v4116_v20 = vld [vmem:[%s5431_s1 + $0x68] sm:$0xff]  }
   0x6   :  { %3645 = vmatprep.subr.bf16.mxu1 %v4101_v5  ;;  %v4109_v13 = vld [vmem:[%s5431_s1 + $0xd8] sm:$0xff]   ;;  %v4113_v17 = vld [vmem:[%s5431_s1 + $0xe0] sm:$0xff]   ;;  %v4117_v21 = vld [vmem:[%s5431_s1 + $0xe8] sm:$0xff]  }
   0x7   :  { %v4110_v14 = vld [vmem:[%s5431_s1 + $0x18] sm:$0xff]   ;;  %v4114_v18 = vld [vmem:[%s5431_s1 + $0x20] sm:$0xff]   ;;  %v4118_v22 = vld [vmem:[%s5431_s1 + $0x28] sm:$0xff]  }
   0x8   :  { %3624 = vmatpush3.bf16.msra.mxu0 %v4102_v6  ;;  %v4111_v15 = vld [vmem:[%s5431_s1 + $0x98] sm:$0xff]   ;;  %v4115_v19 = vld [vmem:[%s5431_s1 + $0xa0] sm:$0xff]   ;;  %v4119_v23 = vld [vmem:[%s5431_s1 + $0xa8] sm:$0xff]  }
   0x9   :  { %3646 = vmatpush3.bf16.msra.mxu1 %v4103_v7  ;;  %3625 = vmatprep.subr.bf16.mxu0 %v4104_v8  ;;  %v4120_v24 = vld [vmem:[%s5431_s1 + $0x70] sm:$0xff]   ;;  %v4124_v28 = vld [vmem:[%s5431_s1 + $0x78] sm:$0xff]   ;;  %v21_v32 = vld [vmem:[%s5432_s0] sm:$0xff] }
   0xa   :  { %3647 = vmatprep.subr.bf16.mxu1 %v4105_v9  ;;  %v4121_v25 = vld [vmem:[%s5431_s1 + $0xf0] sm:$0xff]   ;;  %v4125_v29 = vld [vmem:[%s5431_s1 + $0xf8] sm:$0xff]   ;;  %v22_v33 = vld [vmem:[%s5432_s0 + $0x8] sm:$0xff]  ;;  %v3296_v34 = vcombine.low %v21_v32, %v21_v32  ;;  %v3297_v35 = vcombine.high %v21_v32, %v21_v32 }
   0xb   :  { %v4122_v26 = vld [vmem:[%s5431_s1 + $0x30] sm:$0xff]   ;;  %v4126_v30 = vld [vmem:[%s5431_s1 + $0x38] sm:$0xff]   ;;  %v3298_v36 = vcombine.low %v22_v33, %v22_v33  ;;  %v3299_v37 = vcombine.high %v22_v33, %v22_v33  ;;  %v4132_v38 = vld [vmem:[%s5431_s1 + $0x140] sm:$0xff]  }
   0xc   :  { %3626 = vmatpush3.bf16.msra.mxu0 %v4106_v10  ;;  %v4123_v27 = vld [vmem:[%s5431_s1 + $0xb0] sm:$0xff]   ;;  %v4127_v31 = vld [vmem:[%s5431_s1 + $0xb8] sm:$0xff]   ;;  %v4133_v39 = vld [vmem:[%s5431_s1 + $0x1c0] sm:$0xff]   ;;  %2508 = vmatprep.mubr.bf16.mxu0 %v3297_v35 }
   0xd   :  { %3648 = vmatpush3.bf16.msra.mxu1 %v4107_v11  ;;  %3627 = vmatprep.subr.bf16.mxu0 %v4108_v12  ;;  %v4134_v40 = vld [vmem:[%s5431_s1 + $0x100] sm:$0xff]   ;;  %v4136_v42 = vld [vmem:[%s5431_s1 + $0x148] sm:$0xff]   ;;  %v4140_v46 = vld [vmem:[%s5431_s1 + $0x150] sm:$0xff]  }
   0xe   :  { %3649 = vmatprep.subr.bf16.mxu1 %v4109_v13  ;;  %2548 = vmatprep.mubr.bf16.mxu1 %v3299_v37  ;;  %v4135_v41 = vld [vmem:[%s5431_s1 + $0x180] sm:$0xff]   ;;  %v4137_v43 = vld [vmem:[%s5431_s1 + $0x1c8] sm:$0xff]   ;;  %v4141_v47 = vld [vmem:[%s5431_s1 + $0x1d0] sm:$0xff]  }
   0xf   :  { %v4138_v44 = vld [vmem:[%s5431_s1 + $0x108] sm:$0xff]   ;;  %v4142_v48 = vld [vmem:[%s5431_s1 + $0x110] sm:$0xff]   ;;  %v4144_v50 = vld [vmem:[%s5431_s1 + $0x158] sm:$0xff]  }
  0x10   :  { %3628 = vmatpush3.bf16.msra.mxu0 %v4110_v14  ;;  %v4139_v45 = vld [vmem:[%s5431_s1 + $0x188] sm:$0xff]   ;;  %v4143_v49 = vld [vmem:[%s5431_s1 + $0x190] sm:$0xff]   ;;  %v4145_v51 = vld [vmem:[%s5431_s1 + $0x1d8] sm:$0xff]  }
  0x11   :  { %3650 = vmatpush3.bf16.msra.mxu1 %v4111_v15  ;;  %3629 = vmatprep.subr.bf16.mxu0 %v4112_v16  ;;  %v4146_v52 = vld [vmem:[%s5431_s1 + $0x118] sm:$0xff]   ;;  %v4148_v54 = vld [vmem:[%s5431_s1 + $0x160] sm:$0xff]   ;;  %v4152_v58 = vld [vmem:[%s5431_s1 + $0x168] sm:$0xff]  }
  0x12   :  { %3651 = vmatprep.subr.bf16.mxu1 %v4113_v17  ;;  %v4147_v53 = vld [vmem:[%s5431_s1 + $0x198] sm:$0xff]   ;;  %v4149_v55 = vld [vmem:[%s5431_s1 + $0x1e0] sm:$0xff]   ;;  %v4153_v59 = vld [vmem:[%s5431_s1 + $0x1e8] sm:$0xff]  }
  0x13   :  { %v4150_v56 = vld [vmem:[%s5431_s1 + $0x120] sm:$0xff]   ;;  %v4154_v60 = vld [vmem:[%s5431_s1 + $0x128] sm:$0xff]   ;;  %v4156_v62 = vld [vmem:[%s5431_s1 + $0x170] sm:$0xff]  }
  0x14   :  { %3630 = vmatpush3.bf16.msra.mxu0 %v4114_v18  ;;  %v4151_v57 = vld [vmem:[%s5431_s1 + $0x1a0] sm:$0xff]   ;;  %v4155_v61 = vld [vmem:[%s5431_s1 + $0x1a8] sm:$0xff]   ;;  %v4157_v63 = vld [vmem:[%s5431_s1 + $0x1f0] sm:$0xff]  }
  0x15   :  { %3652 = vmatpush3.bf16.msra.mxu1 %v4115_v19  ;;  %3631 = vmatprep.subr.bf16.mxu0 %v4116_v20  ;;  %v4158_v0 = vld [vmem:[%s5431_s1 + $0x130] sm:$0xff]   ;;  %v4160_v2 = vld [vmem:[%s5431_s1 + $0x178] sm:$0xff]   ;;  %v4168_v12 = vld [vmem:[%s5431_s1 + $0x240] sm:$0xff]  }
  0x16   :  { %3653 = vmatprep.subr.bf16.mxu1 %v4117_v21  ;;  %v4159_v1 = vld [vmem:[%s5431_s1 + $0x1b0] sm:$0xff]   ;;  %v4161_v3 = vld [vmem:[%s5431_s1 + $0x1f8] sm:$0xff]   ;;  %v4169_v13 = vld [vmem:[%s5431_s1 + $0x2c0] sm:$0xff]  }
  0x17   :  { %v4162_v4 = vld [vmem:[%s5431_s1 + $0x138] sm:$0xff]   ;;  %v23_v6 = vld [vmem:[%s5432_s0 + $0x10] sm:$0xff]  ;;  %v4170_v14 = vld [vmem:[%s5431_s1 + $0x200] sm:$0xff]  }
  0x18   :  { %3632 = vmatpush3.bf16.msra.mxu0 %v4118_v22  ;;  %v4163_v5 = vld [vmem:[%s5431_s1 + $0x1b8] sm:$0xff]   ;;  %v3300_v7 = vcombine.low %v23_v6, %v23_v6  ;;  %v3301_v8 = vcombine.high %v23_v6, %v23_v6  ;;  %v4171_v15 = vld [vmem:[%s5431_s1 + $0x280] sm:$0xff]   ;;  %v4172_v16 = vld [vmem:[%s5431_s1 + $0x248] sm:$0xff]  }
  0x19   :  { %3654 = vmatpush3.bf16.msra.mxu1 %v4119_v23  ;;  %3633 = vmatprep.subr.bf16.mxu0 %v4120_v24  ;;  %v24_v9 = vld [vmem:[%s5432_s0 + $0x18] sm:$0xff]  ;;  %v4173_v17 = vld [vmem:[%s5431_s1 + $0x2c8] sm:$0xff]   ;;  %v4176_v20 = vld [vmem:[%s5431_s1 + $0x250] sm:$0xff]  }
  0x1a   :  { %3655 = vmatprep.subr.bf16.mxu1 %v4121_v25  ;;  %v3302_v10 = vcombine.low %v24_v9, %v24_v9  ;;  %v3303_v11 = vcombine.high %v24_v9, %v24_v9  ;;  %v4174_v18 = vld [vmem:[%s5431_s1 + $0x208] sm:$0xff]   ;;  %v4177_v21 = vld [vmem:[%s5431_s1 + $0x2d0] sm:$0xff]   ;;  %v4180_v24 = vld [vmem:[%s5431_s1 + $0x258] sm:$0xff]  }
  0x1b   :  { %v4175_v19 = vld [vmem:[%s5431_s1 + $0x288] sm:$0xff]   ;;  %v4178_v22 = vld [vmem:[%s5431_s1 + $0x210] sm:$0xff]   ;;  %v4181_v25 = vld [vmem:[%s5431_s1 + $0x2d8] sm:$0xff]  }
  0x1c   :  { %3634 = vmatpush3.bf16.msra.mxu0 %v4122_v26  ;;  %v4179_v23 = vld [vmem:[%s5431_s1 + $0x290] sm:$0xff]   ;;  %v4182_v26 = vld [vmem:[%s5431_s1 + $0x218] sm:$0xff]   ;;  %v4188_v32 = vld [vmem:[%s5431_s1 + $0x268] sm:$0xff]  }
  0x1d   :  { %3656 = vmatpush3.bf16.msra.mxu1 %v4123_v27  ;;  %3635 = vmatprep.subr.bf16.mxu0 %v4124_v28  ;;  %v4183_v27 = vld [vmem:[%s5431_s1 + $0x298] sm:$0xff]   ;;  %v4184_v28 = vld [vmem:[%s5431_s1 + $0x260] sm:$0xff]   ;;  %v4189_v33 = vld [vmem:[%s5431_s1 + $0x2e8] sm:$0xff]  }
  0x1e   :  { %3657 = vmatprep.subr.bf16.mxu1 %v4125_v29  ;;  %v4185_v29 = vld [vmem:[%s5431_s1 + $0x2e0] sm:$0xff]   ;;  %v4191_v35 = vld [vmem:[%s5431_s1 + $0x2a8] sm:$0xff]   ;;  %v4193_v37 = vld [vmem:[%s5431_s1 + $0x2f0] sm:$0xff]  }
  0x1f   :  { %v4224_v6 = vld [vmem:[%s5431_s1 + $0x368] sm:$0xff]  }
  0x20   :  { %3636 = vmatpush3.bf16.msra.mxu0 %v4126_v30  ;;  %v4186_v30 = vld [vmem:[%s5431_s1 + $0x220] sm:$0xff]   ;;  %v4227_v9 = vld [vmem:[%s5431_s1 + $0x3a8] sm:$0xff]  }
  0x21   :  { %3658 = vmatpush3.bf16.msra.mxu1 %v4127_v31  ;;  %3665 = vmatprep.subr.bf16.mxu0 %v4132_v38  ;;  %v4187_v31 = vld [vmem:[%s5431_s1 + $0x2a0] sm:$0xff]   ;;  %v4194_v38 = vld [vmem:[%s5431_s1 + $0x230] sm:$0xff]  }
  0x22   :  { %3687 = vmatprep.subr.bf16.mxu1 %v4133_v39  ;;  %v4195_v39 = vld [vmem:[%s5431_s1 + $0x2b0] sm:$0xff]  }
  0x23   :  { %2509 = vmatmul.mubr.bf16.vlgmr.msra.gmra.mrb[0].mxu0 %v3296_v34  ;;  %v4190_v34 = vld [vmem:[%s5431_s1 + $0x228] sm:$0xff]  }
  0x24   :  { %2549 = vmatmul.mubr.bf16.vlgmr.msra.gmra.mrb[0].mxu1 %v3298_v36  ;;  %3666 = vmatpush3.bf16.msra.mxu0 %v4134_v40  ;;  %v4192_v36 = vld [vmem:[%s5431_s1 + $0x270] sm:$0xff]   ;;  %v4196_v40 = vld [vmem:[%s5431_s1 + $0x278] sm:$0xff]  }
  0x25   :  { %3688 = vmatpush3.bf16.msra.mxu1 %v4135_v41  ;;  %3667 = vmatprep.subr.bf16.mxu0 %v4136_v42  ;;  %v4197_v41 = vld [vmem:[%s5431_s1 + $0x2f8] sm:$0xff]  }
  0x26   :  { %3689 = vmatprep.subr.bf16.mxu1 %v4137_v43  ;;  %2588 = vmatprep.mubr.bf16.mxu0 %v3301_v8  ;;  %v4198_v42 = vld [vmem:[%s5431_s1 + $0x238] sm:$0xff]   ;;  %v4226_v8 = vld [vmem:[%s5431_s1 + $0x328] sm:$0xff]  }
  0x27   :  { %2628 = vmatprep.mubr.bf16.mxu1 %v3303_v11  ;;  %v4199_v43 = vld [vmem:[%s5431_s1 + $0x2b8] sm:$0xff]   ;;  %v4229_v11 = vld [vmem:[%s5431_s1 + $0x3f0] sm:$0xff]  }
  0x28   :  { %3668 = vmatpush3.bf16.msra.mxu0 %v4138_v44  ;;  %v25_v44 = vld [vmem:[%s5432_s0 + $0x20] sm:$0xff] }
  0x29   :  { %3690 = vmatpush3.bf16.msra.mxu1 %v4139_v45  ;;  %3669 = vmatprep.subr.bf16.mxu0 %v4140_v46  ;;  %v26_v45 = vld [vmem:[%s5432_s0 + $0x28] sm:$0xff]  ;;  %v3304_v46 = vcombine.low %v25_v44, %v25_v44 }
  0x2a   :  { %3691 = vmatprep.subr.bf16.mxu1 %v4141_v47  ;;  %v3305_v47 = vcombine.high %v25_v44, %v25_v44  ;;  %v4260_v44 = vld [vmem:[%s5431_s1 + $0x468] sm:$0xff]  }
  0x2c   :  { %3670 = vmatpush3.bf16.msra.mxu0 %v4142_v48  ;;  %v3306_v48 = vcombine.low %v26_v45, %v26_v45 }
  0x2d   :  { %3692 = vmatpush3.bf16.msra.mxu1 %v4143_v49  ;;  %3671 = vmatprep.subr.bf16.mxu0 %v4144_v50  ;;  %v3307_v49 = vcombine.high %v26_v45, %v26_v45  ;;  %v4204_v50 = vld [vmem:[%s5431_s1 + $0x340] sm:$0xff]   ;;  %v4261_v45 = vld [vmem:[%s5431_s1 + $0x4e8] sm:$0xff]  }
  0x2e   :  { %3693 = vmatprep.subr.bf16.mxu1 %v4145_v51  ;;  %v4205_v51 = vld [vmem:[%s5431_s1 + $0x3c0] sm:$0xff]  }
  0x30   :  { %3672 = vmatpush3.bf16.msra.mxu0 %v4146_v52  ;;  %v4206_v52 = vld [vmem:[%s5431_s1 + $0x300] sm:$0xff]  }
  0x31   :  { %3694 = vmatpush3.bf16.msra.mxu1 %v4147_v53  ;;  %3673 = vmatprep.subr.bf16.mxu0 %v4148_v54  ;;  %v4207_v53 = vld [vmem:[%s5431_s1 + $0x380] sm:$0xff]   ;;  %v4208_v54 = vld [vmem:[%s5431_s1 + $0x348] sm:$0xff]  }
  0x32   :  { %3695 = vmatprep.subr.bf16.mxu1 %v4149_v55  ;;  %v4209_v55 = vld [vmem:[%s5431_s1 + $0x3c8] sm:$0xff]  }
  0x34   :  { %3674 = vmatpush3.bf16.msra.mxu0 %v4150_v56  ;;  %v4210_v56 = vld [vmem:[%s5431_s1 + $0x308] sm:$0xff]  }
  0x35   :  { %3696 = vmatpush3.bf16.msra.mxu1 %v4151_v57  ;;  %3675 = vmatprep.subr.bf16.mxu0 %v4152_v58  ;;  %v4211_v57 = vld [vmem:[%s5431_s1 + $0x388] sm:$0xff]   ;;  %v4212_v58 = vld [vmem:[%s5431_s1 + $0x350] sm:$0xff]  }
  0x36   :  { %3697 = vmatprep.subr.bf16.mxu1 %v4153_v59  ;;  %v4213_v59 = vld [vmem:[%s5431_s1 + $0x3d0] sm:$0xff]  }
  0x38   :  { %3676 = vmatpush3.bf16.msra.mxu0 %v4154_v60  ;;  %v4214_v60 = vld [vmem:[%s5431_s1 + $0x310] sm:$0xff]  }
  0x39   :  { %3698 = vmatpush3.bf16.msra.mxu1 %v4155_v61  ;;  %3677 = vmatprep.subr.bf16.mxu0 %v4156_v62  ;;  %v4215_v61 = vld [vmem:[%s5431_s1 + $0x390] sm:$0xff]   ;;  %v4216_v62 = vld [vmem:[%s5431_s1 + $0x358] sm:$0xff]  }
  0x3a   :  { %3699 = vmatprep.subr.bf16.mxu1 %v4157_v63  ;;  %v4217_v63 = vld [vmem:[%s5431_s1 + $0x3d8] sm:$0xff]  }
  0x3c   :  { %3678 = vmatpush3.bf16.msra.mxu0 %v4158_v0  ;;  %v4218_v0 = vld [vmem:[%s5431_s1 + $0x318] sm:$0xff]  }
  0x3d   :  { %3700 = vmatpush3.bf16.msra.mxu1 %v4159_v1  ;;  %3679 = vmatprep.subr.bf16.mxu0 %v4160_v2  ;;  %v4219_v1 = vld [vmem:[%s5431_s1 + $0x398] sm:$0xff]   ;;  %v4220_v2 = vld [vmem:[%s5431_s1 + $0x360] sm:$0xff]  }
  0x3e   :  { %3701 = vmatprep.subr.bf16.mxu1 %v4161_v3  ;;  %v4221_v3 = vld [vmem:[%s5431_s1 + $0x3e0] sm:$0xff]  }
  0x40   :  { %3680 = vmatpush3.bf16.msra.mxu0 %v4162_v4  ;;  %v4222_v4 = vld [vmem:[%s5431_s1 + $0x320] sm:$0xff]  }
  0x41   :  { %3702 = vmatpush3.bf16.msra.mxu1 %v4163_v5  ;;  %3709 = vmatprep.subr.bf16.mxu0 %v4168_v12  ;;  %v4223_v5 = vld [vmem:[%s5431_s1 + $0x3a0] sm:$0xff]   ;;  %v4230_v12 = vld [vmem:[%s5431_s1 + $0x330] sm:$0xff]  }
  0x42   :  { %3731 = vmatprep.subr.bf16.mxu1 %v4169_v13  ;;  %v4231_v13 = vld [vmem:[%s5431_s1 + $0x3b0] sm:$0xff]  }
  0x43   :  { %2589 = vmatmul.mubr.bf16.vlgmr.msra.gmra.mrb[4].mxu0 %v3300_v7  ;;  %v4225_v7 = vld [vmem:[%s5431_s1 + $0x3e8] sm:$0xff]  }
  0x44   :  { %2629 = vmatmul.mubr.bf16.vlgmr.msra.gmra.mrb[4].mxu1 %v3302_v10  ;;  %3710 = vmatpush3.bf16.msra.mxu0 %v4170_v14  ;;  %v4228_v10 = vld [vmem:[%s5431_s1 + $0x370] sm:$0xff]   ;;  %v4232_v14 = vld [vmem:[%s5431_s1 + $0x378] sm:$0xff]  }
  0x45   :  { %3732 = vmatpush3.bf16.msra.mxu1 %v4171_v15  ;;  %3711 = vmatprep.subr.bf16.mxu0 %v4172_v16  ;;  %v4233_v15 = vld [vmem:[%s5431_s1 + $0x3f8] sm:$0xff]  }
  0x46   :  { %3733 = vmatprep.subr.bf16.mxu1 %v4173_v17  ;;  %2668 = vmatprep.mubr.bf16.mxu0 %v3305_v47  ;;  %v4234_v16 = vld [vmem:[%s5431_s1 + $0x338] sm:$0xff]   ;;  %v4263_v47 = vld [vmem:[%s5431_s1 + $0x4a8] sm:$0xff]  }
  0x47   :  { %2708 = vmatprep.mubr.bf16.mxu1 %v3307_v49  ;;  %v4235_v17 = vld [vmem:[%s5431_s1 + $0x3b8] sm:$0xff]   ;;  %v4265_v49 = vld [vmem:[%s5431_s1 + $0x4f0] sm:$0xff]  }
  0x48   :  { %3712 = vmatpush3.bf16.msra.mxu0 %v4174_v18  ;;  %v27_v18 = vld [vmem:[%s5432_s0 + $0x30] sm:$0xff] }
  0x49   :  { %3734 = vmatpush3.bf16.msra.mxu1 %v4175_v19  ;;  %3713 = vmatprep.subr.bf16.mxu0 %v4176_v20  ;;  %v28_v19 = vld [vmem:[%s5432_s0 + $0x38] sm:$0xff]  ;;  %v3308_v20 = vcombine.low %v27_v18, %v27_v18 }
  0x4a   :  { %3735 = vmatprep.subr.bf16.mxu1 %v4177_v21  ;;  %v3309_v21 = vcombine.high %v27_v18, %v27_v18  ;;  %v4296_v18 = vld [vmem:[%s5431_s1 + $0x568] sm:$0xff]  }
  0x4c   :  { %3714 = vmatpush3.bf16.msra.mxu0 %v4178_v22  ;;  %v3310_v22 = vcombine.low %v28_v19, %v28_v19 }
  0x4d   :  { %3736 = vmatpush3.bf16.msra.mxu1 %v4179_v23  ;;  %3715 = vmatprep.subr.bf16.mxu0 %v4180_v24  ;;  %v4240_v23 = vld [vmem:[%s5431_s1 + $0x440] sm:$0xff]   ;;  %v3311_v24 = vcombine.high %v28_v19, %v28_v19  ;;  %v4297_v19 = vld [vmem:[%s5431_s1 + $0x5e8] sm:$0xff]  }
  0x4e   :  { %3737 = vmatprep.subr.bf16.mxu1 %v4181_v25  ;;  %v4241_v25 = vld [vmem:[%s5431_s1 + $0x4c0] sm:$0xff]  }
  0x50   :  { %3716 = vmatpush3.bf16.msra.mxu0 %v4182_v26  ;;  %v4242_v26 = vld [vmem:[%s5431_s1 + $0x400] sm:$0xff]  }
  0x51   :  { %3738 = vmatpush3.bf16.msra.mxu1 %v4183_v27  ;;  %3717 = vmatprep.subr.bf16.mxu0 %v4184_v28  ;;  %v4243_v27 = vld [vmem:[%s5431_s1 + $0x480] sm:$0xff]   ;;  %v4244_v28 = vld [vmem:[%s5431_s1 + $0x448] sm:$0xff]  }
  0x52   :  { %3739 = vmatprep.subr.bf16.mxu1 %v4185_v29  ;;  %v4245_v29 = vld [vmem:[%s5431_s1 + $0x4c8] sm:$0xff]  }
  0x54   :  { %3718 = vmatpush3.bf16.msra.mxu0 %v4186_v30  ;;  %v4246_v30 = vld [vmem:[%s5431_s1 + $0x408] sm:$0xff]  }
  0x55   :  { %3740 = vmatpush3.bf16.msra.mxu1 %v4187_v31  ;;  %3719 = vmatprep.subr.bf16.mxu0 %v4188_v32  ;;  %v4247_v31 = vld [vmem:[%s5431_s1 + $0x488] sm:$0xff]   ;;  %v4248_v32 = vld [vmem:[%s5431_s1 + $0x450] sm:$0xff]  }
  0x56   :  { %3741 = vmatprep.subr.bf16.mxu1 %v4189_v33  ;;  %v4249_v33 = vld [vmem:[%s5431_s1 + $0x4d0] sm:$0xff]  }
  0x58   :  { %3720 = vmatpush3.bf16.msra.mxu0 %v4190_v34  ;;  %v4250_v34 = vld [vmem:[%s5431_s1 + $0x410] sm:$0xff]  }
  0x59   :  { %3742 = vmatpush3.bf16.msra.mxu1 %v4191_v35  ;;  %3721 = vmatprep.subr.bf16.mxu0 %v4192_v36  ;;  %v4251_v35 = vld [vmem:[%s5431_s1 + $0x490] sm:$0xff]   ;;  %v4252_v36 = vld [vmem:[%s5431_s1 + $0x458] sm:$0xff]  }
  0x5a   :  { %3743 = vmatprep.subr.bf16.mxu1 %v4193_v37  ;;  %v4253_v37 = vld [vmem:[%s5431_s1 + $0x4d8] sm:$0xff]  }
  0x5c   :  { %3722 = vmatpush3.bf16.msra.mxu0 %v4194_v38  ;;  %v4254_v38 = vld [vmem:[%s5431_s1 + $0x418] sm:$0xff]  }
  0x5d   :  { %3744 = vmatpush3.bf16.msra.mxu1 %v4195_v39  ;;  %3723 = vmatprep.subr.bf16.mxu0 %v4196_v40  ;;  %v4255_v39 = vld [vmem:[%s5431_s1 + $0x498] sm:$0xff]   ;;  %v4256_v40 = vld [vmem:[%s5431_s1 + $0x460] sm:$0xff]  }
  0x5e   :  { %3745 = vmatprep.subr.bf16.mxu1 %v4197_v41  ;;  %v4257_v41 = vld [vmem:[%s5431_s1 + $0x4e0] sm:$0xff]  }
  0x60   :  { %3724 = vmatpush3.bf16.msra.mxu0 %v4198_v42  ;;  %v4258_v42 = vld [vmem:[%s5431_s1 + $0x420] sm:$0xff]  }
  0x61   :  { %3746 = vmatpush3.bf16.msra.mxu1 %v4199_v43  ;;  %3753 = vmatprep.subr.bf16.mxu0 %v4204_v50  ;;  %v4259_v43 = vld [vmem:[%s5431_s1 + $0x4a0] sm:$0xff]   ;;  %v4266_v50 = vld [vmem:[%s5431_s1 + $0x430] sm:$0xff]  }
  0x62   :  { %3775 = vmatprep.subr.bf16.mxu1 %v4205_v51  ;;  %v4267_v51 = vld [vmem:[%s5431_s1 + $0x4b0] sm:$0xff]  }
  0x63   :  { %2669 = vmatmul.mubr.bf16.vlgmr.msra.gmra.mrb[8].mxu0 %v3304_v46  ;;  %v4262_v46 = vld [vmem:[%s5431_s1 + $0x428] sm:$0xff]  }
  0x64   :  { %2709 = vmatmul.mubr.bf16.vlgmr.msra.gmra.mrb[8].mxu1 %v3306_v48  ;;  %3754 = vmatpush3.bf16.msra.mxu0 %v4206_v52  ;;  %v4264_v48 = vld [vmem:[%s5431_s1 + $0x470] sm:$0xff]   ;;  %v4268_v52 = vld [vmem:[%s5431_s1 + $0x478] sm:$0xff]  }
  0x65   :  { %3776 = vmatpush3.bf16.msra.mxu1 %v4207_v53  ;;  %3755 = vmatprep.subr.bf16.mxu0 %v4208_v54  ;;  %v4269_v53 = vld [vmem:[%s5431_s1 + $0x4f8] sm:$0xff]  }
  0x66   :  { %3777 = vmatprep.subr.bf16.mxu1 %v4209_v55  ;;  %2748 = vmatprep.mubr.bf16.mxu0 %v3309_v21  ;;  %v4270_v54 = vld [vmem:[%s5431_s1 + $0x438] sm:$0xff]   ;;  %v4299_v21 = vld [vmem:[%s5431_s1 + $0x5a8] sm:$0xff]  }
  0x67   :  { %2788 = vmatprep.mubr.bf16.mxu1 %v3311_v24  ;;  %v4271_v55 = vld [vmem:[%s5431_s1 + $0x4b8] sm:$0xff]   ;;  %v4302_v24 = vld [vmem:[%s5431_s1 + $0x530] sm:$0xff]  }
  0x68   :  { %3756 = vmatpush3.bf16.msra.mxu0 %v4210_v56  ;;  %v29_v56 = vld [vmem:[%s5432_s0 + $0x40] sm:$0xff] }
  0x69   :  { %3778 = vmatpush3.bf16.msra.mxu1 %v4211_v57  ;;  %3757 = vmatprep.subr.bf16.mxu0 %v4212_v58  ;;  %v3312_v57 = vcombine.low %v29_v56, %v29_v56  ;;  %v3313_v58 = vcombine.high %v29_v56, %v29_v56  ;;  %v4332_v56 = vld [vmem:[%s5431_s1 + $0x668] sm:$0xff]  }
  0x6a   :  { %3779 = vmatprep.subr.bf16.mxu1 %v4213_v59  ;;  %v30_v59 = vld [vmem:[%s5432_s0 + $0x48] sm:$0xff] }
  0x6c   :  { %3758 = vmatpush3.bf16.msra.mxu0 %v4214_v60  ;;  %v3314_v60 = vcombine.low %v30_v59, %v30_v59 }
  0x6d   :  { %3780 = vmatpush3.bf16.msra.mxu1 %v4215_v61  ;;  %3759 = vmatprep.subr.bf16.mxu0 %v4216_v62  ;;  %v3315_v61 = vcombine.high %v30_v59, %v30_v59  ;;  %v4276_v62 = vld [vmem:[%s5431_s1 + $0x540] sm:$0xff]   ;;  %v4335_v59 = vld [vmem:[%s5431_s1 + $0x6a8] sm:$0xff]  }
  0x6e   :  { %3781 = vmatprep.subr.bf16.mxu1 %v4217_v63  ;;  %v4277_v63 = vld [vmem:[%s5431_s1 + $0x5c0] sm:$0xff]  }
  0x70   :  { %3760 = vmatpush3.bf16.msra.mxu0 %v4218_v0  ;;  %v4278_v0 = vld [vmem:[%s5431_s1 + $0x500] sm:$0xff]  }
  0x71   :  { %3782 = vmatpush3.bf16.msra.mxu1 %v4219_v1  ;;  %3761 = vmatprep.subr.bf16.mxu0 %v4220_v2  ;;  %v4279_v1 = vld [vmem:[%s5431_s1 + $0x580] sm:$0xff]   ;;  %v4280_v2 = vld [vmem:[%s5431_s1 + $0x548] sm:$0xff]  }
  0x72   :  { %3783 = vmatprep.subr.bf16.mxu1 %v4221_v3  ;;  %v4281_v3 = vld [vmem:[%s5431_s1 + $0x5c8] sm:$0xff]  }
  0x74   :  { %3762 = vmatpush3.bf16.msra.mxu0 %v4222_v4  ;;  %v4282_v4 = vld [vmem:[%s5431_s1 + $0x508] sm:$0xff]  }
  0x75   :  { %3784 = vmatpush3.bf16.msra.mxu1 %v4223_v5  ;;  %3763 = vmatprep.subr.bf16.mxu0 %v4224_v6  ;;  %v4283_v5 = vld [vmem:[%s5431_s1 + $0x588] sm:$0xff]   ;;  %v4284_v6 = vld [vmem:[%s5431_s1 + $0x550] sm:$0xff]  }
  0x76   :  { %3785 = vmatprep.subr.bf16.mxu1 %v4225_v7  ;;  %v4285_v7 = vld [vmem:[%s5431_s1 + $0x5d0] sm:$0xff]  }
  0x78   :  { %3764 = vmatpush3.bf16.msra.mxu0 %v4226_v8  ;;  %v4286_v8 = vld [vmem:[%s5431_s1 + $0x510] sm:$0xff]  }
  0x79   :  { %3786 = vmatpush3.bf16.msra.mxu1 %v4227_v9  ;;  %3765 = vmatprep.subr.bf16.mxu0 %v4228_v10  ;;  %v4287_v9 = vld [vmem:[%s5431_s1 + $0x590] sm:$0xff]   ;;  %v4288_v10 = vld [vmem:[%s5431_s1 + $0x558] sm:$0xff]  }
  0x7a   :  { %3787 = vmatprep.subr.bf16.mxu1 %v4229_v11  ;;  %v4289_v11 = vld [vmem:[%s5431_s1 + $0x5d8] sm:$0xff]  }
  0x7c   :  { %3766 = vmatpush3.bf16.msra.mxu0 %v4230_v12  ;;  %v4290_v12 = vld [vmem:[%s5431_s1 + $0x518] sm:$0xff]  }
  0x7d   :  { %3788 = vmatpush3.bf16.msra.mxu1 %v4231_v13  ;;  %3767 = vmatprep.subr.bf16.mxu0 %v4232_v14  ;;  %v4291_v13 = vld [vmem:[%s5431_s1 + $0x598] sm:$0xff]   ;;  %v4292_v14 = vld [vmem:[%s5431_s1 + $0x560] sm:$0xff]  }
  0x7e   :  { %3789 = vmatprep.subr.bf16.mxu1 %v4233_v15  ;;  %v4293_v15 = vld [vmem:[%s5431_s1 + $0x5e0] sm:$0xff]  }
  0x80   :  { %3768 = vmatpush3.bf16.msra.mxu0 %v4234_v16  ;;  %v4294_v16 = vld [vmem:[%s5431_s1 + $0x520] sm:$0xff]  }
  0x81   :  { %3790 = vmatpush3.bf16.msra.mxu1 %v4235_v17  ;;  %3797 = vmatprep.subr.bf16.mxu0 %v4240_v23  ;;  %v4295_v17 = vld [vmem:[%s5431_s1 + $0x5a0] sm:$0xff]   ;;  %v4301_v23 = vld [vmem:[%s5431_s1 + $0x5f0] sm:$0xff]  }
  0x82   :  { %3819 = vmatprep.subr.bf16.mxu1 %v4241_v25  ;;  %v4303_v25 = vld [vmem:[%s5431_s1 + $0x5b0] sm:$0xff]  }
  0x83   :  { %2749 = vmatmul.mubr.bf16.vlgmr.msra.gmra.mrb[12].mxu0 %v3308_v20  ;;  %v4298_v20 = vld [vmem:[%s5431_s1 + $0x528] sm:$0xff]  }
  0x84   :  { %2789 = vmatmul.mubr.bf16.vlgmr.msra.gmra.mrb[12].mxu1 %v3310_v22  ;;  %3798 = vmatpush3.bf16.msra.mxu0 %v4242_v26  ;;  %v4300_v22 = vld [vmem:[%s5431_s1 + $0x570] sm:$0xff]   ;;  %v4304_v26 = vld [vmem:[%s5431_s1 + $0x578] sm:$0xff]  }
  0x85   :  { %3820 = vmatpush3.bf16.msra.mxu1 %v4243_v27  ;;  %3799 = vmatprep.subr.bf16.mxu0 %v4244_v28  ;;  %v4305_v27 = vld [vmem:[%s5431_s1 + $0x5f8] sm:$0xff]  }
  0x86   :  { %3821 = vmatprep.subr.bf16.mxu1 %v4245_v29  ;;  %2828 = vmatprep.mubr.bf16.mxu0 %v3313_v58  ;;  %v4306_v28 = vld [vmem:[%s5431_s1 + $0x538] sm:$0xff]   ;;  %v4334_v58 = vld [vmem:[%s5431_s1 + $0x628] sm:$0xff]  }
  0x87   :  { %2868 = vmatprep.mubr.bf16.mxu1 %v3315_v61  ;;  %v4307_v29 = vld [vmem:[%s5431_s1 + $0x5b8] sm:$0xff]   ;;  %v4337_v61 = vld [vmem:[%s5431_s1 + $0x6f0] sm:$0xff]  }
  0x88   :  { %3800 = vmatpush3.bf16.msra.mxu0 %v4246_v30  ;;  %v31_v30 = vld [vmem:[%s5432_s0 + $0x50] sm:$0xff] }
  0x89   :  { %3822 = vmatpush3.bf16.msra.mxu1 %v4247_v31  ;;  %3801 = vmatprep.subr.bf16.mxu0 %v4248_v32  ;;  %v32_v31 = vld [vmem:[%s5432_s0 + $0x58] sm:$0xff]  ;;  %v3316_v32 = vcombine.low %v31_v30, %v31_v30 }
  0x8a   :  { %3823 = vmatprep.subr.bf16.mxu1 %v4249_v33  ;;  %v3317_v33 = vcombine.high %v31_v30, %v31_v30  ;;  %v4367_v30 = vld [vmem:[%s5431_s1 + $0x7a0] sm:$0xff]  }
  0x8c   :  { %3802 = vmatpush3.bf16.msra.mxu0 %v4250_v34  ;;  %v3318_v34 = vcombine.low %v32_v31, %v32_v31 }
  0x8d   :  { %3824 = vmatpush3.bf16.msra.mxu1 %v4251_v35  ;;  %3803 = vmatprep.subr.bf16.mxu0 %v4252_v36  ;;  %v3319_v35 = vcombine.high %v32_v31, %v32_v31  ;;  %v4312_v36 = vld [vmem:[%s5431_s1 + $0x640] sm:$0xff]  }
  0x8e   :  { %3825 = vmatprep.subr.bf16.mxu1 %v4253_v37  ;;  %v4313_v37 = vld [vmem:[%s5431_s1 + $0x6c0] sm:$0xff]  }
  0x90   :  { %3804 = vmatpush3.bf16.msra.mxu0 %v4254_v38  ;;  %v4314_v38 = vld [vmem:[%s5431_s1 + $0x600] sm:$0xff]  }
  0x91   :  { %3826 = vmatpush3.bf16.msra.mxu1 %v4255_v39  ;;  %3805 = vmatprep.subr.bf16.mxu0 %v4256_v40  ;;  %v4315_v39 = vld [vmem:[%s5431_s1 + $0x680] sm:$0xff]   ;;  %v4316_v40 = vld [vmem:[%s5431_s1 + $0x648] sm:$0xff]  }
  0x92   :  { %3827 = vmatprep.subr.bf16.mxu1 %v4257_v41  ;;  %v4317_v41 = vld [vmem:[%s5431_s1 + $0x6c8] sm:$0xff]  }
  0x94   :  { %3806 = vmatpush3.bf16.msra.mxu0 %v4258_v42  ;;  %v4318_v42 = vld [vmem:[%s5431_s1 + $0x608] sm:$0xff]  }
  0x95   :  { %3828 = vmatpush3.bf16.msra.mxu1 %v4259_v43  ;;  %3807 = vmatprep.subr.bf16.mxu0 %v4260_v44  ;;  %v4319_v43 = vld [vmem:[%s5431_s1 + $0x688] sm:$0xff]   ;;  %v4320_v44 = vld [vmem:[%s5431_s1 + $0x650] sm:$0xff]  }
  0x96   :  { %3829 = vmatprep.subr.bf16.mxu1 %v4261_v45  ;;  %v4321_v45 = vld [vmem:[%s5431_s1 + $0x6d0] sm:$0xff]  }
  0x98   :  { %3808 = vmatpush3.bf16.msra.mxu0 %v4262_v46  ;;  %v4322_v46 = vld [vmem:[%s5431_s1 + $0x610] sm:$0xff]  }
  0x99   :  { %3830 = vmatpush3.bf16.msra.mxu1 %v4263_v47  ;;  %3809 = vmatprep.subr.bf16.mxu0 %v4264_v48  ;;  %v4323_v47 = vld [vmem:[%s5431_s1 + $0x690] sm:$0xff]   ;;  %v4324_v48 = vld [vmem:[%s5431_s1 + $0x658] sm:$0xff]  }
  0x9a   :  { %3831 = vmatprep.subr.bf16.mxu1 %v4265_v49  ;;  %v4325_v49 = vld [vmem:[%s5431_s1 + $0x6d8] sm:$0xff]  }
  0x9c   :  { %3810 = vmatpush3.bf16.msra.mxu0 %v4266_v50  ;;  %v4326_v50 = vld [vmem:[%s5431_s1 + $0x618] sm:$0xff]  }
  0x9d   :  { %3832 = vmatpush3.bf16.msra.mxu1 %v4267_v51  ;;  %3811 = vmatprep.subr.bf16.mxu0 %v4268_v52  ;;  %v4327_v51 = vld [vmem:[%s5431_s1 + $0x698] sm:$0xff]   ;;  %v4328_v52 = vld [vmem:[%s5431_s1 + $0x660] sm:$0xff]  }
  0x9e   :  { %3833 = vmatprep.subr.bf16.mxu1 %v4269_v53  ;;  %v4329_v53 = vld [vmem:[%s5431_s1 + $0x6e0] sm:$0xff]  }
  0xa0   :  { %3812 = vmatpush3.bf16.msra.mxu0 %v4270_v54  ;;  %v4330_v54 = vld [vmem:[%s5431_s1 + $0x620] sm:$0xff]  }
  0xa1   :  { %3834 = vmatpush3.bf16.msra.mxu1 %v4271_v55  ;;  %3841 = vmatprep.subr.bf16.mxu0 %v4276_v62  ;;  %v4331_v55 = vld [vmem:[%s5431_s1 + $0x6a0] sm:$0xff]   ;;  %v4338_v62 = vld [vmem:[%s5431_s1 + $0x630] sm:$0xff]  }
  0xa2   :  { %3863 = vmatprep.subr.bf16.mxu1 %v4277_v63  ;;  %v4339_v63 = vld [vmem:[%s5431_s1 + $0x6b0] sm:$0xff]  }
  0xa3   :  { %2829 = vmatmul.mubr.bf16.vlgmr.msra.gmra.mrb[16].mxu0 %v3312_v57  ;;  %v4333_v57 = vld [vmem:[%s5431_s1 + $0x6e8] sm:$0xff]  }
  0xa4   :  { %2869 = vmatmul.mubr.bf16.vlgmr.msra.gmra.mrb[16].mxu1 %v3314_v60  ;;  %3842 = vmatpush3.bf16.msra.mxu0 %v4278_v0  ;;  %v4336_v60 = vld [vmem:[%s5431_s1 + $0x670] sm:$0xff]   ;;  %v4340_v0 = vld [vmem:[%s5431_s1 + $0x678] sm:$0xff]  }
  0xa5   :  { %3864 = vmatpush3.bf16.msra.mxu1 %v4279_v1  ;;  %3843 = vmatprep.subr.bf16.mxu0 %v4280_v2  ;;  %v4341_v1 = vld [vmem:[%s5431_s1 + $0x6f8] sm:$0xff]  }
  0xa6   :  { %3865 = vmatprep.subr.bf16.mxu1 %v4281_v3  ;;  %2908 = vmatprep.mubr.bf16.mxu0 %v3317_v33  ;;  %v4342_v2 = vld [vmem:[%s5431_s1 + $0x638] sm:$0xff]  }
  0xa7   :  { %2948 = vmatprep.mubr.bf16.mxu1 %v3319_v35  ;;  %v4343_v3 = vld [vmem:[%s5431_s1 + $0x6b8] sm:$0xff]  }
  0xa8   :  { %3844 = vmatpush3.bf16.msra.mxu0 %v4282_v4  ;;  %v33_v4 = vld [vmem:[%s5432_s0 + $0x60] sm:$0xff] }
  0xa9   :  { %3866 = vmatpush3.bf16.msra.mxu1 %v4283_v5  ;;  %3845 = vmatprep.subr.bf16.mxu0 %v4284_v6  ;;  %v34_v5 = vld [vmem:[%s5432_s0 + $0x68] sm:$0xff]  ;;  %v3320_v6 = vcombine.low %v33_v4, %v33_v4 }
  0xaa   :  { %3867 = vmatprep.subr.bf16.mxu1 %v4285_v7  ;;  %v3321_v7 = vcombine.high %v33_v4, %v33_v4  ;;  %v4391_v4 = vld [vmem:[%s5431_s1 + $0x888] sm:$0xff]  }
  0xac   :  { %3846 = vmatpush3.bf16.msra.mxu0 %v4286_v8  ;;  %v3322_v8 = vcombine.low %v34_v5, %v34_v5 }
  0xad   :  { %3868 = vmatpush3.bf16.msra.mxu1 %v4287_v9  ;;  %3847 = vmatprep.subr.bf16.mxu0 %v4288_v10  ;;  %v4348_v9 = vld [vmem:[%s5431_s1 + $0x740] sm:$0xff]   ;;  %v3323_v10 = vcombine.high %v34_v5, %v34_v5  ;;  %v4392_v5 = vld [vmem:[%s5431_s1 + $0x850] sm:$0xff]  }
  0xae   :  { %3869 = vmatprep.subr.bf16.mxu1 %v4289_v11  ;;  %v4349_v11 = vld [vmem:[%s5431_s1 + $0x7c0] sm:$0xff]  }
  0xb0   :  { %3848 = vmatpush3.bf16.msra.mxu0 %v4290_v12  ;;  %v4350_v12 = vld [vmem:[%s5431_s1 + $0x700] sm:$0xff]  }
  0xb1   :  { %3870 = vmatpush3.bf16.msra.mxu1 %v4291_v13  ;;  %3849 = vmatprep.subr.bf16.mxu0 %v4292_v14  ;;  %v4351_v13 = vld [vmem:[%s5431_s1 + $0x780] sm:$0xff]   ;;  %v4352_v14 = vld [vmem:[%s5431_s1 + $0x748] sm:$0xff]  }
  0xb2   :  { %3871 = vmatprep.subr.bf16.mxu1 %v4293_v15  ;;  %v4353_v15 = vld [vmem:[%s5431_s1 + $0x7c8] sm:$0xff]  }
  0xb4   :  { %3850 = vmatpush3.bf16.msra.mxu0 %v4294_v16  ;;  %v4354_v16 = vld [vmem:[%s5431_s1 + $0x708] sm:$0xff]  }
  0xb5   :  { %3872 = vmatpush3.bf16.msra.mxu1 %v4295_v17  ;;  %3851 = vmatprep.subr.bf16.mxu0 %v4296_v18  ;;  %v4355_v17 = vld [vmem:[%s5431_s1 + $0x788] sm:$0xff]   ;;  %v4356_v18 = vld [vmem:[%s5431_s1 + $0x750] sm:$0xff]  }
  0xb6   :  { %3873 = vmatprep.subr.bf16.mxu1 %v4297_v19  ;;  %v4357_v19 = vld [vmem:[%s5431_s1 + $0x7d0] sm:$0xff]  }
  0xb8   :  { %3852 = vmatpush3.bf16.msra.mxu0 %v4298_v20  ;;  %v4358_v20 = vld [vmem:[%s5431_s1 + $0x710] sm:$0xff]  }
  0xb9   :  { %3874 = vmatpush3.bf16.msra.mxu1 %v4299_v21  ;;  %3853 = vmatprep.subr.bf16.mxu0 %v4300_v22  ;;  %v4359_v21 = vld [vmem:[%s5431_s1 + $0x790] sm:$0xff]   ;;  %v4360_v22 = vld [vmem:[%s5431_s1 + $0x758] sm:$0xff]  }
  0xba   :  { %3875 = vmatprep.subr.bf16.mxu1 %v4301_v23  ;;  %v4361_v23 = vld [vmem:[%s5431_s1 + $0x7d8] sm:$0xff]  }
  0xbc   :  { %3854 = vmatpush3.bf16.msra.mxu0 %v4302_v24  ;;  %v4362_v24 = vld [vmem:[%s5431_s1 + $0x718] sm:$0xff]  }
  0xbd   :  { %3876 = vmatpush3.bf16.msra.mxu1 %v4303_v25  ;;  %3855 = vmatprep.subr.bf16.mxu0 %v4304_v26  ;;  %v4363_v25 = vld [vmem:[%s5431_s1 + $0x798] sm:$0xff]   ;;  %v4364_v26 = vld [vmem:[%s5431_s1 + $0x760] sm:$0xff]  }
  0xbe   :  { %3877 = vmatprep.subr.bf16.mxu1 %v4305_v27  ;;  %v4365_v27 = vld [vmem:[%s5431_s1 + $0x7e0] sm:$0xff]  }
  0xc0   :  { %3856 = vmatpush3.bf16.msra.mxu0 %v4306_v28  ;;  %v4366_v28 = vld [vmem:[%s5431_s1 + $0x720] sm:$0xff]  }
  0xc1   :  { %3878 = vmatpush3.bf16.msra.mxu1 %v4307_v29  ;;  %3885 = vmatprep.subr.bf16.mxu0 %v4312_v36 }
  0xc2   :  { %3907 = vmatprep.subr.bf16.mxu1 %v4313_v37  ;;  %v4368_v37 = vld [vmem:[%s5431_s1 + $0x768] sm:$0xff]  }
  0xc3   :  { %2909 = vmatmul.mubr.bf16.vlgmr.msra.gmra.mrb[20].mxu0 %v3316_v32  ;;  %v3295_v32 = vld [vmem:[%s5433_s2] ss:$0 sm:$0xff] }
  0xc4   :  { %2949 = vmatmul.mubr.bf16.vlgmr.msra.gmra.mrb[20].mxu1 %v3318_v34  ;;  %3886 = vmatpush3.bf16.msra.mxu0 %v4314_v38 }
  0xc5   :  { %3908 = vmatpush3.bf16.msra.mxu1 %v4315_v39  ;;  %3887 = vmatprep.subr.bf16.mxu0 %v4316_v40  ;;  %v4369_v39 = vld [vmem:[%s5431_s1 + $0x7e8] sm:$0xff]  }
  0xc6   :  { %3909 = vmatprep.subr.bf16.mxu1 %v4317_v41  ;;  %2988 = vmatprep.mubr.bf16.mxu0 %v3321_v7  ;;  %v4394_v7 = vld [vmem:[%s5431_s1 + $0x810] sm:$0xff]  }
  0xc7   :  { %3028 = vmatprep.mubr.bf16.mxu1 %v3323_v10  ;;  %v4397_v10 = vld [vmem:[%s5431_s1 + $0x8d8] sm:$0xff]  }
  0xc8   :  { %3888 = vmatpush3.bf16.msra.mxu0 %v4318_v42  ;;  %v4370_v42 = vld [vmem:[%s5431_s1 + $0x728] sm:$0xff]  }
  0xc9   :  { %3910 = vmatpush3.bf16.msra.mxu1 %v4319_v43  ;;  %3889 = vmatprep.subr.bf16.mxu0 %v4320_v44  ;;  %v4371_v44 = vld [vmem:[%s5431_s1 + $0x7a8] sm:$0xff]  }
  0xca   :  { %3911 = vmatprep.subr.bf16.mxu1 %v4321_v45 }
  0xcc   :  { %3890 = vmatpush3.bf16.msra.mxu0 %v4322_v46 }
  0xcd   :  { %3912 = vmatpush3.bf16.msra.mxu1 %v4323_v47  ;;  %3891 = vmatprep.subr.bf16.mxu0 %v4324_v48  ;;  %v4372_v47 = vld [vmem:[%s5431_s1 + $0x770] sm:$0xff]  }
  0xce   :  { %3913 = vmatprep.subr.bf16.mxu1 %v4325_v49  ;;  %v4373_v48 = vld [vmem:[%s5431_s1 + $0x7f0] sm:$0xff]  }
  0xcf   :  { %v4374_v49 = vld [vmem:[%s5431_s1 + $0x730] sm:$0xff]  }
  0xd0   :  { %3892 = vmatpush3.bf16.msra.mxu0 %v4326_v50  ;;  %v4375_v50 = vld [vmem:[%s5431_s1 + $0x7b0] sm:$0xff]  }
  0xd1   :  { %3914 = vmatpush3.bf16.msra.mxu1 %v4327_v51  ;;  %3893 = vmatprep.subr.bf16.mxu0 %v4328_v52  ;;  %v4376_v51 = vld [vmem:[%s5431_s1 + $0x778] sm:$0xff]  }
  0xd2   :  { %3915 = vmatprep.subr.bf16.mxu1 %v4329_v53  ;;  %v4377_v52 = vld [vmem:[%s5431_s1 + $0x7f8] sm:$0xff]  }
  0xd3   :  { %v4378_v53 = vld [vmem:[%s5431_s1 + $0x738] sm:$0xff]  }
  0xd4   :  { %3894 = vmatpush3.bf16.msra.mxu0 %v4330_v54  ;;  %v4379_v54 = vld [vmem:[%s5431_s1 + $0x7b8] sm:$0xff]  }
  0xd5   :  { %3916 = vmatpush3.bf16.msra.mxu1 %v4331_v55  ;;  %3895 = vmatprep.subr.bf16.mxu0 %v4332_v56  ;;  %v35_v55 = vld [vmem:[%s5432_s0 + $0x70] sm:$0xff]  ;;  %v36_v56 = vld [vmem:[%s5432_s0 + $0x78] sm:$0xff] }
  0xd6   :  { %3917 = vmatprep.subr.bf16.mxu1 %v4333_v57  ;;  %v3324_v57 = vcombine.low %v35_v55, %v35_v55 }
  0xd8   :  { %3896 = vmatpush3.bf16.msra.mxu0 %v4334_v58  ;;  %v3325_v58 = vcombine.high %v35_v55, %v35_v55 }
  0xd9   :  { %3918 = vmatpush3.bf16.msra.mxu1 %v4335_v59  ;;  %3897 = vmatprep.subr.bf16.mxu0 %v4336_v60  ;;  %v3326_v59 = vcombine.low %v36_v56, %v36_v56  ;;  %v3327_v60 = vcombine.high %v36_v56, %v36_v56 }
  0xda   :  { %3919 = vmatprep.subr.bf16.mxu1 %v4337_v61  ;;  %v4384_v61 = vld [vmem:[%s5431_s1 + $0x840] sm:$0xff]  }
  0xdc   :  { %3898 = vmatpush3.bf16.msra.mxu0 %v4338_v62  ;;  %v4385_v62 = vld [vmem:[%s5431_s1 + $0x8c0] sm:$0xff]  }
  0xdd   :  { %3920 = vmatpush3.bf16.msra.mxu1 %v4339_v63  ;;  %3899 = vmatprep.subr.bf16.mxu0 %v4340_v0  ;;  %v4386_v63 = vld [vmem:[%s5431_s1 + $0x800] sm:$0xff]  }
  0xde   :  { %3921 = vmatprep.subr.bf16.mxu1 %v4341_v1  ;;  %v4387_v0 = vld [vmem:[%s5431_s1 + $0x880] sm:$0xff]   ;;  %v4388_v1 = vld [vmem:[%s5431_s1 + $0x848] sm:$0xff]  }
  0xe0   :  { %3900 = vmatpush3.bf16.msra.mxu0 %v4342_v2  ;;  %v4389_v2 = vld [vmem:[%s5431_s1 + $0x8c8] sm:$0xff]  }
  0xe1   :  { %3922 = vmatpush3.bf16.msra.mxu1 %v4343_v3  ;;  %3929 = vmatprep.subr.bf16.mxu0 %v4348_v9  ;;  %v4390_v3 = vld [vmem:[%s5431_s1 + $0x808] sm:$0xff]   ;;  %v4396_v9 = vld [vmem:[%s5431_s1 + $0x858] sm:$0xff]  }
  0xe2   :  { %3951 = vmatprep.subr.bf16.mxu1 %v4349_v11  ;;  %v4398_v11 = vld [vmem:[%s5431_s1 + $0x818] sm:$0xff]  }
  0xe3   :  { %2989 = vmatmul.mubr.bf16.vlgmr.msra.gmra.mrb[24].mxu0 %v3320_v6  ;;  %v4393_v6 = vld [vmem:[%s5431_s1 + $0x8d0] sm:$0xff]  }
  0xe4   :  { %3029 = vmatmul.mubr.bf16.vlgmr.msra.gmra.mrb[24].mxu1 %v3322_v8  ;;  %3930 = vmatpush3.bf16.msra.mxu0 %v4350_v12  ;;  %v4395_v8 = vld [vmem:[%s5431_s1 + $0x890] sm:$0xff]   ;;  %v4399_v12 = vld [vmem:[%s5431_s1 + $0x898] sm:$0xff]  }
  0xe5   :  { %3952 = vmatpush3.bf16.msra.mxu1 %v4351_v13  ;;  %3931 = vmatprep.subr.bf16.mxu0 %v4352_v14  ;;  %v4400_v13 = vld [vmem:[%s5431_s1 + $0x860] sm:$0xff]  }
  0xe6   :  { %3953 = vmatprep.subr.bf16.mxu1 %v4353_v15  ;;  %3068 = vmatprep.mubr.bf16.mxu0 %v3325_v58  ;;  %v4401_v14 = vld [vmem:[%s5431_s1 + $0x8e0] sm:$0xff]  }
  0xe7   :  { %3108 = vmatprep.mubr.bf16.mxu1 %v3327_v60  ;;  %v4402_v15 = vld [vmem:[%s5431_s1 + $0x820] sm:$0xff]  }
  0xe8   :  { %3932 = vmatpush3.bf16.msra.mxu0 %v4354_v16 }
  0xe9   :  { %3954 = vmatpush3.bf16.msra.mxu1 %v4355_v17  ;;  %3933 = vmatprep.subr.bf16.mxu0 %v4356_v18  ;;  %v4403_v17 = vld [vmem:[%s5431_s1 + $0x8a0] sm:$0xff]  }
  0xea   :  { %3955 = vmatprep.subr.bf16.mxu1 %v4357_v19 }
  0xec   :  { %3934 = vmatpush3.bf16.msra.mxu0 %v4358_v20 }
  0xed   :  { %3956 = vmatpush3.bf16.msra.mxu1 %v4359_v21  ;;  %3935 = vmatprep.subr.bf16.mxu0 %v4360_v22 }
  0xee   :  { %3957 = vmatprep.subr.bf16.mxu1 %v4361_v23  ;;  %v4404_v23 = vld [vmem:[%s5431_s1 + $0x868] sm:$0xff]  }
  0xf0   :  { %3936 = vmatpush3.bf16.msra.mxu0 %v4362_v24 }
  0xf1   :  { %3958 = vmatpush3.bf16.msra.mxu1 %v4363_v25  ;;  %3937 = vmatprep.subr.bf16.mxu0 %v4364_v26  ;;  %v4405_v25 = vld [vmem:[%s5431_s1 + $0x8e8] sm:$0xff]  }
  0xf2   :  { %3959 = vmatprep.subr.bf16.mxu1 %v4365_v27 }
  0xf4   :  { %3938 = vmatpush3.bf16.msra.mxu0 %v4366_v28  ;;  %v4406_v28 = vld [vmem:[%s5431_s1 + $0x828] sm:$0xff]  }
  0xf5   :  { %3960 = vmatpush3.bf16.msra.mxu1 %v4367_v30  ;;  %3939 = vmatprep.subr.bf16.mxu0 %v4368_v37  ;;  %v4407_v30 = vld [vmem:[%s5431_s1 + $0x8a8] sm:$0xff]   ;;  %v4412_v37 = vld [vmem:[%s5431_s1 + $0x878] sm:$0xff]  }
  0xf6   :  { %v3637_v29 = vpop.f32.mrb[0].mxu0  ;;  %3961 = vmatprep.subr.bf16.mxu1 %v4369_v39  ;;  %v4414_v39 = vld [vmem:[%s5431_s1 + $0x838] sm:$0xff]  }
  0xf7   :  { %v3659_v31 = vpop.f32.mrb[0].mxu1  ;;  %v3638_v33 = vpop.f32.mrb[1].mxu0 }
  0xf8   :  { %v3660_v34 = vpop.f32.mrb[1].mxu1  ;;  %v3639_v35 = vadd.f32 %v3638_v33, %v3637_v29  ;;  %v3640_v38 = vpop.f32.mrb[2].mxu0  ;;  %3940 = vmatpush3.bf16.msra.mxu0 %v4370_v42  ;;  %v4408_v33 = vld [vmem:[%s5431_s1 + $0x870] sm:$0xff]   ;;  %v38_v42 = vld [vmem:[%s5432_s0 + $0x88] sm:$0xff] }
  0xf9   :  { %v3661_v36 = vadd.f32 %v3660_v34, %v3659_v31  ;;  %v3662_v40 = vpop.f32.mrb[2].mxu1  ;;  %v3641_v43 = vpop.f32.mrb[3].mxu0  ;;  %3962 = vmatpush3.bf16.msra.mxu1 %v4371_v44  ;;  %3941 = vmatprep.subr.bf16.mxu0 %v4372_v47  ;;  %v4409_v34 = vld [vmem:[%s5431_s1 + $0x8f0] sm:$0xff]   ;;  %v4413_v38 = vld [vmem:[%s5431_s1 + $0x8f8] sm:$0xff]  }
  0xfa   :  { %v2511_v41 = vadd.f32 %v3639_v35, %v3295_v32  ;;  %v3663_v45 = vpop.f32.mrb[3].mxu1  ;;  %3963 = vmatprep.subr.bf16.mxu1 %v4373_v48  ;;  %v4410_v35 = vld [vmem:[%s5431_s1 + $0x830] sm:$0xff]   ;;  %v4415_v40 = vld [vmem:[%s5431_s1 + $0x8b8] sm:$0xff]  }
  0xfb   :  { %v3330_v45 = vcombine.low %v38_v42, %v38_v42 }
  0xfc   :  { %v5242_v46 = vadd.f32 %v3661_v36, %v2511_v41  ;;  %3942 = vmatpush3.bf16.msra.mxu0 %v4374_v49  ;;  %v4411_v36 = vld [vmem:[%s5431_s1 + $0x8b0] sm:$0xff]   ;;  %v37_v41 = vld [vmem:[%s5432_s0 + $0x80] sm:$0xff] }
  0xfd   :  { %3964 = vmatpush3.bf16.msra.mxu1 %v4375_v50  ;;  %3943 = vmatprep.subr.bf16.mxu0 %v4376_v51  ;;  %v3328_v43 = vcombine.low %v37_v41, %v37_v41  ;;  %v3329_v44 = vcombine.high %v37_v41, %v37_v41  ;;  %v3211_v41 = vld [vmem:[%s5434_s3 + $0x70] sm:$0xff] }
  0xfe   :  { %3965 = vmatprep.subr.bf16.mxu1 %v4377_v52 }
 0x100   :  { %3944 = vmatpush3.bf16.msra.mxu0 %v4378_v53 }
 0x101   :  { %3966 = vmatpush3.bf16.msra.mxu1 %v4379_v54  ;;  %3973 = vmatprep.subr.bf16.mxu0 %v4384_v61 }
 0x102   :  { %3995 = vmatprep.subr.bf16.mxu1 %v4385_v62 }
 0x103   :  { %3069 = vmatmul.mubr.bf16.vlgmr.msra.gmra.mrb[28].mxu0 %v3324_v57 }
 0x104   :  { %3109 = vmatmul.mubr.bf16.vlgmr.msra.gmra.mrb[28].mxu1 %v3326_v59  ;;  %3974 = vmatpush3.bf16.msra.mxu0 %v4386_v63 }
 0x105   :  { %3996 = vmatpush3.bf16.msra.mxu1 %v4387_v0  ;;  %3975 = vmatprep.subr.bf16.mxu0 %v4388_v1 }
 0x106   :  { %3997 = vmatprep.subr.bf16.mxu1 %v4389_v2  ;;  %3148 = vmatprep.mubr.bf16.mxu0 %v3329_v44  ;;  %v4422_v44 = vmov 0.0  }
 0x108   :  { %3976 = vmatpush3.bf16.msra.mxu0 %v4390_v3 }
 0x109   :  { %3998 = vmatpush3.bf16.msra.mxu1 %v4391_v4  ;;  %3977 = vmatprep.subr.bf16.mxu0 %v4392_v5 }
 0x10a   :  { %3999 = vmatprep.subr.bf16.mxu1 %v4393_v6 }
 0x10c   :  { %3978 = vmatpush3.bf16.msra.mxu0 %v4394_v7  ;;  %v4420_v7 = vmov 0.0|0.0  }
 0x10d   :  { %4000 = vmatpush3.bf16.msra.mxu1 %v4395_v8  ;;  %3979 = vmatprep.subr.bf16.mxu0 %v4396_v9  ;;  %v3197_v8 = vld [vmem:[%s5434_s3] sm:$0xff]  ;;  %v3198_v9 = vld [vmem:[%s5434_s3 + $0x8] sm:$0xff] }
 0x10e   :  { %4001 = vmatprep.subr.bf16.mxu1 %v4397_v10  ;;  %v3199_v10 = vld [vmem:[%s5434_s3 + $0x10] sm:$0xff] }
 0x110   :  { %3980 = vmatpush3.bf16.msra.mxu0 %v4398_v11  ;;  %v4070_v11 = vpack.c.bf16 %v3198_v9, %v3197_v8 }
 0x111   :  { %4002 = vmatpush3.bf16.msra.mxu1 %v4399_v12  ;;  %3981 = vmatprep.subr.bf16.mxu0 %v4400_v13  ;;  %v3200_v12 = vld [vmem:[%s5434_s3 + $0x18] sm:$0xff] }
 0x112   :  { %4003 = vmatprep.subr.bf16.mxu1 %v4401_v14  ;;  %v4073_v13 = vpack.c.bf16 %v3200_v12, %v3199_v10  ;;  %v3201_v14 = vld [vmem:[%s5434_s3 + $0x20] sm:$0xff] }
 0x114   :  { %3982 = vmatpush3.bf16.msra.mxu0 %v4402_v15  ;;  %v3202_v15 = vld [vmem:[%s5434_s3 + $0x28] sm:$0xff] }
 0x115   :  { %4004 = vmatpush3.bf16.msra.mxu1 %v4403_v17  ;;  %3983 = vmatprep.subr.bf16.mxu0 %v4404_v23  ;;  %v3203_v17 = vld [vmem:[%s5434_s3 + $0x30] sm:$0xff] }
 0x116   :  { %v3681_v16 = vpop.f32.mrb[4].mxu0  ;;  %4005 = vmatprep.subr.bf16.mxu1 %v4405_v25  ;;  %v3207_v23 = vld [vmem:[%s5434_s3 + $0x50] sm:$0xff] }
 0x117   :  { %v3703_v18 = vpop.f32.mrb[4].mxu1  ;;  %v3682_v19 = vpop.f32.mrb[5].mxu0 }
 0x118   :  { %v3704_v20 = vpop.f32.mrb[5].mxu1  ;;  %v3683_v21 = vadd.f32 %v3682_v19, %v3681_v16  ;;  %v3684_v24 = vpop.f32.mrb[6].mxu0  ;;  %3984 = vmatpush3.bf16.msra.mxu0 %v4406_v28  ;;  %v4076_v16 = vpack.c.bf16 %v3202_v15, %v3201_v14 }
 0x119   :  { %v3705_v22 = vadd.f32 %v3704_v20, %v3703_v18  ;;  %v3706_v26 = vpop.f32.mrb[6].mxu1  ;;  %v3685_v29 = vpop.f32.mrb[7].mxu0  ;;  %4006 = vmatpush3.bf16.msra.mxu1 %v4407_v30  ;;  %3985 = vmatprep.subr.bf16.mxu0 %v4408_v33  ;;  %v3204_v18 = vld [vmem:[%s5434_s3 + $0x38] sm:$0xff]  ;;  %v3205_v20 = vld [vmem:[%s5434_s3 + $0x40] sm:$0xff] }
 0x11a   :  { %v2591_v27 = vadd.f32 %v3683_v21, %v5242_v46  ;;  %v3707_v31 = vpop.f32.mrb[7].mxu1  ;;  %4007 = vmatprep.subr.bf16.mxu1 %v4409_v34  ;;  %v3331_v46 = vcombine.high %v38_v42, %v38_v42  ;;  %v4079_v19 = vpack.c.bf16 %v3204_v18, %v3203_v17  ;;  %v3206_v21 = vld [vmem:[%s5434_s3 + $0x48] sm:$0xff]  ;;  %v3208_v24 = vld [vmem:[%s5434_s3 + $0x58] sm:$0xff] }
 0x11b   :  { %v4085_v25 = vpack.c.bf16 %v3208_v24, %v3207_v23  ;;  %v3212_v42 = vld [vmem:[%s5434_s3 + $0x78] sm:$0xff] }
 0x11c   :  { %v2631_v32 = vadd.f32 %v3705_v22, %v2591_v27  ;;  %3986 = vmatpush3.bf16.msra.mxu0 %v4410_v35  ;;  %3188 = vmatprep.mubr.bf16.mxu1 %v3331_v46  ;;  %v4082_v22 = vpack.c.bf16 %v3206_v21, %v3205_v20 }
 0x11d   :  { %4008 = vmatpush3.bf16.msra.mxu1 %v4411_v36  ;;  %3987 = vmatprep.subr.bf16.mxu0 %v4412_v37  ;;  %v3209_v37 = vld [vmem:[%s5434_s3 + $0x60] sm:$0xff] }
 0x11e   :  { %4009 = vmatprep.subr.bf16.mxu1 %v4413_v38  ;;  %v3210_v38 = vld [vmem:[%s5434_s3 + $0x68] sm:$0xff] }
 0x120   :  { %3988 = vmatpush3.bf16.msra.mxu0 %v4414_v39  ;;  %v4088_v39 = vpack.c.bf16 %v3210_v38, %v3209_v37 }
 0x121   :  { %4010 = vmatpush3.bf16.msra.mxu1 %v4415_v40  ;;  %4069 = vmatprep.subr.bf16.mxu0 %v4420_v7 }
 0x123   :  { %3149 = vmatmul.mubr.bf16.vlgmr.msra.gmra.mrb[32].mxu0 %v3328_v43  ;;  %v4091_v43 = vpack.c.bf16 %v3212_v42, %v3211_v41 }
 0x124   :  { %3189 = vmatmul.mubr.bf16.vlgmr.msra.gmra.mrb[32].mxu1 %v3330_v45  ;;  %4071 = vmatpush3.bf16.msra.mxu0 %v4070_v11 }
 0x125   :  { %4072 = vmatprep.subr.bf16.mxu0 %v4420_v7  ;;  %4066 = vmatprep.mubr.msk.f32.mxu0 %vm4421_vm0, %v4422_v44 }
 0x128   :  { %4074 = vmatpush3.bf16.msra.mxu0 %v4073_v13 }
 0x129   :  { %4075 = vmatprep.subr.bf16.mxu0 %v4420_v7 }
 0x12c   :  { %4077 = vmatpush3.bf16.msra.mxu0 %v4076_v16 }
 0x12d   :  { %4078 = vmatprep.subr.bf16.mxu0 %v4420_v7 }
 0x130   :  { %4080 = vmatpush3.bf16.msra.mxu0 %v4079_v19 }
 0x131   :  { %4081 = vmatprep.subr.bf16.mxu0 %v4420_v7 }
 0x134   :  { %4083 = vmatpush3.bf16.msra.mxu0 %v4082_v22 }
 0x135   :  { %4084 = vmatprep.subr.bf16.mxu0 %v4420_v7 }
 0x136   :  { %v3725_v47 = vpop.f32.mrb[8].mxu0 }
 0x137   :  { %v3747_v48 = vpop.f32.mrb[8].mxu1  ;;  %v3726_v49 = vpop.f32.mrb[9].mxu0 }
 0x138   :  { %v3727_v50 = vadd.f32 %v3726_v49, %v3725_v47  ;;  %v3748_v51 = vpop.f32.mrb[9].mxu1  ;;  %v3728_v52 = vpop.f32.mrb[10].mxu0  ;;  %4086 = vmatpush3.bf16.msra.mxu0 %v4085_v25 }
 0x139   :  { %v3749_v53 = vadd.f32 %v3748_v51, %v3747_v48  ;;  %v3750_v54 = vpop.f32.mrb[10].mxu1  ;;  %v3729_v55 = vpop.f32.mrb[11].mxu0  ;;  %4087 = vmatprep.subr.bf16.mxu0 %v4420_v7 }
 0x13a   :  { %v2671_v56 = vadd.f32 %v3727_v50, %v2631_v32  ;;  %v3751_v57 = vpop.f32.mrb[11].mxu1 }
 0x13c   :  { %v2711_v58 = vadd.f32 %v3749_v53, %v2671_v56  ;;  %4089 = vmatpush3.bf16.msra.mxu0 %v4088_v39 }
 0x13d   :  { %4090 = vmatprep.subr.bf16.mxu0 %v4420_v7 }
 0x140   :  { %4092 = vmatpush3.bf16.msra.mxu0 %v4091_v43 }
 0x156   :  { %v3769_v59 = vpop.f32.mrb[12].mxu0 }
 0x157   :  { %v3791_v60 = vpop.f32.mrb[12].mxu1  ;;  %v3770_v61 = vpop.f32.mrb[13].mxu0 }
 0x158   :  { %v3771_v62 = vadd.f32 %v3770_v61, %v3769_v59  ;;  %v3792_v63 = vpop.f32.mrb[13].mxu1  ;;  %v3772_v0 = vpop.f32.mrb[14].mxu0 }
 0x159   :  { %v3793_v1 = vadd.f32 %v3792_v63, %v3791_v60  ;;  %v3794_v2 = vpop.f32.mrb[14].mxu1  ;;  %v3773_v3 = vpop.f32.mrb[15].mxu0 }
 0x15a   :  { %v2751_v4 = vadd.f32 %v3771_v62, %v2711_v58  ;;  %v3795_v5 = vpop.f32.mrb[15].mxu1 }
 0x15c   :  { %v2791_v6 = vadd.f32 %v3793_v1, %v2751_v4 }
 0x176   :  { %v3813_v26 = vpop.f32.mrb[16].mxu0 }
 0x177   :  { %v3835_v27 = vpop.f32.mrb[16].mxu1  ;;  %v3814_v28 = vpop.f32.mrb[17].mxu0 }
 0x178   :  { %v3836_v29 = vpop.f32.mrb[17].mxu1  ;;  %v3815_v30 = vadd.f32 %v3814_v28, %v3813_v26  ;;  %v3816_v32 = vpop.f32.mrb[18].mxu0 }
 0x179   :  { %v3837_v31 = vadd.f32 %v3836_v29, %v3835_v27  ;;  %v3838_v33 = vpop.f32.mrb[18].mxu1  ;;  %v3817_v34 = vpop.f32.mrb[19].mxu0 }
 0x17a   :  { %v3839_v35 = vpop.f32.mrb[19].mxu1  ;;  %v2831_v36 = vadd.f32 %v3815_v30, %v2791_v6  ;;  %v3620_v30 = vld [vmem:[%s5435_s4] ss:$0 sm:$0xff] }
 0x17c   :  { %v2871_v40 = vadd.f32 %v3837_v31, %v2831_v36 }
 0x196   :  { %v3857_v45 = vpop.f32.mrb[20].mxu0 }
 0x197   :  { %v3879_v46 = vpop.f32.mrb[20].mxu1  ;;  %v3858_v47 = vpop.f32.mrb[21].mxu0 }
 0x198   :  { %v3859_v48 = vadd.f32 %v3858_v47, %v3857_v45  ;;  %v3880_v49 = vpop.f32.mrb[21].mxu1  ;;  %v3860_v50 = vpop.f32.mrb[22].mxu0 }
 0x199   :  { %v3881_v51 = vadd.f32 %v3880_v49, %v3879_v46  ;;  %v3882_v52 = vpop.f32.mrb[22].mxu1  ;;  %v3861_v53 = vpop.f32.mrb[23].mxu0 }
 0x19a   :  { %v2911_v54 = vadd.f32 %v3859_v48, %v2871_v40  ;;  %v3883_v55 = vpop.f32.mrb[23].mxu1 }
 0x19c   :  { %v2951_v56 = vadd.f32 %v3881_v51, %v2911_v54 }
 0x1b6   :  { %v3901_v57 = vpop.f32.mrb[24].mxu0 }
 0x1b7   :  { %v3923_v58 = vpop.f32.mrb[24].mxu1  ;;  %v3902_v59 = vpop.f32.mrb[25].mxu0 }
 0x1b8   :  { %v3903_v60 = vadd.f32 %v3902_v59, %v3901_v57  ;;  %v3924_v61 = vpop.f32.mrb[25].mxu1  ;;  %v3904_v62 = vpop.f32.mrb[26].mxu0 }
 0x1b9   :  { %v3925_v63 = vadd.f32 %v3924_v61, %v3923_v58  ;;  %v3926_v0 = vpop.f32.mrb[26].mxu1  ;;  %v3905_v1 = vpop.f32.mrb[27].mxu0 }
 0x1ba   :  { %v2991_v2 = vadd.f32 %v3903_v60, %v2951_v56  ;;  %v3927_v3 = vpop.f32.mrb[27].mxu1 }
 0x1bc   :  { %v3031_v4 = vadd.f32 %v3925_v63, %v2991_v2 }
 0x1d6   :  { %v3945_v5 = vpop.f32.mrb[28].mxu0 }
 0x1d7   :  { %v3967_v6 = vpop.f32.mrb[28].mxu1  ;;  %v3946_v7 = vpop.f32.mrb[29].mxu0 }
 0x1d8   :  { %v3947_v8 = vadd.f32 %v3946_v7, %v3945_v5  ;;  %v3968_v9 = vpop.f32.mrb[29].mxu1  ;;  %v3948_v10 = vpop.f32.mrb[30].mxu0 }
 0x1d9   :  { %v3969_v11 = vadd.f32 %v3968_v9, %v3967_v6  ;;  %v3970_v12 = vpop.f32.mrb[30].mxu1  ;;  %v3949_v13 = vpop.f32.mrb[31].mxu0 }
 0x1da   :  { %v3071_v14 = vadd.f32 %v3947_v8, %v3031_v4  ;;  %v3971_v15 = vpop.f32.mrb[31].mxu1 }
 0x1dc   :  { %v3111_v16 = vadd.f32 %v3969_v11, %v3071_v14 }
 0x1f6   :  { %v3989_v17 = vpop.f32.mrb[32].mxu0 }
 0x1f7   :  { %v4011_v18 = vpop.f32.mrb[32].mxu1  ;;  %v3990_v19 = vpop.f32.mrb[33].mxu0 }
 0x1f8   :  { %v3991_v20 = vadd.f32 %v3990_v19, %v3989_v17  ;;  %v4012_v21 = vpop.f32.mrb[33].mxu1  ;;  %v3992_v22 = vpop.f32.mrb[34].mxu0 }
 0x1f9   :  { %v4013_v23 = vadd.f32 %v4012_v21, %v4011_v18  ;;  %v4014_v24 = vpop.f32.mrb[34].mxu1  ;;  %v3993_v25 = vpop.f32.mrb[35].mxu0 }
 0x1fa   :  { %v3151_v26 = vadd.f32 %v3991_v20, %v3111_v16  ;;  %v4015_v27 = vpop.f32.mrb[35].mxu1 }
 0x1fc   :  { %v3191_v28 = vadd.f32 %v4013_v23, %v3151_v26 }
 0x1fe   :  { %v3196_v29 = vmax.f32 %v3191_v28, 0.0 }
 0x200   :  { %4067 = vmatmul.mubr.f32.vlgmr.msra.gmra.mrb[36].mxu0 %v3196_v29 }
 0x2d3   :  { %v3286_v31 = vpop.f32.mrb[36].mxu0 }
 0x2d4   :  { %v3287_v32 = vadd.f32 %v3620_v30, %v3286_v31  ;;  %v4068_v33 = vpop.f32.mrb[37].mxu0 }
 0x2d6   :  { %3290 = vst [vmem:[%s5436_s5] sm:$0xff] %v3287_v32 }

</bundles_post_ra>
